<compile_context>
chip_gen: v7x
topology: tpu7x:2x2x1
jax: 0.10.0
libtpu: 0.0.40
codegen_flags: <defaults>
</compile_context>

<pallas_src>
import functools

import jax
import jax.numpy as jnp
from jax.experimental import pallas as pl
from jax.experimental.pallas import tpu as pltpu

LANE = 128
VMEM_LIMIT = 32 * 1024 * 1024


# ----------------------------------------------------------------------------
# small helpers
# ----------------------------------------------------------------------------
def _round_up_lane(c):
    return max(LANE, ((c + LANE - 1) // LANE) * LANE)


def _row_tile(m, max_tile=256):
    # largest row-tile (multiple of 8) <= max_tile that divides m exactly
    for t in (256, 128, 64, 32, 16, 8):
        if t <= max_tile and m % t == 0:
            return t
    return m


def _pad_channels(x, c_target):
    c = x.shape[-1]
    if c == c_target:
        return x
    pad = [(0, 0)] * (x.ndim - 1) + [(0, c_target - c)]
    return jnp.pad(x, pad)


# ----------------------------------------------------------------------------
# Pallas kernels
# ----------------------------------------------------------------------------
def _mm_bn_kernel(x_ref, w_ref, s_ref, b_ref, o_ref, *, relu):
    # y = (x @ w) * scale + bias  (+ optional ReLU); bf16 MXU, f32 accumulation
    y = jnp.dot(x_ref[...].astype(jnp.bfloat16), w_ref[...],
                preferred_element_type=jnp.float32)
    y = y * s_ref[...] + b_ref[...]
    if relu:
        y = jnp.maximum(y, 0.0)
    o_ref[...] = y


def _conv3x3_bn_relu_kernel(x_ref, w_ref, s_ref, b_ref, o_ref):
    # 3x3 conv, stride 1, input pre-padded by 1, + folded BN + ReLU.
    # x_ref: (1, H+2, W+2, Cin)  w_ref: (9, Cin, Cout)  o_ref: (1, H*W, Cout)
    _, hp, wp, cin = x_ref.shape
    h, w = hp - 2, wp - 2
    cout = w_ref.shape[2]
    acc = jnp.zeros((h * w, cout), jnp.float32)
    for kh in range(3):
        for kw in range(3):
            win = x_ref[0, kh:kh + h, kw:kw + w, :].reshape(h * w, cin)
            acc = acc + jnp.dot(win.astype(jnp.bfloat16), w_ref[kh * 3 + kw],
                                preferred_element_type=jnp.float32)
    y = acc * s_ref[...] + b_ref[...]
    o_ref[0] = jnp.maximum(y, 0.0)


def _mm_bn_psum_kernel(x_ref, w_ref, s_ref, b_ref, o_ref, psum_ref):
    # conv3 + BN, plus per-tile channel sums for the SE squeeze (global pool).
    y = jnp.dot(x_ref[0].astype(jnp.bfloat16), w_ref[...],
                preferred_element_type=jnp.float32)
    y = y * s_ref[...] + b_ref[...]
    o_ref[0] = y
    psum_ref[0] = jnp.sum(y, axis=0, keepdims=True)


def _se_gate_kernel(psum_ref, w1_ref, w2_ref, o_ref, *, inv_hw):
    # finish global avg pool -> fc (no bias) -> ReLU -> fc (no bias) -> sigmoid
    pooled = jnp.sum(psum_ref[...], axis=1) * inv_hw                     # (N, C)
    hid = jnp.maximum(jnp.dot(pooled, w1_ref[...],
                              preferred_element_type=jnp.float32), 0.0)
    o_ref[...] = jax.nn.sigmoid(jnp.dot(hid, w2_ref[...],
                                        preferred_element_type=jnp.float32))


def _se_residual_relu_kernel(y_ref, g_ref, r_ref, o_ref):
    # out = relu(y * gate + residual)   (SE rescale + skip + final ReLU fused)
    y = y_ref[0] * g_ref[0] + r_ref[0]
    o_ref[0] = jnp.maximum(y, 0.0)


# ----------------------------------------------------------------------------
# Pallas wrappers
# ----------------------------------------------------------------------------
def conv1x1_bn(x2d, w, scale, bias, relu):
    m, k = x2d.shape
    n = w.shape[1]
    tm = _row_tile(m)
    return pl.pallas_call(
        functools.partial(_mm_bn_kernel, relu=relu),
        out_shape=jax.ShapeDtypeStruct((m, n), jnp.float32),
        grid=(m // tm,),
        in_specs=[pl.BlockSpec((tm, k), lambda i: (i, 0)),
                  pl.BlockSpec((k, n), lambda i: (0, 0)),
                  pl.BlockSpec((1, n), lambda i: (0, 0)),
                  pl.BlockSpec((1, n), lambda i: (0, 0))],
        out_specs=pl.BlockSpec((tm, n), lambda i: (i, 0)),
        compiler_params=pltpu.CompilerParams(
            dimension_semantics=("parallel",), vmem_limit_bytes=VMEM_LIMIT),
    )(x2d, w, scale, bias)


def conv3x3_bn_relu(xp, w9, scale, bias):
    nb, hp, wp, cin = xp.shape
    h, w = hp - 2, wp - 2
    cout = w9.shape[2]
    # TODO(synk): for large spatial inputs this should also tile H with a halo
    #             (manual DMA); one image per grid step is plenty at these sizes.
    return pl.pallas_call(
        _conv3x3_bn_relu_kernel,
        out_shape=jax.ShapeDtypeStruct((nb, h * w, cout), jnp.float32),
        grid=(nb,),
        in_specs=[pl.BlockSpec((1, hp, wp, cin), lambda n: (n, 0, 0, 0)),
                  pl.BlockSpec((9, cin, cout), lambda n: (0, 0, 0)),
                  pl.BlockSpec((1, cout), lambda n: (0, 0)),
                  pl.BlockSpec((1, cout), lambda n: (0, 0))],
        out_specs=pl.BlockSpec((1, h * w, cout), lambda n: (n, 0, 0)),
        compiler_params=pltpu.CompilerParams(
            dimension_semantics=("parallel",), vmem_limit_bytes=VMEM_LIMIT),
    )(xp, w9, scale, bias)


def conv1x1_bn_psum(x3d, w, scale, bias):
    nb, hw, k = x3d.shape
    c = w.shape[1]
    tm = _row_tile(hw)
    t = hw // tm
    return pl.pallas_call(
        _mm_bn_psum_kernel,
        out_shape=(jax.ShapeDtypeStruct((nb, hw, c), jnp.float32),
                   jax.ShapeDtypeStruct((nb, t, c), jnp.float32)),
        grid=(nb, t),
        in_specs=[pl.BlockSpec((1, tm, k), lambda n, i: (n, i, 0)),
                  pl.BlockSpec((k, c), lambda n, i: (0, 0)),
                  pl.BlockSpec((1, c), lambda n, i: (0, 0)),
                  pl.BlockSpec((1, c), lambda n, i: (0, 0))],
        out_specs=(pl.BlockSpec((1, tm, c), lambda n, i: (n, i, 0)),
                   pl.BlockSpec((1, 1, c), lambda n, i: (n, i, 0))),
        compiler_params=pltpu.CompilerParams(
            dimension_semantics=("parallel", "parallel"),
            vmem_limit_bytes=VMEM_LIMIT),
    )(x3d, w, scale, bias)


def se_gate(psum, w1, w2, inv_hw):
    nb, t, c = psum.shape
    r = w1.shape[1]
    return pl.pallas_call(
        functools.partial(_se_gate_kernel, inv_hw=inv_hw),
        out_shape=jax.ShapeDtypeStruct((nb, c), jnp.float32),
        grid=(1,),
        in_specs=[pl.BlockSpec((nb, t, c), lambda i: (0, 0, 0)),
                  pl.BlockSpec((c, r), lambda i: (0, 0)),
                  pl.BlockSpec((r, c), lambda i: (0, 0))],
        out_specs=pl.BlockSpec((nb, c), lambda i: (0, 0)),
    )(psum, w1, w2)


def se_scale_residual_relu(y3, gate3, res):
    nb, hw, c = y3.shape
    tm = _row_tile(hw)
    t = hw // tm
    return pl.pallas_call(
        _se_residual_relu_kernel,
        out_shape=jax.ShapeDtypeStruct((nb, hw, c), jnp.float32),
        grid=(nb, t),
        in_specs=[pl.BlockSpec((1, tm, c), lambda n, i: (n, i, 0)),
                  pl.BlockSpec((1, 1, c), lambda n, i: (n, 0, 0)),
                  pl.BlockSpec((1, tm, c), lambda n, i: (n, i, 0))],
        out_specs=pl.BlockSpec((1, tm, c), lambda n, i: (n, i, 0)),
        compiler_params=pltpu.CompilerParams(
            dimension_semantics=("parallel", "parallel"),
            vmem_limit_bytes=VMEM_LIMIT),
    )(y3, gate3, res)


# ----------------------------------------------------------------------------
# Parameter construction (deterministic, synthetic; channels pre-padded to 128)
# ----------------------------------------------------------------------------
def init_params(key, inplanes, planes, stride=1, reduction=16):
    cout = planes * 4                                   # expansion = 4
    cin_p, pp, cp4 = _round_up_lane(inplanes), _round_up_lane(planes), _round_up_lane(cout)
    hidden = max(1, cout // reduction)
    rp = _round_up_lane(hidden)

    keys = iter(jax.random.split(key, 32))

    def dense(ci, co, ci_p, co_p, fan_in, dtype=jnp.bfloat16):
        w = jax.random.normal(next(keys), (ci, co), jnp.float32) / jnp.sqrt(float(fan_in))
        return jnp.pad(w, ((0, ci_p - ci), (0, co_p - co))).astype(dtype)

    def bn(c, c_p):
        gamma = 1.0 + 0.1 * jax.random.normal(next(keys), (c,), jnp.float32)
        beta = 0.1 * jax.random.normal(next(keys), (c,), jnp.float32)
        mean = 0.1 * jax.random.normal(next(keys), (c,), jnp.float32)
        var = jnp.ones((c,), jnp.float32)
        scale = gamma / jnp.sqrt(var + 1e-5)
        bias = beta - mean * scale
        return (jnp.pad(scale, (0, c_p - c)).reshape(1, c_p),
                jnp.pad(bias, (0, c_p - c)).reshape(1, c_p))

    w2 = (jax.random.normal(next(keys), (3, 3, planes, planes), jnp.float32)
          / jnp.sqrt(float(9 * planes)))
    w2 = jnp.pad(w2, ((0, 0), (0, 0), (0, pp - planes), (0, pp - planes)))
    w2 = w2.reshape(9, pp, pp).astype(jnp.bfloat16)

    params = dict(
        inplanes=inplanes, planes=planes, cout=cout, stride=stride,
        cin_p=cin_p, planes_p=pp, cp4=cp4,
        w1=dense(inplanes, planes, cin_p, pp, fan_in=inplanes), bn1=bn(planes, pp),
        w2=w2, bn2=bn(planes, pp),
        w3=dense(planes, cout, pp, cp4, fan_in=planes), bn3=bn(cout, cp4),
        # SELayer: Linear(C, C//r, bias=False) -> ReLU -> Linear(C//r, C, bias=False) -> Sigmoid
        se_w1=dense(cout, hidden, cp4, rp, fan_in=cout, dtype=jnp.float32),
        se_w2=dense(hidden, cout, rp, cp4, fan_in=hidden, dtype=jnp.float32),
        downsample=None,
    )
    if stride != 1 or inplanes != cout:
        params['downsample'] = (dense(inplanes, cout, cin_p, cp4, fan_in=inplanes),
                                bn(cout, cp4))
    return params


# ----------------------------------------------------------------------------
# Forward pass (matches SEBottleneck.forward)
# ----------------------------------------------------------------------------
def se_bottleneck_forward(x_nchw, params):
    stride = params['stride']
    cin_p, pp, cp4 = params['cin_p'], params['planes_p'], params['cp4']

    x = jnp.transpose(x_nchw, (0, 2, 3, 1)).astype(jnp.float32)      # NHWC
    nb, h, w, _ = x.shape
    x = _pad_channels(x, cin_p)                                      # (nb, h, w, cin_p)

    # --- conv1 (1x1) + bn1 + relu : tiled matmul ---
    s1, b1 = params['bn1']
    y = conv1x1_bn(x.reshape(nb * h * w, cin_p), params['w1'], s1, b1, relu=True)
    y = y.reshape(nb, h, w, pp)

    # --- conv2 (3x3, pad 1, stride) + bn2 + relu ---
    s2, b2 = params['bn2']
    yp = jnp.pad(y, ((0, 0), (1, 1), (1, 1), (0, 0)))
    if stride == 1:
        y = conv3x3_bn_relu(yp, params['w2'], s2, b2)                # (nb, h*w, pp)
        ho, wo = h, w
    else:
        # TODO(synk): stride>1 path builds im2col patches in XLA (9x HBM blow-up of
        #             the conv2 input) and reuses the tiled matmul kernel.
        ho = (h + 2 - 3) // stride + 1
        wo = (w + 2 - 3) // stride + 1
        patches = [yp[:, kh:kh + (ho - 1) * stride + 1:stride,
                      kw:kw + (wo - 1) * stride + 1:stride, :]
                   for kh in range(3) for kw in range(3)]
        patches = jnp.concatenate(patches, axis=-1).reshape(nb * ho * wo, 9 * pp)
        y = conv1x1_bn(patches, params['w2'].reshape(9 * pp, pp), s2, b2, relu=True)
        y = y.reshape(nb, ho * wo, pp)

    # --- conv3 (1x1) + bn3, fused with the SE channel partial sums ---
    s3, b3 = params['bn3']
    y3, psum = conv1x1_bn_psum(y, params['w3'], s3, b3)              # (nb, ho*wo, cp4)

    # --- SE gate (tiny): finish pool -> fc -> relu -> fc -> sigmoid ---
    gate = se_gate(psum, params['se_w1'], params['se_w2'],
                   inv_hw=1.0 / float(ho * wo))                      # (nb, cp4)

    # --- residual path ---
    if params['downsample'] is not None:
        wd, (sd, bd) = params['downsample']
        xs = x[:, ::stride, ::stride, :] if stride > 1 else x
        res = conv1x1_bn(xs.reshape(nb * ho * wo, cin_p), wd, sd, bd, relu=False)
        res = res.reshape(nb, ho * wo, cp4)
    else:
        res = x.reshape(nb, ho * wo, cp4)                            # identity (cin_p == cp4)

    # --- fused SE rescale + residual add + final ReLU ---
    out = se_scale_residual_relu(y3, gate.reshape(nb, 1, cp4), res)

    out = out.reshape(nb, ho, wo, cp4)[..., :params['cout']]
    return jnp.transpose(out, (0, 3, 1, 2))                         # back to NCHW


if __name__ == "__main__":
    key = jax.random.PRNGKey(0)
    kp, kx = jax.random.split(key)
    inplanes, planes = 128, 32                   # inplanes == planes * expansion -> identity skip
    params = init_params(kp, inplanes, planes, stride=1, reduction=16)
    x = jax.random.normal(kx, (2, inplanes, 16, 16), jnp.float32)    # NCHW like PyTorch
    fwd = jax.jit(lambda inp: se_bottleneck_forward(inp, params))
    out = fwd(x)
    jax.block_until_ready(out)
    assert out.shape == (2, planes * 4, 16, 16), out.shape
    assert bool(jnp.all(jnp.isfinite(out)))
    print("KERNEL_OK")
</pallas_src>

<mosaic_0001>
module attributes {stable_mosaic.version = 11 : i64} {
  func.func @_mm_bn_psum_kernel(%arg0: i32, %arg1: i32, %arg2: memref<1x256x128xf32, #tpu.memory_space<vmem>>, %arg3: memref<128x128xbf16, #tpu.memory_space<vmem>>, %arg4: memref<1x128xf32, #tpu.memory_space<vmem>>, %arg5: memref<1x128xf32, #tpu.memory_space<vmem>>, %arg6: memref<1x256x128xf32, #tpu.memory_space<vmem>>, %arg7: memref<1x1x128xf32, #tpu.memory_space<vmem>>) attributes {dimension_semantics = [#tpu.dimension_semantics<parallel>, #tpu.dimension_semantics<parallel>], iteration_bounds = array<i64: 2, 1>, scalar_prefetch = 0 : i64, scratch_operands = 0 : i64, tpu.core_type = #tpu.core_type<tc>, window_params = [{transform_indices = @transform_0, window_bounds = array<i64: 1, 256, 128>}, {pipeline_mode = #tpu.pipeline_mode<synchronous>, transform_indices = @transform_1, window_bounds = array<i64: 128, 128>}, {pipeline_mode = #tpu.pipeline_mode<synchronous>, transform_indices = @transform_2, window_bounds = array<i64: 1, 128>}, {pipeline_mode = #tpu.pipeline_mode<synchronous>, transform_indices = @transform_3, window_bounds = array<i64: 1, 128>}, {transform_indices = @transform_4, window_bounds = array<i64: 1, 256, 128>}, {transform_indices = @transform_5, window_bounds = array<i64: 1, 1, 128>}]} {
    %c0 = arith.constant 0 : index
    %c0_0 = arith.constant 0 : index
    %c0_1 = arith.constant 0 : index
    %0 = vector.load %arg2[%c0, %c0_0, %c0_1] : memref<1x256x128xf32, #tpu.memory_space<vmem>>, vector<1x256x128xf32>
    %1 = vector.shape_cast %0 : vector<1x256x128xf32> to vector<256x128xf32>
    %2 = arith.truncf %1 : vector<256x128xf32> to vector<256x128xbf16>
    %c0_2 = arith.constant 0 : index
    %c0_3 = arith.constant 0 : index
    %3 = vector.load %arg3[%c0_2, %c0_3] : memref<128x128xbf16, #tpu.memory_space<vmem>>, vector<128x128xbf16>
    %cst = arith.constant dense<0.000000e+00> : vector<256x128xf32>
    %4 = tpu.matmul %2, %3, %cst {dimension_numbers = #tpu.dot_dimension_numbers<[1], [0], [0], [1], [0, 0, 1, 1], [], []>} : vector<256x128xbf16>, vector<128x128xbf16>, vector<256x128xf32> -> vector<256x128xf32>
    %c0_4 = arith.constant 0 : index
    %c0_5 = arith.constant 0 : index
    %5 = vector.load %arg4[%c0_4, %c0_5] : memref<1x128xf32, #tpu.memory_space<vmem>>, vector<1x128xf32>
    %6 = vector.broadcast %5 : vector<1x128xf32> to vector<256x128xf32>
    %7 = arith.mulf %4, %6 : vector<256x128xf32>
    %c0_6 = arith.constant 0 : index
    %c0_7 = arith.constant 0 : index
    %8 = vector.load %arg5[%c0_6, %c0_7] : memref<1x128xf32, #tpu.memory_space<vmem>>, vector<1x128xf32>
    %9 = vector.broadcast %8 : vector<1x128xf32> to vector<256x128xf32>
    %10 = arith.addf %7, %9 : vector<256x128xf32>
    %c0_8 = arith.constant 0 : index
    %c0_9 = arith.constant 0 : index
    %c0_10 = arith.constant 0 : index
    %11 = vector.load %arg6[%c0_8, %c0_9, %c0_10] : memref<1x256x128xf32, #tpu.memory_space<vmem>>, vector<1x256x128xf32>
    %12 = vector.shape_cast %11 : vector<1x256x128xf32> to vector<256x128xf32>
    %13 = vector.shape_cast %10 : vector<256x128xf32> to vector<1x256x128xf32>
    tpu.vector_store %arg6[%c0_8, %c0_9, %c0_10], %13 {strides = array<i32>} : memref<1x256x128xf32, #tpu.memory_space<vmem>>, vector<1x256x128xf32>,
    %cst_11 = arith.constant dense<0.000000e+00> : vector<128xf32>
    %14 = vector.multi_reduction <add>, %10, %cst_11 [0] : vector<256x128xf32> to vector<128xf32>
    %15 = vector.shape_cast %14 : vector<128xf32> to vector<1x128xf32>
    %c0_12 = arith.constant 0 : index
    %c0_13 = arith.constant 0 : index
    %c0_14 = arith.constant 0 : index
    %16 = vector.load %arg7[%c0_12, %c0_13, %c0_14] : memref<1x1x128xf32, #tpu.memory_space<vmem>>, vector<1x1x128xf32>
    %17 = vector.shape_cast %16 : vector<1x1x128xf32> to vector<1x128xf32>
    %18 = vector.shape_cast %15 : vector<1x128xf32> to vector<1x1x128xf32>
    tpu.vector_store %arg7[%c0_12, %c0_13, %c0_14], %18 {strides = array<i32>} : memref<1x1x128xf32, #tpu.memory_space<vmem>>, vector<1x1x128xf32>,
    return
  }
  func.func @transform_0(%arg0: i32, %arg1: i32) -> (i32, i32, i32) {
    %c0_i32 = arith.constant 0 : i32
    %c0_i32_0 = arith.constant 0 : i32
    return %arg0, %arg1, %c0_i32 : i32, i32, i32
  }
  func.func @transform_1(%arg0: i32, %arg1: i32) -> (i32, i32) {
    %c0_i32 = arith.constant 0 : i32
    %c0_i32_0 = arith.constant 0 : i32
    %c0_i32_1 = arith.constant 0 : i32
    return %c0_i32, %c0_i32_0 : i32, i32
  }
  func.func @transform_2(%arg0: i32, %arg1: i32) -> (i32, i32) {
    %c0_i32 = arith.constant 0 : i32
    %c0_i32_0 = arith.constant 0 : i32
    %c0_i32_1 = arith.constant 0 : i32
    return %c0_i32, %c0_i32_0 : i32, i32
  }
  func.func @transform_3(%arg0: i32, %arg1: i32) -> (i32, i32) {
    %c0_i32 = arith.constant 0 : i32
    %c0_i32_0 = arith.constant 0 : i32
    %c0_i32_1 = arith.constant 0 : i32
    return %c0_i32, %c0_i32_0 : i32, i32
  }
  func.func @transform_4(%arg0: i32, %arg1: i32) -> (i32, i32, i32) {
    %c0_i32 = arith.constant 0 : i32
    %c0_i32_0 = arith.constant 0 : i32
    return %arg0, %arg1, %c0_i32 : i32, i32, i32
  }
  func.func @transform_5(%arg0: i32, %arg1: i32) -> (i32, i32, i32) {
    %c0_i32 = arith.constant 0 : i32
    %c0_i32_0 = arith.constant 0 : i32
    return %arg0, %arg1, %c0_i32 : i32, i32, i32
  }
}

module attributes {stable_mosaic.version = 11 : i64} {
  func.func @_conv3x3_bn_relu_kernel(%arg0: i32, %arg1: memref<1x18x18x128xf32, #tpu.memory_space<vmem>>, %arg2: memref<9x128x128xbf16, #tpu.memory_space<vmem>>, %arg3: memref<1x128xf32, #tpu.memory_space<vmem>>, %arg4: memref<1x128xf32, #tpu.memory_space<vmem>>, %arg5: memref<1x256x128xf32, #tpu.memory_space<vmem>>) attributes {dimension_semantics = [#tpu.dimension_semantics<parallel>], iteration_bounds = array<i64: 2>, scalar_prefetch = 0 : i64, scratch_operands = 0 : i64, tpu.core_type = #tpu.core_type<tc>, window_params = [{transform_indices = @transform_0, window_bounds = array<i64: 1, 18, 18, 128>}, {pipeline_mode = #tpu.pipeline_mode<synchronous>, transform_indices = @transform_1, window_bounds = array<i64: 9, 128, 128>}, {pipeline_mode = #tpu.pipeline_mode<synchronous>, transform_indices = @transform_2, window_bounds = array<i64: 1, 128>}, {pipeline_mode = #tpu.pipeline_mode<synchronous>, transform_indices = @transform_3, window_bounds = array<i64: 1, 128>}, {transform_indices = @transform_4, window_bounds = array<i64: 1, 256, 128>}]} {
    %cst = arith.constant 0.000000e+00 : f32
    %0 = vector.broadcast %cst : f32 to vector<256x128xf32>
    %c0 = arith.constant 0 : index
    %c0_0 = arith.constant 0 : index
    %c0_1 = arith.constant 0 : index
    %c0_2 = arith.constant 0 : index
    %1 = vector.load %arg1[%c0, %c0_0, %c0_1, %c0_2] : memref<1x18x18x128xf32, #tpu.memory_space<vmem>>, vector<1x16x16x128xf32>
    %2 = vector.shape_cast %1 : vector<1x16x16x128xf32> to vector<16x16x128xf32>
    %3 = vector.shape_cast %2 : vector<16x16x128xf32> to vector<256x128xf32>
    %4 = arith.truncf %3 : vector<256x128xf32> to vector<256x128xbf16>
    %c0_3 = arith.constant 0 : index
    %c0_4 = arith.constant 0 : index
    %c0_5 = arith.constant 0 : index
    %5 = vector.load %arg2[%c0_3, %c0_4, %c0_5] : memref<9x128x128xbf16, #tpu.memory_space<vmem>>, vector<1x128x128xbf16>
    %6 = vector.shape_cast %5 : vector<1x128x128xbf16> to vector<128x128xbf16>
    %cst_6 = arith.constant dense<0.000000e+00> : vector<256x128xf32>
    %7 = tpu.matmul %4, %6, %cst_6 {dimension_numbers = #tpu.dot_dimension_numbers<[1], [0], [0], [1], [0, 0, 1, 1], [], []>} : vector<256x128xbf16>, vector<128x128xbf16>, vector<256x128xf32> -> vector<256x128xf32>
    %8 = arith.addf %0, %7 : vector<256x128xf32>
    %c0_7 = arith.constant 0 : index
    %c0_8 = arith.constant 0 : index
    %c1 = arith.constant 1 : index
    %c0_9 = arith.constant 0 : index
    %9 = vector.load %arg1[%c0_7, %c0_8, %c1, %c0_9] : memref<1x18x18x128xf32, #tpu.memory_space<vmem>>, vector<1x16x16x128xf32>
    %10 = vector.shape_cast %9 : vector<1x16x16x128xf32> to vector<16x16x128xf32>
    %11 = vector.shape_cast %10 : vector<16x16x128xf32> to vector<256x128xf32>
    %12 = arith.truncf %11 : vector<256x128xf32> to vector<256x128xbf16>
    %c1_10 = arith.constant 1 : index
    %c0_11 = arith.constant 0 : index
    %c0_12 = arith.constant 0 : index
    %13 = vector.load %arg2[%c1_10, %c0_11, %c0_12] : memref<9x128x128xbf16, #tpu.memory_space<vmem>>, vector<1x128x128xbf16>
    %14 = vector.shape_cast %13 : vector<1x128x128xbf16> to vector<128x128xbf16>
    %cst_13 = arith.constant dense<0.000000e+00> : vector<256x128xf32>
    %15 = tpu.matmul %12, %14, %cst_13 {dimension_numbers = #tpu.dot_dimension_numbers<[1], [0], [0], [1], [0, 0, 1, 1], [], []>} : vector<256x128xbf16>, vector<128x128xbf16>, vector<256x128xf32> -> vector<256x128xf32>
    %16 = arith.addf %8, %15 : vector<256x128xf32>
    %c0_14 = arith.constant 0 : index
    %c0_15 = arith.constant 0 : index
    %c2 = arith.constant 2 : index
    %c0_16 = arith.constant 0 : index
    %17 = vector.load %arg1[%c0_14, %c0_15, %c2, %c0_16] : memref<1x18x18x128xf32, #tpu.memory_space<vmem>>, vector<1x16x16x128xf32>
    %18 = vector.shape_cast %17 : vector<1x16x16x128xf32> to vector<16x16x128xf32>
    %19 = vector.shape_cast %18 : vector<16x16x128xf32> to vector<256x128xf32>
    %20 = arith.truncf %19 : vector<256x128xf32> to vector<256x128xbf16>
    %c2_17 = arith.constant 2 : index
    %c0_18 = arith.constant 0 : index
    %c0_19 = arith.constant 0 : index
    %21 = vector.load %arg2[%c2_17, %c0_18, %c0_19] : memref<9x128x128xbf16, #tpu.memory_space<vmem>>, vector<1x128x128xbf16>
    %22 = vector.shape_cast %21 : vector<1x128x128xbf16> to vector<128x128xbf16>
    %cst_20 = arith.constant dense<0.000000e+00> : vector<256x128xf32>
    %23 = tpu.matmul %20, %22, %cst_20 {dimension_numbers = #tpu.dot_dimension_numbers<[1], [0], [0], [1], [0, 0, 1, 1], [], []>} : vector<256x128xbf16>, vector<128x128xbf16>, vector<256x128xf32> -> vector<256x128xf32>
    %24 = arith.addf %16, %23 : vector<256x128xf32>
    %c0_21 = arith.constant 0 : index
    %c1_22 = arith.constant 1 : index
    %c0_23 = arith.constant 0 : index
    %c0_24 = arith.constant 0 : index
    %25 = vector.load %arg1[%c0_21, %c1_22, %c0_23, %c0_24] : memref<1x18x18x128xf32, #tpu.memory_space<vmem>>, vector<1x16x16x128xf32>
    %26 = vector.shape_cast %25 : vector<1x16x16x128xf32> to vector<16x16x128xf32>
    %27 = vector.shape_cast %26 : vector<16x16x128xf32> to vector<256x128xf32>
    %28 = arith.truncf %27 : vector<256x128xf32> to vector<256x128xbf16>
    %c3 = arith.constant 3 : index
    %c0_25 = arith.constant 0 : index
    %c0_26 = arith.constant 0 : index
    %29 = vector.load %arg2[%c3, %c0_25, %c0_26] : memref<9x128x128xbf16, #tpu.memory_space<vmem>>, vector<1x128x128xbf16>
    %30 = vector.shape_cast %29 : vector<1x128x128xbf16> to vector<128x128xbf16>
    %cst_27 = arith.constant dense<0.000000e+00> : vector<256x128xf32>
    %31 = tpu.matmul %28, %30, %cst_27 {dimension_numbers = #tpu.dot_dimension_numbers<[1], [0], [0], [1], [0, 0, 1, 1], [], []>} : vector<256x128xbf16>, vector<128x128xbf16>, vector<256x128xf32> -> vector<256x128xf32>
    %32 = arith.addf %24, %31 : vector<256x128xf32>
    %c0_28 = arith.constant 0 : index
    %c1_29 = arith.constant 1 : index
    %c1_30 = arith.constant 1 : index
    %c0_31 = arith.constant 0 : index
    %33 = vector.load %arg1[%c0_28, %c1_29, %c1_30, %c0_31] : memref<1x18x18x128xf32, #tpu.memory_space<vmem>>, vector<1x16x16x128xf32>
    %34 = vector.shape_cast %33 : vector<1x16x16x128xf32> to vector<16x16x128xf32>
    %35 = vector.shape_cast %34 : vector<16x16x128xf32> to vector<256x128xf32>
    %36 = arith.truncf %35 : vector<256x128xf32> to vector<256x128xbf16>
    %c4 = arith.constant 4 : index
    %c0_32 = arith.constant 0 : index
    %c0_33 = arith.constant 0 : index
    %37 = vector.load %arg2[%c4, %c0_32, %c0_33] : memref<9x128x128xbf16, #tpu.memory_space<vmem>>, vector<1x128x128xbf16>
    %38 = vector.shape_cast %37 : vector<1x128x128xbf16> to vector<128x128xbf16>
    %cst_34 = arith.constant dense<0.000000e+00> : vector<256x128xf32>
    %39 = tpu.matmul %36, %38, %cst_34 {dimension_numbers = #tpu.dot_dimension_numbers<[1], [0], [0], [1], [0, 0, 1, 1], [], []>} : vector<256x128xbf16>, vector<128x128xbf16>, vector<256x128xf32> -> vector<256x128xf32>
    %40 = arith.addf %32, %39 : vector<256x128xf32>
    %c0_35 = arith.constant 0 : index
    %c1_36 = arith.constant 1 : index
    %c2_37 = arith.constant 2 : index
    %c0_38 = arith.constant 0 : index
    %41 = vector.load %arg1[%c0_35, %c1_36, %c2_37, %c0_38] : memref<1x18x18x128xf32, #tpu.memory_space<vmem>>, vector<1x16x16x128xf32>
    %42 = vector.shape_cast %41 : vector<1x16x16x128xf32> to vector<16x16x128xf32>
    %43 = vector.shape_cast %42 : vector<16x16x128xf32> to vector<256x128xf32>
    %44 = arith.truncf %43 : vector<256x128xf32> to vector<256x128xbf16>
    %c5 = arith.constant 5 : index
    %c0_39 = arith.constant 0 : index
    %c0_40 = arith.constant 0 : index
    %45 = vector.load %arg2[%c5, %c0_39, %c0_40] : memref<9x128x128xbf16, #tpu.memory_space<vmem>>, vector<1x128x128xbf16>
    %46 = vector.shape_cast %45 : vector<1x128x128xbf16> to vector<128x128xbf16>
    %cst_41 = arith.constant dense<0.000000e+00> : vector<256x128xf32>
    %47 = tpu.matmul %44, %46, %cst_41 {dimension_numbers = #tpu.dot_dimension_numbers<[1], [0], [0], [1], [0, 0, 1, 1], [], []>} : vector<256x128xbf16>, vector<128x128xbf16>, vector<256x128xf32> -> vector<256x128xf32>
    %48 = arith.addf %40, %47 : vector<256x128xf32>
    %c0_42 = arith.constant 0 : index
    %c2_43 = arith.constant 2 : index
    %c0_44 = arith.constant 0 : index
    %c0_45 = arith.constant 0 : index
    %49 = vector.load %arg1[%c0_42, %c2_43, %c0_44, %c0_45] : memref<1x18x18x128xf32, #tpu.memory_space<vmem>>, vector<1x16x16x128xf32>
    %50 = vector.shape_cast %49 : vector<1x16x16x128xf32> to vector<16x16x128xf32>
    %51 = vector.shape_cast %50 : vector<16x16x128xf32> to vector<256x128xf32>
    %52 = arith.truncf %51 : vector<256x128xf32> to vector<256x128xbf16>
    %c6 = arith.constant 6 : index
    %c0_46 = arith.constant 0 : index
    %c0_47 = arith.constant 0 : index
    %53 = vector.load %arg2[%c6, %c0_46, %c0_47] : memref<9x128x128xbf16, #tpu.memory_space<vmem>>, vector<1x128x128xbf16>
    %54 = vector.shape_cast %53 : vector<1x128x128xbf16> to vector<128x128xbf16>
    %cst_48 = arith.constant dense<0.000000e+00> : vector<256x128xf32>
    %55 = tpu.matmul %52, %54, %cst_48 {dimension_numbers = #tpu.dot_dimension_numbers<[1], [0], [0], [1], [0, 0, 1, 1], [], []>} : vector<256x128xbf16>, vector<128x128xbf16>, vector<256x128xf32> -> vector<256x128xf32>
    %56 = arith.addf %48, %55 : vector<256x128xf32>
    %c0_49 = arith.constant 0 : index
    %c2_50 = arith.constant 2 : index
    %c1_51 = arith.constant 1 : index
    %c0_52 = arith.constant 0 : index
    %57 = vector.load %arg1[%c0_49, %c2_50, %c1_51, %c0_52] : memref<1x18x18x128xf32, #tpu.memory_space<vmem>>, vector<1x16x16x128xf32>
    %58 = vector.shape_cast %57 : vector<1x16x16x128xf32> to vector<16x16x128xf32>
    %59 = vector.shape_cast %58 : vector<16x16x128xf32> to vector<256x128xf32>
    %60 = arith.truncf %59 : vector<256x128xf32> to vector<256x128xbf16>
    %c7 = arith.constant 7 : index
    %c0_53 = arith.constant 0 : index
    %c0_54 = arith.constant 0 : index
    %61 = vector.load %arg2[%c7, %c0_53, %c0_54] : memref<9x128x128xbf16, #tpu.memory_space<vmem>>, vector<1x128x128xbf16>
    %62 = vector.shape_cast %61 : vector<1x128x128xbf16> to vector<128x128xbf16>
    %cst_55 = arith.constant dense<0.000000e+00> : vector<256x128xf32>
    %63 = tpu.matmul %60, %62, %cst_55 {dimension_numbers = #tpu.dot_dimension_numbers<[1], [0], [0], [1], [0, 0, 1, 1], [], []>} : vector<256x128xbf16>, vector<128x128xbf16>, vector<256x128xf32> -> vector<256x128xf32>
    %64 = arith.addf %56, %63 : vector<256x128xf32>
    %c0_56 = arith.constant 0 : index
    %c2_57 = arith.constant 2 : index
    %c2_58 = arith.constant 2 : index
    %c0_59 = arith.constant 0 : index
    %65 = vector.load %arg1[%c0_56, %c2_57, %c2_58, %c0_59] : memref<1x18x18x128xf32, #tpu.memory_space<vmem>>, vector<1x16x16x128xf32>
    %66 = vector.shape_cast %65 : vector<1x16x16x128xf32> to vector<16x16x128xf32>
    %67 = vector.shape_cast %66 : vector<16x16x128xf32> to vector<256x128xf32>
    %68 = arith.truncf %67 : vector<256x128xf32> to vector<256x128xbf16>
    %c8 = arith.constant 8 : index
    %c0_60 = arith.constant 0 : index
    %c0_61 = arith.constant 0 : index
    %69 = vector.load %arg2[%c8, %c0_60, %c0_61] : memref<9x128x128xbf16, #tpu.memory_space<vmem>>, vector<1x128x128xbf16>
    %70 = vector.shape_cast %69 : vector<1x128x128xbf16> to vector<128x128xbf16>
    %cst_62 = arith.constant dense<0.000000e+00> : vector<256x128xf32>
    %71 = tpu.matmul %68, %70, %cst_62 {dimension_numbers = #tpu.dot_dimension_numbers<[1], [0], [0], [1], [0, 0, 1, 1], [], []>} : vector<256x128xbf16>, vector<128x128xbf16>, vector<256x128xf32> -> vector<256x128xf32>
    %72 = arith.addf %64, %71 : vector<256x128xf32>
    %c0_63 = arith.constant 0 : index
    %c0_64 = arith.constant 0 : index
    %73 = vector.load %arg3[%c0_63, %c0_64] : memref<1x128xf32, #tpu.memory_space<vmem>>, vector<1x128xf32>
    %74 = vector.broadcast %73 : vector<1x128xf32> to vector<256x128xf32>
    %75 = arith.mulf %72, %74 : vector<256x128xf32>
    %c0_65 = arith.constant 0 : index
    %c0_66 = arith.constant 0 : index
    %76 = vector.load %arg4[%c0_65, %c0_66] : memref<1x128xf32, #tpu.memory_space<vmem>>, vector<1x128xf32>
    %77 = vector.broadcast %76 : vector<1x128xf32> to vector<256x128xf32>
    %78 = arith.addf %75, %77 : vector<256x128xf32>
    %cst_67 = arith.constant 0.000000e+00 : f32
    %79 = vector.broadcast %cst_67 : f32 to vector<256x128xf32>
    %80 = arith.maximumf %78, %79 : vector<256x128xf32>
    %c0_68 = arith.constant 0 : index
    %c0_69 = arith.constant 0 : index
    %c0_70 = arith.constant 0 : index
    %81 = vector.load %arg5[%c0_68, %c0_69, %c0_70] : memref<1x256x128xf32, #tpu.memory_space<vmem>>, vector<1x256x128xf32>
    %82 = vector.shape_cast %81 : vector<1x256x128xf32> to vector<256x128xf32>
    %83 = vector.shape_cast %80 : vector<256x128xf32> to vector<1x256x128xf32>
    tpu.vector_store %arg5[%c0_68, %c0_69, %c0_70], %83 {strides = array<i32>} : memref<1x256x128xf32, #tpu.memory_space<vmem>>, vector<1x256x128xf32>,
    return
  }
  func.func @transform_0(%arg0: i32) -> (i32, i32, i32, i32) {
    %c0_i32 = arith.constant 0 : i32
    %c0_i32_0 = arith.constant 0 : i32
    %c0_i32_1 = arith.constant 0 : i32
    %c0_i32_2 = arith.constant 0 : i32
    return %arg0, %c0_i32, %c0_i32_0, %c0_i32_1 : i32, i32, i32, i32
  }
  func.func @transform_1(%arg0: i32) -> (i32, i32, i32) {
    %c0_i32 = arith.constant 0 : i32
    %c0_i32_0 = arith.constant 0 : i32
    %c0_i32_1 = arith.constant 0 : i32
    %c0_i32_2 = arith.constant 0 : i32
    return %c0_i32, %c0_i32_0, %c0_i32_1 : i32, i32, i32
  }
  func.func @transform_2(%arg0: i32) -> (i32, i32) {
    %c0_i32 = arith.constant 0 : i32
    %c0_i32_0 = arith.constant 0 : i32
    %c0_i32_1 = arith.constant 0 : i32
    return %c0_i32, %c0_i32_0 : i32, i32
  }
  func.func @transform_3(%arg0: i32) -> (i32, i32) {
    %c0_i32 = arith.constant 0 : i32
    %c0_i32_0 = arith.constant 0 : i32
    %c0_i32_1 = arith.constant 0 : i32
    return %c0_i32, %c0_i32_0 : i32, i32
  }
  func.func @transform_4(%arg0: i32) -> (i32, i32, i32) {
    %c0_i32 = arith.constant 0 : i32
    %c0_i32_0 = arith.constant 0 : i32
    %c0_i32_1 = arith.constant 0 : i32
    return %arg0, %c0_i32, %c0_i32_0 : i32, i32, i32
  }
}

module attributes {stable_mosaic.version = 11 : i64} {
  func.func @_mm_bn_kernel(%arg0: i32, %arg1: memref<256x128xf32, #tpu.memory_space<vmem>>, %arg2: memref<128x128xbf16, #tpu.memory_space<vmem>>, %arg3: memref<1x128xf32, #tpu.memory_space<vmem>>, %arg4: memref<1x128xf32, #tpu.memory_space<vmem>>, %arg5: memref<256x128xf32, #tpu.memory_space<vmem>>) attributes {dimension_semantics = [#tpu.dimension_semantics<parallel>], iteration_bounds = array<i64: 2>, scalar_prefetch = 0 : i64, scratch_operands = 0 : i64, tpu.core_type = #tpu.core_type<tc>, window_params = [{transform_indices = @transform_0, window_bounds = array<i64: 256, 128>}, {pipeline_mode = #tpu.pipeline_mode<synchronous>, transform_indices = @transform_1, window_bounds = array<i64: 128, 128>}, {pipeline_mode = #tpu.pipeline_mode<synchronous>, transform_indices = @transform_2, window_bounds = array<i64: 1, 128>}, {pipeline_mode = #tpu.pipeline_mode<synchronous>, transform_indices = @transform_3, window_bounds = array<i64: 1, 128>}, {transform_indices = @transform_4, window_bounds = array<i64: 256, 128>}]} {
    %c0 = arith.constant 0 : index
    %c0_0 = arith.constant 0 : index
    %0 = vector.load %arg1[%c0, %c0_0] : memref<256x128xf32, #tpu.memory_space<vmem>>, vector<256x128xf32>
    %1 = arith.truncf %0 : vector<256x128xf32> to vector<256x128xbf16>
    %c0_1 = arith.constant 0 : index
    %c0_2 = arith.constant 0 : index
    %2 = vector.load %arg2[%c0_1, %c0_2] : memref<128x128xbf16, #tpu.memory_space<vmem>>, vector<128x128xbf16>
    %cst = arith.constant dense<0.000000e+00> : vector<256x128xf32>
    %3 = tpu.matmul %1, %2, %cst {dimension_numbers = #tpu.dot_dimension_numbers<[1], [0], [0], [1], [0, 0, 1, 1], [], []>} : vector<256x128xbf16>, vector<128x128xbf16>, vector<256x128xf32> -> vector<256x128xf32>
    %c0_3 = arith.constant 0 : index
    %c0_4 = arith.constant 0 : index
    %4 = vector.load %arg3[%c0_3, %c0_4] : memref<1x128xf32, #tpu.memory_space<vmem>>, vector<1x128xf32>
    %5 = vector.broadcast %4 : vector<1x128xf32> to vector<256x128xf32>
    %6 = arith.mulf %3, %5 : vector<256x128xf32>
    %c0_5 = arith.constant 0 : index
    %c0_6 = arith.constant 0 : index
    %7 = vector.load %arg4[%c0_5, %c0_6] : memref<1x128xf32, #tpu.memory_space<vmem>>, vector<1x128xf32>
    %8 = vector.broadcast %7 : vector<1x128xf32> to vector<256x128xf32>
    %9 = arith.addf %6, %8 : vector<256x128xf32>
    %cst_7 = arith.constant 0.000000e+00 : f32
    %10 = vector.broadcast %cst_7 : f32 to vector<256x128xf32>
    %11 = arith.maximumf %9, %10 : vector<256x128xf32>
    %c0_8 = arith.constant 0 : index
    %c0_9 = arith.constant 0 : index
    %12 = vector.load %arg5[%c0_8, %c0_9] : memref<256x128xf32, #tpu.memory_space<vmem>>, vector<256x128xf32>
    tpu.vector_store %arg5[%c0_8, %c0_9], %11 {strides = array<i32>} : memref<256x128xf32, #tpu.memory_space<vmem>>, vector<256x128xf32>,
    return
  }
  func.func @transform_0(%arg0: i32) -> (i32, i32) {
    %c0_i32 = arith.constant 0 : i32
    %c0_i32_0 = arith.constant 0 : i32
    return %arg0, %c0_i32 : i32, i32
  }
  func.func @transform_1(%arg0: i32) -> (i32, i32) {
    %c0_i32 = arith.constant 0 : i32
    %c0_i32_0 = arith.constant 0 : i32
    %c0_i32_1 = arith.constant 0 : i32
    return %c0_i32, %c0_i32_0 : i32, i32
  }
  func.func @transform_2(%arg0: i32) -> (i32, i32) {
    %c0_i32 = arith.constant 0 : i32
    %c0_i32_0 = arith.constant 0 : i32
    %c0_i32_1 = arith.constant 0 : i32
    return %c0_i32, %c0_i32_0 : i32, i32
  }
  func.func @transform_3(%arg0: i32) -> (i32, i32) {
    %c0_i32 = arith.constant 0 : i32
    %c0_i32_0 = arith.constant 0 : i32
    %c0_i32_1 = arith.constant 0 : i32
    return %c0_i32, %c0_i32_0 : i32, i32
  }
  func.func @transform_4(%arg0: i32) -> (i32, i32) {
    %c0_i32 = arith.constant 0 : i32
    %c0_i32_0 = arith.constant 0 : i32
    return %arg0, %c0_i32 : i32, i32
  }
}

module attributes {stable_mosaic.version = 11 : i64} {
  func.func @_se_gate_kernel(%arg0: i32, %arg1: memref<2x1x128xf32, #tpu.memory_space<vmem>>, %arg2: memref<128x128xf32, #tpu.memory_space<vmem>>, %arg3: memref<128x128xf32, #tpu.memory_space<vmem>>, %arg4: memref<2x128xf32, #tpu.memory_space<vmem>>) attributes {dimension_semantics = [#tpu.dimension_semantics<arbitrary>], iteration_bounds = array<i64: 1>, scalar_prefetch = 0 : i64, scratch_operands = 0 : i64, tpu.core_type = #tpu.core_type<tc>, window_params = [{pipeline_mode = #tpu.pipeline_mode<synchronous>, transform_indices = @transform_0, window_bounds = array<i64: 2, 1, 128>}, {pipeline_mode = #tpu.pipeline_mode<synchronous>, transform_indices = @transform_1, window_bounds = array<i64: 128, 128>}, {pipeline_mode = #tpu.pipeline_mode<synchronous>, transform_indices = @transform_2, window_bounds = array<i64: 128, 128>}, {pipeline_mode = #tpu.pipeline_mode<synchronous>, transform_indices = @transform_3, window_bounds = array<i64: 2, 128>}]} {
    %c0 = arith.constant 0 : index
    %c0_0 = arith.constant 0 : index
    %c0_1 = arith.constant 0 : index
    %0 = vector.load %arg1[%c0, %c0_0, %c0_1] : memref<2x1x128xf32, #tpu.memory_space<vmem>>, vector<2x1x128xf32>
    %cst = arith.constant dense<0.000000e+00> : vector<2x128xf32>
    %1 = vector.multi_reduction <add>, %0, %cst [1] : vector<2x1x128xf32> to vector<2x128xf32>
    %cst_2 = arith.constant 3.906250e-03 : f32
    %2 = vector.broadcast %cst_2 : f32 to vector<2x128xf32>
    %3 = arith.mulf %1, %2 : vector<2x128xf32>
    %c0_3 = arith.constant 0 : index
    %c0_4 = arith.constant 0 : index
    %4 = vector.load %arg2[%c0_3, %c0_4] : memref<128x128xf32, #tpu.memory_space<vmem>>, vector<128x128xf32>
    %cst_5 = arith.constant dense<0.000000e+00> : vector<2x128xf32>
    %5 = tpu.matmul %3, %4, %cst_5 {dimension_numbers = #tpu.dot_dimension_numbers<[1], [0], [0], [1], [0, 0, 1, 1], [], []>} : vector<2x128xf32>, vector<128x128xf32>, vector<2x128xf32> -> vector<2x128xf32>
    %cst_6 = arith.constant 0.000000e+00 : f32
    %6 = vector.broadcast %cst_6 : f32 to vector<2x128xf32>
    %7 = arith.maximumf %5, %6 : vector<2x128xf32>
    %c0_7 = arith.constant 0 : index
    %c0_8 = arith.constant 0 : index
    %8 = vector.load %arg3[%c0_7, %c0_8] : memref<128x128xf32, #tpu.memory_space<vmem>>, vector<128x128xf32>
    %cst_9 = arith.constant dense<0.000000e+00> : vector<2x128xf32>
    %9 = tpu.matmul %7, %8, %cst_9 {dimension_numbers = #tpu.dot_dimension_numbers<[1], [0], [0], [1], [0, 0, 1, 1], [], []>} : vector<2x128xf32>, vector<128x128xf32>, vector<2x128xf32> -> vector<2x128xf32>
    %10 = arith.negf %9 : vector<2x128xf32>
    %11 = math.exp %10 : vector<2x128xf32>
    %cst_10 = arith.constant 1.000000e+00 : f32
    %12 = vector.broadcast %cst_10 : f32 to vector<2x128xf32>
    %13 = arith.addf %12, %11 : vector<2x128xf32>
    %14 = arith.divf %12, %13 : vector<2x128xf32>
    %c0_11 = arith.constant 0 : index
    %c0_12 = arith.constant 0 : index
    %15 = vector.load %arg4[%c0_11, %c0_12] : memref<2x128xf32, #tpu.memory_space<vmem>>, vector<2x128xf32>
    tpu.vector_store %arg4[%c0_11, %c0_12], %14 {strides = array<i32>} : memref<2x128xf32, #tpu.memory_space<vmem>>, vector<2x128xf32>,
    return
  }
  func.func @transform_0(%arg0: i32) -> (i32, i32, i32) {
    %c0_i32 = arith.constant 0 : i32
    %c0_i32_0 = arith.constant 0 : i32
    %c0_i32_1 = arith.constant 0 : i32
    %c0_i32_2 = arith.constant 0 : i32
    return %c0_i32, %c0_i32_0, %c0_i32_1 : i32, i32, i32
  }
  func.func @transform_1(%arg0: i32) -> (i32, i32) {
    %c0_i32 = arith.constant 0 : i32
    %c0_i32_0 = arith.constant 0 : i32
    %c0_i32_1 = arith.constant 0 : i32
    return %c0_i32, %c0_i32_0 : i32, i32
  }
  func.func @transform_2(%arg0: i32) -> (i32, i32) {
    %c0_i32 = arith.constant 0 : i32
    %c0_i32_0 = arith.constant 0 : i32
    %c0_i32_1 = arith.constant 0 : i32
    return %c0_i32, %c0_i32_0 : i32, i32
  }
  func.func @transform_3(%arg0: i32) -> (i32, i32) {
    %c0_i32 = arith.constant 0 : i32
    %c0_i32_0 = arith.constant 0 : i32
    %c0_i32_1 = arith.constant 0 : i32
    return %c0_i32, %c0_i32_0 : i32, i32
  }
}

module attributes {stable_mosaic.version = 11 : i64} {
  func.func @_se_residual_relu_kernel(%arg0: i32, %arg1: i32, %arg2: memref<1x256x128xf32, #tpu.memory_space<vmem>>, %arg3: memref<1x1x128xf32, #tpu.memory_space<vmem>>, %arg4: memref<1x256x128xf32, #tpu.memory_space<vmem>>, %arg5: memref<1x256x128xf32, #tpu.memory_space<vmem>>) attributes {dimension_semantics = [#tpu.dimension_semantics<parallel>, #tpu.dimension_semantics<parallel>], iteration_bounds = array<i64: 2, 1>, scalar_prefetch = 0 : i64, scratch_operands = 0 : i64, tpu.core_type = #tpu.core_type<tc>, window_params = [{transform_indices = @transform_0, window_bounds = array<i64: 1, 256, 128>}, {transform_indices = @transform_1, window_bounds = array<i64: 1, 1, 128>}, {transform_indices = @transform_2, window_bounds = array<i64: 1, 256, 128>}, {transform_indices = @transform_3, window_bounds = array<i64: 1, 256, 128>}]} {
    %c0 = arith.constant 0 : index
    %c0_0 = arith.constant 0 : index
    %c0_1 = arith.constant 0 : index
    %0 = vector.load %arg2[%c0, %c0_0, %c0_1] : memref<1x256x128xf32, #tpu.memory_space<vmem>>, vector<1x256x128xf32>
    %1 = vector.shape_cast %0 : vector<1x256x128xf32> to vector<256x128xf32>
    %c0_2 = arith.constant 0 : index
    %c0_3 = arith.constant 0 : index
    %c0_4 = arith.constant 0 : index
    %2 = vector.load %arg3[%c0_2, %c0_3, %c0_4] : memref<1x1x128xf32, #tpu.memory_space<vmem>>, vector<1x1x128xf32>
    %3 = vector.shape_cast %2 : vector<1x1x128xf32> to vector<1x128xf32>
    %4 = vector.broadcast %3 : vector<1x128xf32> to vector<256x128xf32>
    %5 = arith.mulf %1, %4 : vector<256x128xf32>
    %c0_5 = arith.constant 0 : index
    %c0_6 = arith.constant 0 : index
    %c0_7 = arith.constant 0 : index
    %6 = vector.load %arg4[%c0_5, %c0_6, %c0_7] : memref<1x256x128xf32, #tpu.memory_space<vmem>>, vector<1x256x128xf32>
    %7 = vector.shape_cast %6 : vector<1x256x128xf32> to vector<256x128xf32>
    %8 = arith.addf %5, %7 : vector<256x128xf32>
    %cst = arith.constant 0.000000e+00 : f32
    %9 = vector.broadcast %cst : f32 to vector<256x128xf32>
    %10 = arith.maximumf %8, %9 : vector<256x128xf32>
    %c0_8 = arith.constant 0 : index
    %c0_9 = arith.constant 0 : index
    %c0_10 = arith.constant 0 : index
    %11 = vector.load %arg5[%c0_8, %c0_9, %c0_10] : memref<1x256x128xf32, #tpu.memory_space<vmem>>, vector<1x256x128xf32>
    %12 = vector.shape_cast %11 : vector<1x256x128xf32> to vector<256x128xf32>
    %13 = vector.shape_cast %10 : vector<256x128xf32> to vector<1x256x128xf32>
    tpu.vector_store %arg5[%c0_8, %c0_9, %c0_10], %13 {strides = array<i32>} : memref<1x256x128xf32, #tpu.memory_space<vmem>>, vector<1x256x128xf32>,
    return
  }
  func.func @transform_0(%arg0: i32, %arg1: i32) -> (i32, i32, i32) {
    %c0_i32 = arith.constant 0 : i32
    %c0_i32_0 = arith.constant 0 : i32
    return %arg0, %arg1, %c0_i32 : i32, i32, i32
  }
  func.func @transform_1(%arg0: i32, %arg1: i32) -> (i32, i32, i32) {
    %c0_i32 = arith.constant 0 : i32
    %c0_i32_0 = arith.constant 0 : i32
    %c0_i32_1 = arith.constant 0 : i32
    return %arg0, %c0_i32, %c0_i32_0 : i32, i32, i32
  }
  func.func @transform_2(%arg0: i32, %arg1: i32) -> (i32, i32, i32) {
    %c0_i32 = arith.constant 0 : i32
    %c0_i32_0 = arith.constant 0 : i32
    return %arg0, %arg1, %c0_i32 : i32, i32, i32
  }
  func.func @transform_3(%arg0: i32, %arg1: i32) -> (i32, i32, i32) {
    %c0_i32 = arith.constant 0 : i32
    %c0_i32_0 = arith.constant 0 : i32
    return %arg0, %arg1, %c0_i32 : i32, i32, i32
  }
}

</mosaic_0001>

<bundles_post_ra>
// kernel: _lambda_.5
= control target key start
LH: loop header
LB: loop body
LE: loop exit
PB: predicated region body
PF: predicated region fallthrough
CT: control target
= control target key end

     0   :  { %9 = vsyncpa [#allocation3], 0  ;;  %s1320_s0 = inlined_call_operand.hbm [shape: f32[512,128], index: 0, kind: input, shape index: {}]   ;;  %s1321_s1 = inlined_call_operand.hbm [shape: bf16[128,128], index: 1, kind: input, shape index: {}]   ;;  %s1322_s2 = inlined_call_operand.vmem [shape: f32[1,128], index: 2, kind: input, shape index: {}]   ;;  %s1323_s3 = inlined_call_operand.vmem [shape: f32[1,128], index: 3, kind: input, shape index: {}]   ;;  %s1324_s4 = inlined_call_operand.vmem [shape: f32[512,128], index: 4, kind: output, shape index: {}]  }
   0x1   :  { %11 = vsyncpa [#allocation3 + $0x1], 0 }
   0x2   :  { %12 = vsyncpa [#allocation5], 0  ;;  %s1033_s15 = smov 0   ;;  %s1035_s16 = smov 0  }
   0x3   :  { %s1037_s17 = smov 0   ;;  %s1039_s18 = smov 0  }
   0x4 LB: > { %s728_s19 = sadd.s32 4294967295, %s1000_s18   ;;  %p38_p0 = scmp.ne.s32.totalorder %s992_s16, %s988_s15  ;;  %s1000_s18 = sphi %s1039_s18, %s1341_s18   ;;  %s996_s17 = sphi %s1037_s17, %s1340_s17   ;;  %s992_s16 = sphi %s1035_s16, %s1339_s16   ;;  %s988_s15 = sphi %s1033_s15, %s1338_s15  }
   0x5   : > { %p1055_p1 = scmp.eq.s32.totalorder %s728_s19, 0  ;;  %p730_p2 = scmp.ge.s32.totalorder %s1000_s18, 1 }
   0x6   : > { %p138_p3 = scmp.lt.s32.totalorder %s1000_s18, 3  ;;  %s1002_s23 = smov [#allocation4]  }
   0x7   : > { %s1329_s20 = scalar_select %p1055_p1, 1, 0 }
   0x8   : > { %p1063_p4 = por %p1055_p1, %p38_p0  ;;  %p1067_p5 = pnand %p730_p2, %p138_p3 }
   0x9   : > { %s150_s24 = sshll.u32 %s1002_s23, 4  ;;  %s1080_s26 = sadd.s32 1, %s1000_s18   ;;  %s151_s24 = int_to_ptr.vmem [resolvable:$true] %s150_s24 }
   0xa   : > { %s1330_s21 = scalar_select %p1063_p4, 1, 0 }
   0xb   : > { %s1331_s22 = scalar_select %p1067_p5, 1, 0 }
   0xc   : > { %p848_p6 = pneg %p1067_p5  ;;  %s25_s27 = sadd.s32 1, %s996_s17 }
   0xd   : > { %s22_s28 = ssub.s32 %s1000_s18, %s1080_s26  ;;  %s904_s5 = scalar_lea.hbm %s1321_s1, 1024 }
   0xe   : > { %p1075_p7 = pnand %p848_p6, %p1055_p1  ;;  %p905_p8 = scmp.ne.s32.totalorder %s1321_s1, %s904_s5 }
   0xf   : > { %p911_p12 = scmp.lt.u32.totalorder %s904_s5, %s1321_s1 }
  0x10   : > { %p906_p9 = pneg %p1075_p7 }
  0x12   : > { %p907_p10 = pnand %p906_p9, %p905_p8 }
  0x14   : > { %p908_p11 = pneg %p907_p10 }
  0x16   : > { %p913_p13 = pnand %p911_p12, %p908_p11 }
  0x18   : > { %916 = shalt.err (!%p913_p13)
}
  0x19   : > { %s917_s10 = scalar_lea.vmem %s151_s24, 1024  ;;  %p925_p6 = scmp.lt.s32.totalorder %s151_s24, %s151_s24 }
  0x1a   : > { %p918_p0 = scmp.ne.s32.totalorder %s151_s24, %s917_s10  ;;  %p926_p1 = scmp.lt.s32.totalorder %s917_s10, %s917_s10 }
  0x1c   : > { %p920_p2 = pnand %p918_p0, %p906_p9  ;;  %p927_p4 = por %p926_p1, %p925_p6 }
  0x1e   : > { %p921_p3 = pneg %p920_p2 }
  0x20   : > { %p928_p5 = pnand %p927_p4, %p921_p3 }
  0x22   : > { %931 = shalt.err (!%p928_p5)
}
  0x23   : > { %s1003_s11 = smov 64   ;;  %s1004_s12 = smov 4  }
  0x24   : > { %851 = dma.hbm_to_vmem [thread:$0]  (!%p1075_p7), %s1321_s1, 1024, %s151_s24, [#allocation5], %s1003_s11, %s1003_s11, %s1004_s12  }
  0x25   : > { %p23_p8 = scmp.eq.s32.totalorder %s22_s28, 0  ;;  %p32_p9 = scmp.ne.s32.totalorder %s996_s17, %s992_s16 }
  0x26   : > { %p33_p1 = scmp.eq.s32.totalorder %s1000_s18, 0  ;;  %p857_p4 = scmp.lt.s32.totalorder %s1000_s18, 2 }
  0x27   : > { %s1106_s15 = scalar_select %p23_p8, %s996_s17, %s25_s27  }
  0x28   : > { %p34_p5 = por %p33_p1, %p32_p9  ;;  %s170_s23 = sand.u32 1, %s996_s17  }
  0x29   : > { %s733_s29 = sshll.u32 %s170_s23, 8  ;;  %s753_s30 = sshll.u32 %s1000_s18, 12 }
  0x2a   : > { %s1113_s7 = scalar_lea.hbm %s1320_s0, %s753_s30  ;;  %s174_s24 = scalar_lea.vmem [#allocation2], %s733_s29 }
  0x2b   : > { %s181_s25 = sshll.u32 %s174_s24, 4  ;;  %p1117_p7 = pnand %p857_p4, %p34_p5  ;;  %s1115_s25 = int_to_ptr.vmem [resolvable:$true] %s181_s25 }
  0x2c   : > { %s1121_s28 = scalar_lea.sflag [#allocation3], %s170_s23  ;;  %s932_s8 = scalar_lea.hbm %s1113_s7, 4096 }
  0x2d   : > { %p933_p10 = scmp.ne.s32.totalorder %s1113_s7, %s932_s8  ;;  %p934_p11 = pneg %p1117_p7 }
  0x2e   : > { %s937_s11 = scalar_lea.hbm %s1320_s0, 8192  ;;  %p938_p0 = scmp.lt.u32.totalorder %s1113_s7, %s1320_s0 }
  0x2f   : > { %p935_p12 = pnand %p934_p11, %p933_p10  ;;  %p939_p2 = scmp.lt.u32.totalorder %s937_s11, %s932_s8 }
  0x30   : > { %p941_p6 = scmp.lt.u32.totalorder %s932_s8, %s1113_s7 }
  0x31   : > { %p936_p13 = pneg %p935_p12  ;;  %p940_p3 = por %p939_p2, %p938_p0 }
  0x33   : > { %p942_p8 = por %p941_p6, %p940_p3 }
  0x35   : > { %p943_p9 = pnand %p942_p8, %p936_p13 }
  0x37   : > { %946 = shalt.err (!%p943_p9)
}
  0x38   : > { %s947_s14 = scalar_lea.vmem %s1115_s25, 4096  ;;  %s1005_s23 = smov [#allocation2]  }
  0x39   : > { %p948_p1 = scmp.ne.s32.totalorder %s1115_s25, %s947_s14  ;;  %s952_s29 = sshll.u32 %s1005_s23, 4  ;;  %s953_s29 = int_to_ptr.vmem [resolvable:$false] %s952_s29 }
  0x3a   : > { %s954_s30 = scalar_lea.vmem %s953_s29, 8192  ;;  %p955_p10 = scmp.lt.s32.totalorder %s1115_s25, %s953_s29 }
  0x3b   : > { %p950_p4 = pnand %p948_p1, %p934_p11  ;;  %p956_p12 = scmp.lt.s32.totalorder %s954_s30, %s947_s14 }
  0x3d   : > { %p951_p5 = pneg %p950_p4  ;;  %p957_p0 = por %p956_p12, %p955_p10 }
  0x3f   : > { %p958_p2 = pnand %p957_p0, %p951_p5 }
  0x41   : > { %961 = shalt.err (!%p958_p2)
}
  0x42   : > { %s1006_s5 = smov 128   ;;  %s1007_s6 = smov 8  }
  0x43   : > { %855 = dma.hbm_to_vmem [thread:$0]  (!%p1117_p7), %s1113_s7, 4096, %s1115_s25, %s1121_s28, %s1006_s5, %s1006_s5, %s1007_s6  }
  0x44   : > { %p1334_p11 = scmp.ne.s32.totalorder %s1331_s22, 0 }
  0x45   : > { %s195_s24 = sand.u32 (!%p1334_p11), 1, %s992_s16   ;;  %p1335_p13 = scmp.ne.s32.totalorder (!%p1334_p11), %s1330_s21, 0 }
  0x46   : > { %193 = sbr.rel (%p1334_p11) target bundleno = 360 (0x168), region = 36  ;;  %s737_s8 = sshll.u32 (!%p1334_p11), %s195_s24, 8 }
  0x47   : > { %s196_s9 = scalar_lea.sflag (!%p1334_p11), [#allocation3], %s195_s24  ;;  %s1152_s10 = scalar_lea.vmem (!%p1334_p11), [#allocation2], %s737_s8 }
  0x4d   : > { %979 = dma.done.wait (%p1335_p13), %s196_s9, 4096  }
  0x4e   : > { %981 = vsyncadd (%p1335_p13), %s196_s9, 4294963200  ;;  %p1336_p3 = scmp.ne.s32.totalorder %s1329_s20, 0 }
  0x50   : > { %983 = dma.done.wait (%p1336_p3), [#allocation5], 1024  }
  0x51   : > { %985 = vsyncadd (%p1336_p3), [#allocation5], 4294966272  ;;  %v896_v0 = vld [vmem:[#allocation4] sm:$0xff]   ;;  %v897_v1 = vld [vmem:[#allocation4 + $0x8] sm:$0xff]   ;;  %s739_s20 = sshll.u32 %s728_s19, 5 }
  0x52   : > { %778 = vmatprep.subr.bf16.mxu0 %v896_v0  ;;  %826 = vmatprep.subr.bf16.mxu1 %v896_v0  ;;  %v898_v2 = vld [vmem:[#allocation4 + $0x10] sm:$0xff]   ;;  %v899_v3 = vld [vmem:[#allocation4 + $0x18] sm:$0xff]   ;;  %v236_v4 = vld [vmem:[%s1152_s10] sm:$0xff]  ;;  %p230_p7 = scmp.lt.s32.totalorder %s739_s20, 63 }
  0x53   : > { %779 = vmatpush3.bf16.msra.mxu0 %v896_v0  ;;  %834 = vmatpush3.bf16.msra.mxu1 %v896_v0  ;;  %v237_v5 = vld [vmem:[%s1152_s10 + $0x8] sm:$0xff]  ;;  %v252_v6 = vld [vmem:[%s1152_s10 + $0x80] sm:$0xff]  ;;  %v902_v12 = vld [vmem:[#allocation4 + $0x30] sm:$0xff]  }
  0x54   : > { %780 = vmatprep.subr.bf16.mxu0 %v897_v1  ;;  %827 = vmatprep.subr.bf16.mxu1 %v897_v1  ;;  %v268_v7 = vpack.c.bf16 %v237_v5, %v236_v4  ;;  %v253_v8 = vld [vmem:[%s1152_s10 + $0x88] sm:$0xff]  ;;  %v900_v10 = vld [vmem:[#allocation4 + $0x20] sm:$0xff]   ;;  %v903_v13 = vld [vmem:[#allocation4 + $0x38] sm:$0xff]   ;;  %s1343_s20 = smov (!%p230_p7, %s739_s20), 63 }
  0x55   : > { %v276_v9 = vpack.c.bf16 %v253_v8, %v252_v6  ;;  %v901_v11 = vld [vmem:[#allocation4 + $0x28] sm:$0xff]   ;;  %v238_v14 = vld [vmem:[%s1152_s10 + $0x10] sm:$0xff]  ;;  %v239_v15 = vld [vmem:[%s1152_s10 + $0x18] sm:$0xff]  ;;  %s740_s27 = sshll.u32 %s1343_s20, 3 }
  0x56   : > { %794 = vmatprep.mubr.bf16.mxu0 %v268_v7  ;;  %v254_v16 = vld [vmem:[%s1152_s10 + $0x90] sm:$0xff]  ;;  %v255_v17 = vld [vmem:[%s1152_s10 + $0x98] sm:$0xff]  ;;  %v240_v18 = vld [vmem:[%s1152_s10 + $0x20] sm:$0xff]  ;;  %v269_v22 = vpack.c.bf16 %v239_v15, %v238_v14  ;;  %s1217_s28 = scalar_lea.vmem %s1324_s4, %s740_s27 }
  0x57   : > { %781 = vmatpush3.bf16.msra.mxu0 %v897_v1  ;;  %835 = vmatpush3.bf16.msra.mxu1 %v897_v1  ;;  %v241_v19 = vld [vmem:[%s1152_s10 + $0x28] sm:$0xff]  ;;  %v256_v20 = vld [vmem:[%s1152_s10 + $0xa0] sm:$0xff]  ;;  %v277_v23 = vpack.c.bf16 %v255_v17, %v254_v16  ;;  %v242_v26 = vld [vmem:[%s1152_s10 + $0x30] sm:$0xff] }
  0x58   : > { %782 = vmatprep.subr.bf16.mxu0 %v898_v2  ;;  %828 = vmatprep.subr.bf16.mxu1 %v898_v2  ;;  %v257_v21 = vld [vmem:[%s1152_s10 + $0xa8] sm:$0xff]  ;;  %v270_v24 = vpack.c.bf16 %v241_v19, %v240_v18  ;;  %v243_v27 = vld [vmem:[%s1152_s10 + $0x38] sm:$0xff]  ;;  %v258_v28 = vld [vmem:[%s1152_s10 + $0xb0] sm:$0xff] }
  0x59   : > { %810 = vmatprep.mubr.bf16.mxu1 %v276_v9  ;;  %v278_v25 = vpack.c.bf16 %v257_v21, %v256_v20  ;;  %v259_v29 = vld [vmem:[%s1152_s10 + $0xb8] sm:$0xff]  ;;  %v244_v30 = vld [vmem:[%s1152_s10 + $0x40] sm:$0xff]  ;;  %v245_v31 = vld [vmem:[%s1152_s10 + $0x48] sm:$0xff]  ;;  %v271_v34 = vpack.c.bf16 %v243_v27, %v242_v26 }
  0x5a   : > { %v260_v32 = vld [vmem:[%s1152_s10 + $0xc0] sm:$0xff]  ;;  %v261_v33 = vld [vmem:[%s1152_s10 + $0xc8] sm:$0xff]  ;;  %v279_v35 = vpack.c.bf16 %v259_v29, %v258_v28  ;;  %v272_v36 = vpack.c.bf16 %v245_v31, %v244_v30  ;;  %v246_v38 = vld [vmem:[%s1152_s10 + $0x50] sm:$0xff] }
  0x5b   : > { %783 = vmatpush3.bf16.msra.mxu0 %v898_v2  ;;  %836 = vmatpush3.bf16.msra.mxu1 %v898_v2  ;;  %v280_v37 = vpack.c.bf16 %v261_v33, %v260_v32  ;;  %v247_v39 = vld [vmem:[%s1152_s10 + $0x58] sm:$0xff]  ;;  %v262_v40 = vld [vmem:[%s1152_s10 + $0xd0] sm:$0xff]  ;;  %v248_v42 = vld [vmem:[%s1152_s10 + $0x60] sm:$0xff] }
  0x5c   : > { %784 = vmatprep.subr.bf16.mxu0 %v899_v3  ;;  %829 = vmatprep.subr.bf16.mxu1 %v899_v3  ;;  %v263_v41 = vld [vmem:[%s1152_s10 + $0xd8] sm:$0xff]  ;;  %v249_v43 = vld [vmem:[%s1152_s10 + $0x68] sm:$0xff]  ;;  %v264_v44 = vld [vmem:[%s1152_s10 + $0xe0] sm:$0xff]  ;;  %v273_v46 = vpack.c.bf16 %v247_v39, %v246_v38 }
  0x5d   : > { %v265_v45 = vld [vmem:[%s1152_s10 + $0xe8] sm:$0xff]  ;;  %v281_v47 = vpack.c.bf16 %v263_v41, %v262_v40  ;;  %v274_v48 = vpack.c.bf16 %v249_v43, %v248_v42  ;;  %v250_v50 = vld [vmem:[%s1152_s10 + $0x70] sm:$0xff]  ;;  %v251_v51 = vld [vmem:[%s1152_s10 + $0x78] sm:$0xff] }
  0x5e   : > { %v282_v49 = vpack.c.bf16 %v265_v45, %v264_v44  ;;  %v266_v52 = vld [vmem:[%s1152_s10 + $0xf0] sm:$0xff]  ;;  %v267_v53 = vld [vmem:[%s1152_s10 + $0xf8] sm:$0xff]  ;;  %v275_v54 = vpack.c.bf16 %v251_v51, %v250_v50  ;;  %v1199_v56 = vld [vmem:[%s1322_s2] ss:$0 sm:$0xff] }
  0x5f   : > { %785 = vmatpush3.bf16.msra.mxu0 %v899_v3  ;;  %837 = vmatpush3.bf16.msra.mxu1 %v899_v3  ;;  %v283_v55 = vpack.c.bf16 %v267_v53, %v266_v52  ;;  %v1204_v58 = vld [vmem:[%s1323_s3] ss:$0 sm:$0xff] }
  0x60   : > { %786 = vmatprep.subr.bf16.mxu0 %v900_v10  ;;  %830 = vmatprep.subr.bf16.mxu1 %v900_v10 }
  0x63   : > { %787 = vmatpush3.bf16.msra.mxu0 %v900_v10  ;;  %838 = vmatpush3.bf16.msra.mxu1 %v900_v10 }
  0x64   : > { %788 = vmatprep.subr.bf16.mxu0 %v901_v11  ;;  %831 = vmatprep.subr.bf16.mxu1 %v901_v11 }
  0x67   : > { %789 = vmatpush3.bf16.msra.mxu0 %v901_v11  ;;  %839 = vmatpush3.bf16.msra.mxu1 %v901_v11 }
  0x68   : > { %790 = vmatprep.subr.bf16.mxu0 %v902_v12  ;;  %832 = vmatprep.subr.bf16.mxu1 %v902_v12 }
  0x6b   : > { %791 = vmatpush3.bf16.msra.mxu0 %v902_v12  ;;  %840 = vmatpush3.bf16.msra.mxu1 %v902_v12 }
  0x6c   : > { %792 = vmatprep.subr.bf16.mxu0 %v903_v13  ;;  %833 = vmatprep.subr.bf16.mxu1 %v903_v13 }
  0x6f   : > { %793 = vmatpush3.bf16.msra.mxu0 %v903_v13  ;;  %841 = vmatpush3.bf16.msra.mxu1 %v903_v13 }
  0x72   : > { %795 = vmatmul.mubr.bf16.vlgmr.msra.gmra.mrb[0].mxu0 %v269_v22  ;;  %811 = vmatmul.mubr.bf16.vlgmr.msra.gmra.mrb[0].mxu1 %v277_v23 }
  0x73   : > { %798 = vmatprep.mubr.bf16.mxu0 %v270_v24  ;;  %814 = vmatprep.mubr.bf16.mxu1 %v278_v25 }
  0x7a   : > { %799 = vmatmul.mubr.bf16.gmra.mrb[4].mxu0 %v271_v34  ;;  %815 = vmatmul.mubr.bf16.gmra.mrb[4].mxu1 %v279_v35 }
  0x7b   : > { %802 = vmatprep.mubr.bf16.mxu0 %v272_v36  ;;  %818 = vmatprep.mubr.bf16.mxu1 %v280_v37 }
  0x82   : > { %803 = vmatmul.mubr.bf16.gmra.mrb[8].mxu0 %v273_v46  ;;  %819 = vmatmul.mubr.bf16.gmra.mrb[8].mxu1 %v281_v47 }
  0x83   : > { %806 = vmatprep.mubr.bf16.mxu0 %v274_v48  ;;  %822 = vmatprep.mubr.bf16.mxu1 %v282_v49 }
  0x8a   : > { %807 = vmatmul.mubr.bf16.gmra.mrb[12].mxu0 %v275_v54  ;;  %823 = vmatmul.mubr.bf16.gmra.mrb[12].mxu1 %v283_v55 }
 0x145   : > { %v796_v57 = vpop.f32.mrb[0].mxu0  ;;  %v812_v59 = vpop.f32.mrb[0].mxu1 }
 0x146   : > { %v518_v60 = vmul.f32 %v796_v57, %v1199_v56  ;;  %v534_v61 = vmul.f32 %v812_v59, %v1199_v56  ;;  %v382_v62 = vpop.f32.mrb[1].mxu0  ;;  %v446_v63 = vpop.f32.mrb[1].mxu1 }
 0x147   : > { %v516_v0 = vmul.f32 %v1199_v56, %v382_v62  ;;  %v532_v1 = vmul.f32 %v1199_v56, %v446_v63  ;;  %v797_v2 = vpop.f32.mrb[2].mxu0  ;;  %v813_v3 = vpop.f32.mrb[2].mxu1 }
 0x148   : > { %v557_v4 = vadd.f32 %v1204_v58, %v518_v60  ;;  %v573_v5 = vadd.f32 %v1204_v58, %v534_v61  ;;  %v519_v6 = vmul.f32 %v797_v2, %v1199_v56  ;;  %v535_v7 = vmul.f32 %v813_v3, %v1199_v56  ;;  %v385_v8 = vpop.f32.mrb[3].mxu0  ;;  %v449_v9 = vpop.f32.mrb[3].mxu1 }
 0x149   : > { %v555_v10 = vadd.f32 %v1204_v58, %v516_v0  ;;  %v571_v11 = vadd.f32 %v1204_v58, %v532_v1  ;;  %v517_v12 = vmul.f32 %v1199_v56, %v385_v8  ;;  %v533_v13 = vmul.f32 %v1199_v56, %v449_v9 }
 0x14a   : > { %v589_v14 = vmax.f32 %v557_v4, 0.0  ;;  %v605_v15 = vmax.f32 %v573_v5, 0.0  ;;  %v558_v16 = vadd.f32 %v1204_v58, %v519_v6  ;;  %v574_v17 = vadd.f32 %v1204_v58, %v535_v7 }
 0x14b   : > { %v587_v18 = vmax.f32 %v555_v10, 0.0  ;;  %v603_v19 = vmax.f32 %v571_v11, 0.0  ;;  %v556_v20 = vadd.f32 %v1204_v58, %v517_v12  ;;  %v572_v21 = vadd.f32 %v1204_v58, %v533_v13 }
 0x14c   : > { %621 = vst [vmem:[%s1217_s28 + $0x10] sm:$0xff] %v589_v14  ;;  %637 = vst [vmem:[%s1217_s28 + $0x90] sm:$0xff] %v605_v15  ;;  %v590_v22 = vmax.f32 %v558_v16, 0.0  ;;  %v606_v23 = vmax.f32 %v574_v17, 0.0 }
 0x14d   : > { %619 = vst [vmem:[%s1217_s28] sm:$0xff] %v587_v18  ;;  %635 = vst [vmem:[%s1217_s28 + $0x80] sm:$0xff] %v603_v19  ;;  %v588_v24 = vmax.f32 %v556_v20, 0.0  ;;  %v604_v25 = vmax.f32 %v572_v21, 0.0  ;;  %v800_v26 = vpop.f32.mrb[4].mxu0  ;;  %v816_v27 = vpop.f32.mrb[4].mxu1 }
 0x14e   : > { %622 = vst [vmem:[%s1217_s28 + $0x18] sm:$0xff] %v590_v22  ;;  %638 = vst [vmem:[%s1217_s28 + $0x98] sm:$0xff] %v606_v23  ;;  %v522_v28 = vmul.f32 %v800_v26, %v1199_v56  ;;  %v538_v29 = vmul.f32 %v816_v27, %v1199_v56  ;;  %v398_v30 = vpop.f32.mrb[5].mxu0  ;;  %v462_v31 = vpop.f32.mrb[5].mxu1 }
 0x14f   : > { %620 = vst [vmem:[%s1217_s28 + $0x8] sm:$0xff] %v588_v24  ;;  %636 = vst [vmem:[%s1217_s28 + $0x88] sm:$0xff] %v604_v25  ;;  %v520_v32 = vmul.f32 %v1199_v56, %v398_v30  ;;  %v536_v33 = vmul.f32 %v1199_v56, %v462_v31  ;;  %v801_v34 = vpop.f32.mrb[6].mxu0  ;;  %v817_v35 = vpop.f32.mrb[6].mxu1 }
 0x150   : > { %v561_v36 = vadd.f32 %v1204_v58, %v522_v28  ;;  %v577_v37 = vadd.f32 %v1204_v58, %v538_v29  ;;  %v523_v38 = vmul.f32 %v801_v34, %v1199_v56  ;;  %v539_v39 = vmul.f32 %v817_v35, %v1199_v56  ;;  %v401_v40 = vpop.f32.mrb[7].mxu0  ;;  %v465_v41 = vpop.f32.mrb[7].mxu1 }
 0x151   : > { %v559_v42 = vadd.f32 %v1204_v58, %v520_v32  ;;  %v575_v43 = vadd.f32 %v1204_v58, %v536_v33  ;;  %v521_v44 = vmul.f32 %v1199_v56, %v401_v40  ;;  %v537_v45 = vmul.f32 %v1199_v56, %v465_v41 }
 0x152   : > { %v593_v46 = vmax.f32 %v561_v36, 0.0  ;;  %v609_v47 = vmax.f32 %v577_v37, 0.0  ;;  %v562_v48 = vadd.f32 %v1204_v58, %v523_v38  ;;  %v578_v49 = vadd.f32 %v1204_v58, %v539_v39 }
 0x153   : > { %v591_v50 = vmax.f32 %v559_v42, 0.0  ;;  %v607_v51 = vmax.f32 %v575_v43, 0.0  ;;  %v560_v52 = vadd.f32 %v1204_v58, %v521_v44  ;;  %v576_v53 = vadd.f32 %v1204_v58, %v537_v45 }
 0x154   : > { %625 = vst [vmem:[%s1217_s28 + $0x30] sm:$0xff] %v593_v46  ;;  %641 = vst [vmem:[%s1217_s28 + $0xb0] sm:$0xff] %v609_v47  ;;  %v594_v54 = vmax.f32 %v562_v48, 0.0  ;;  %v610_v55 = vmax.f32 %v578_v49, 0.0 }
 0x155   : > { %623 = vst [vmem:[%s1217_s28 + $0x20] sm:$0xff] %v591_v50  ;;  %639 = vst [vmem:[%s1217_s28 + $0xa0] sm:$0xff] %v607_v51  ;;  %v592_v57 = vmax.f32 %v560_v52, 0.0  ;;  %v608_v59 = vmax.f32 %v576_v53, 0.0  ;;  %v804_v60 = vpop.f32.mrb[8].mxu0  ;;  %v820_v61 = vpop.f32.mrb[8].mxu1 }
 0x156   : > { %626 = vst [vmem:[%s1217_s28 + $0x38] sm:$0xff] %v594_v54  ;;  %642 = vst [vmem:[%s1217_s28 + $0xb8] sm:$0xff] %v610_v55  ;;  %v526_v62 = vmul.f32 %v804_v60, %v1199_v56  ;;  %v542_v63 = vmul.f32 %v820_v61, %v1199_v56  ;;  %v414_v0 = vpop.f32.mrb[9].mxu0  ;;  %v478_v1 = vpop.f32.mrb[9].mxu1 }
 0x157   : > { %624 = vst [vmem:[%s1217_s28 + $0x28] sm:$0xff] %v592_v57  ;;  %640 = vst [vmem:[%s1217_s28 + $0xa8] sm:$0xff] %v608_v59  ;;  %v524_v2 = vmul.f32 %v1199_v56, %v414_v0  ;;  %v540_v3 = vmul.f32 %v1199_v56, %v478_v1  ;;  %v805_v4 = vpop.f32.mrb[10].mxu0  ;;  %v821_v5 = vpop.f32.mrb[10].mxu1 }
 0x158   : > { %v565_v6 = vadd.f32 %v1204_v58, %v526_v62  ;;  %v581_v7 = vadd.f32 %v1204_v58, %v542_v63  ;;  %v527_v8 = vmul.f32 %v805_v4, %v1199_v56  ;;  %v543_v9 = vmul.f32 %v821_v5, %v1199_v56  ;;  %v417_v10 = vpop.f32.mrb[11].mxu0  ;;  %v481_v11 = vpop.f32.mrb[11].mxu1 }
 0x159   : > { %v563_v12 = vadd.f32 %v1204_v58, %v524_v2  ;;  %v579_v13 = vadd.f32 %v1204_v58, %v540_v3  ;;  %v525_v14 = vmul.f32 %v1199_v56, %v417_v10  ;;  %v541_v15 = vmul.f32 %v1199_v56, %v481_v11 }
 0x15a   : > { %v597_v16 = vmax.f32 %v565_v6, 0.0  ;;  %v613_v17 = vmax.f32 %v581_v7, 0.0  ;;  %v566_v18 = vadd.f32 %v1204_v58, %v527_v8  ;;  %v582_v19 = vadd.f32 %v1204_v58, %v543_v9 }
 0x15b   : > { %v595_v20 = vmax.f32 %v563_v12, 0.0  ;;  %v611_v21 = vmax.f32 %v579_v13, 0.0  ;;  %v564_v22 = vadd.f32 %v1204_v58, %v525_v14  ;;  %v580_v23 = vadd.f32 %v1204_v58, %v541_v15 }
 0x15c   : > { %629 = vst [vmem:[%s1217_s28 + $0x50] sm:$0xff] %v597_v16  ;;  %645 = vst [vmem:[%s1217_s28 + $0xd0] sm:$0xff] %v613_v17  ;;  %v598_v24 = vmax.f32 %v566_v18, 0.0  ;;  %v614_v25 = vmax.f32 %v582_v19, 0.0 }
 0x15d   : > { %627 = vst [vmem:[%s1217_s28 + $0x40] sm:$0xff] %v595_v20  ;;  %643 = vst [vmem:[%s1217_s28 + $0xc0] sm:$0xff] %v611_v21  ;;  %v596_v26 = vmax.f32 %v564_v22, 0.0  ;;  %v612_v27 = vmax.f32 %v580_v23, 0.0  ;;  %v808_v28 = vpop.f32.mrb[12].mxu0  ;;  %v824_v29 = vpop.f32.mrb[12].mxu1 }
 0x15e   : > { %630 = vst [vmem:[%s1217_s28 + $0x58] sm:$0xff] %v598_v24  ;;  %646 = vst [vmem:[%s1217_s28 + $0xd8] sm:$0xff] %v614_v25  ;;  %v530_v30 = vmul.f32 %v808_v28, %v1199_v56  ;;  %v546_v31 = vmul.f32 %v824_v29, %v1199_v56  ;;  %v430_v32 = vpop.f32.mrb[13].mxu0  ;;  %v494_v33 = vpop.f32.mrb[13].mxu1 }
 0x15f   : > { %628 = vst [vmem:[%s1217_s28 + $0x48] sm:$0xff] %v596_v26  ;;  %644 = vst [vmem:[%s1217_s28 + $0xc8] sm:$0xff] %v612_v27  ;;  %v528_v34 = vmul.f32 %v1199_v56, %v430_v32  ;;  %v544_v35 = vmul.f32 %v1199_v56, %v494_v33  ;;  %v809_v36 = vpop.f32.mrb[14].mxu0  ;;  %v825_v37 = vpop.f32.mrb[14].mxu1 }
 0x160   : > { %v569_v38 = vadd.f32 %v1204_v58, %v530_v30  ;;  %v585_v39 = vadd.f32 %v1204_v58, %v546_v31  ;;  %v531_v40 = vmul.f32 %v809_v36, %v1199_v56  ;;  %v547_v41 = vmul.f32 %v825_v37, %v1199_v56  ;;  %v433_v42 = vpop.f32.mrb[15].mxu0  ;;  %v497_v43 = vpop.f32.mrb[15].mxu1 }
 0x161   : > { %v567_v44 = vadd.f32 %v1204_v58, %v528_v34  ;;  %v583_v45 = vadd.f32 %v1204_v58, %v544_v35  ;;  %v529_v46 = vmul.f32 %v1199_v56, %v433_v42  ;;  %v545_v47 = vmul.f32 %v1199_v56, %v497_v43 }
 0x162   : > { %v601_v48 = vmax.f32 %v569_v38, 0.0  ;;  %v617_v49 = vmax.f32 %v585_v39, 0.0  ;;  %v570_v50 = vadd.f32 %v1204_v58, %v531_v40  ;;  %v586_v51 = vadd.f32 %v1204_v58, %v547_v41 }
 0x163   : > { %v599_v52 = vmax.f32 %v567_v44, 0.0  ;;  %v615_v53 = vmax.f32 %v583_v45, 0.0  ;;  %v568_v54 = vadd.f32 %v1204_v58, %v529_v46  ;;  %v584_v55 = vadd.f32 %v1204_v58, %v545_v47 }
 0x164   : > { %633 = vst [vmem:[%s1217_s28 + $0x70] sm:$0xff] %v601_v48  ;;  %649 = vst [vmem:[%s1217_s28 + $0xf0] sm:$0xff] %v617_v49  ;;  %v602_v57 = vmax.f32 %v570_v50, 0.0  ;;  %v618_v56 = vmax.f32 %v586_v51, 0.0 }
 0x165   : > { %631 = vst [vmem:[%s1217_s28 + $0x60] sm:$0xff] %v599_v52  ;;  %647 = vst [vmem:[%s1217_s28 + $0xe0] sm:$0xff] %v615_v53  ;;  %v600_v59 = vmax.f32 %v568_v54, 0.0  ;;  %v616_v60 = vmax.f32 %v584_v55, 0.0 }
 0x166   : > { %634 = vst [vmem:[%s1217_s28 + $0x78] sm:$0xff] %v602_v57  ;;  %650 = vst [vmem:[%s1217_s28 + $0xf8] sm:$0xff] %v618_v56 }
 0x167   : > { %632 = vst [vmem:[%s1217_s28 + $0x68] sm:$0xff] %v600_v59  ;;  %648 = vst [vmem:[%s1217_s28 + $0xe8] sm:$0xff] %v616_v60 }
 0x168 PF: > { %s1337_s11 = smov %s1106_s15  ;;  %p15_p6 = scmp.ge.s32.totalorder %s1080_s26, 4  }
 0x169   : > { %s1338_s15 = smov %s992_s16  ;;  %s1339_s16 = smov %s996_s17 }
 0x16a   : > { %s1340_s17 = smov %s1337_s11  ;;  %s1341_s18 = smov %s1080_s26 }
 0x16b   :  { %17 = sbr.rel (!%p15_p6) target bundleno = 4 (0x4), region = 80 }
 0x172   :  { %673 = vsyncpa [#allocation3], 1 }
 0x173   :  { %675 = vsyncpa [#allocation3 + $0x1], 1 }
 0x174   :  { %676 = vsyncpa [#allocation5], 1 }

// kernel: _lambda_.7
= control target key start
LH: loop header
LB: loop body
LE: loop exit
PB: predicated region body
PF: predicated region fallthrough
CT: control target
= control target key end

     0   :  { %s1022_s18 = smov 0   ;;  %s1024_s19 = smov 0   ;;  %s1268_s0 = inlined_call_operand.vmem [shape: f32[2,256,128], index: 0, kind: input, shape index: {}]   ;;  %s1269_s1 = inlined_call_operand.vmem [shape: bf16[128,128], index: 1, kind: input, shape index: {}]   ;;  %s1270_s2 = inlined_call_operand.vmem [shape: f32[1,128], index: 2, kind: input, shape index: {}]   ;;  %s1271_s3 = inlined_call_operand.vmem [shape: f32[1,128], index: 3, kind: input, shape index: {}]   ;;  %s1272_s4 = inlined_call_operand.vmem [shape: f32[2,256,128], index: 4, kind: output, shape index: {0}]   ;;  %s1273_s5 = inlined_call_operand.vmem [shape: f32[2,1,128], index: 5, kind: output, shape index: {1}]  }
   0x1   :  { %s1026_s20 = smov 0  }
   0x2 LB: > { %s28_s21 = sadd.s32 1, %s986_s19  ;;  %p829_p0 = scmp.ge.s32.totalorder %s990_s20, 1  ;;  %s990_s20 = sphi %s1026_s20, %s16_s20   ;;  %s986_s19 = sphi %s1024_s19, %s1275_s19   ;;  %s982_s18 = sphi %s1022_s18, %s1274_s18  }
   0x3   : > { %p30_p1 = scmp.ge.s32.totalorder %s28_s21, 2  ;;  %p213_p2 = scmp.lt.s32.totalorder %s990_s20, 3 }
   0x5   : > { %s1277_s21 = smov (%p30_p1, %s28_s21), 0  ;;  %p214_p3 = pnand %p829_p0, %p213_p2 }
   0x6   : > { %v960_v0 = vld [vmem:[%s1269_s1] sm:$0xff] (!%p214_p3)   ;;  %p256_p4 = scmp.lt.s32.totalorder (!%p214_p3), %s982_s18, 1  ;;  %v961_v1 = vld [vmem:[%s1269_s1 + $0x8] sm:$0xff] (!%p214_p3)   ;;  %v962_v2 = vld [vmem:[%s1269_s1 + $0x10] sm:$0xff] (!%p214_p3)  }
   0x7   : > { %217 = sbr.rel (%p214_p3) target bundleno = 333 (0x14d), region = 36  ;;  %872 = vmatprep.subr.bf16.mxu0 (!%p214_p3), %v960_v0  ;;  %920 = vmatprep.subr.bf16.mxu1 (!%p214_p3), %v960_v0  ;;  %v963_v3 = vld [vmem:[%s1269_s1 + $0x18] sm:$0xff] (!%p214_p3)   ;;  %v964_v7 = vld [vmem:[%s1269_s1 + $0x20] sm:$0xff] (!%p214_p3)   ;;  %v965_v11 = vld [vmem:[%s1269_s1 + $0x28] sm:$0xff] (!%p214_p3)  }
   0x8   : > { %873 = vmatpush3.bf16.msra.mxu0 (!%p214_p3), %v960_v0  ;;  %928 = vmatpush3.bf16.msra.mxu1 (!%p214_p3), %v960_v0  ;;  %v966_v12 = vld [vmem:[%s1269_s1 + $0x30] sm:$0xff] (!%p214_p3)   ;;  %v967_v13 = vld [vmem:[%s1269_s1 + $0x38] sm:$0xff] (!%p214_p3)   ;;  %v1109_v56 = vld [vmem:[%s1270_s2] ss:$0 sm:$0xff] (!%p214_p3) }
   0x9   : > { %874 = vmatprep.subr.bf16.mxu0 (!%p214_p3), %v961_v1  ;;  %921 = vmatprep.subr.bf16.mxu1 (!%p214_p3), %v961_v1  ;;  %v1114_v58 = vld [vmem:[%s1271_s3] ss:$0 sm:$0xff] (!%p214_p3) }
   0xc   : > { %875 = vmatpush3.bf16.msra.mxu0 (!%p214_p3), %v961_v1  ;;  %929 = vmatpush3.bf16.msra.mxu1 (!%p214_p3), %v961_v1 }
   0xd   : > { %876 = vmatprep.subr.bf16.mxu0 (!%p214_p3), %v962_v2  ;;  %922 = vmatprep.subr.bf16.mxu1 (!%p214_p3), %v962_v2 }
   0xe   : > { %s1279_s18 = smov (!%p256_p4, %s982_s18), 1 }
   0xf   : > { %s846_s28 = sshll.u32 %s1279_s18, 8  ;;  %s280_s30 = scalar_lea.vmem %s1273_s5, %s1279_s18 }
  0x10   : > { %s1057_s6 = scalar_lea.vmem %s1268_s0, %s846_s28  ;;  %877 = vmatpush3.bf16.msra.mxu0 %v962_v2  ;;  %930 = vmatpush3.bf16.msra.mxu1 %v962_v2  ;;  %s1122_s27 = scalar_lea.vmem %s1272_s4, %s846_s28 }
  0x11   : > { %v282_v4 = vld [vmem:[%s1057_s6] sm:$0xff]  ;;  %v283_v5 = vld [vmem:[%s1057_s6 + $0x8] sm:$0xff]  ;;  %878 = vmatprep.subr.bf16.mxu0 %v963_v3  ;;  %923 = vmatprep.subr.bf16.mxu1 %v963_v3  ;;  %v284_v14 = vld [vmem:[%s1057_s6 + $0x10] sm:$0xff] }
  0x12   : > { %v314_v6 = vpack.c.bf16 %v283_v5, %v282_v4  ;;  %v298_v8 = vld [vmem:[%s1057_s6 + $0x80] sm:$0xff]  ;;  %v299_v9 = vld [vmem:[%s1057_s6 + $0x88] sm:$0xff]  ;;  %v285_v15 = vld [vmem:[%s1057_s6 + $0x18] sm:$0xff] }
  0x13   : > { %v322_v10 = vpack.c.bf16 %v299_v9, %v298_v8  ;;  %v286_v16 = vld [vmem:[%s1057_s6 + $0x20] sm:$0xff]  ;;  %v287_v17 = vld [vmem:[%s1057_s6 + $0x28] sm:$0xff]  ;;  %v300_v18 = vld [vmem:[%s1057_s6 + $0x90] sm:$0xff]  ;;  %v315_v22 = vpack.c.bf16 %v285_v15, %v284_v14 }
  0x14   : > { %888 = vmatprep.mubr.bf16.mxu0 %v314_v6  ;;  %879 = vmatpush3.bf16.msra.mxu0 %v963_v3  ;;  %v301_v19 = vld [vmem:[%s1057_s6 + $0x98] sm:$0xff]  ;;  %v302_v20 = vld [vmem:[%s1057_s6 + $0xa0] sm:$0xff]  ;;  %v303_v21 = vld [vmem:[%s1057_s6 + $0xa8] sm:$0xff]  ;;  %v316_v23 = vpack.c.bf16 %v287_v17, %v286_v16 }
  0x15   : > { %880 = vmatprep.subr.bf16.mxu0 %v964_v7  ;;  %931 = vmatpush3.bf16.msra.mxu1 %v963_v3  ;;  %v323_v24 = vpack.c.bf16 %v301_v19, %v300_v18  ;;  %v324_v25 = vpack.c.bf16 %v303_v21, %v302_v20  ;;  %v288_v26 = vld [vmem:[%s1057_s6 + $0x30] sm:$0xff]  ;;  %v289_v27 = vld [vmem:[%s1057_s6 + $0x38] sm:$0xff]  ;;  %v290_v28 = vld [vmem:[%s1057_s6 + $0x40] sm:$0xff] }
  0x16   : > { %924 = vmatprep.subr.bf16.mxu1 %v964_v7  ;;  %904 = vmatprep.mubr.bf16.mxu1 %v322_v10  ;;  %v291_v29 = vld [vmem:[%s1057_s6 + $0x48] sm:$0xff]  ;;  %v304_v30 = vld [vmem:[%s1057_s6 + $0xb0] sm:$0xff]  ;;  %v305_v31 = vld [vmem:[%s1057_s6 + $0xb8] sm:$0xff]  ;;  %v317_v34 = vpack.c.bf16 %v289_v27, %v288_v26 }
  0x17   : > { %v306_v32 = vld [vmem:[%s1057_s6 + $0xc0] sm:$0xff]  ;;  %v307_v33 = vld [vmem:[%s1057_s6 + $0xc8] sm:$0xff]  ;;  %v318_v35 = vpack.c.bf16 %v291_v29, %v290_v28  ;;  %v325_v36 = vpack.c.bf16 %v305_v31, %v304_v30  ;;  %v292_v38 = vld [vmem:[%s1057_s6 + $0x50] sm:$0xff] }
  0x18   : > { %881 = vmatpush3.bf16.msra.mxu0 %v964_v7  ;;  %v326_v37 = vpack.c.bf16 %v307_v33, %v306_v32  ;;  %v293_v39 = vld [vmem:[%s1057_s6 + $0x58] sm:$0xff]  ;;  %v294_v40 = vld [vmem:[%s1057_s6 + $0x60] sm:$0xff]  ;;  %v295_v41 = vld [vmem:[%s1057_s6 + $0x68] sm:$0xff] }
  0x19   : > { %882 = vmatprep.subr.bf16.mxu0 %v965_v11  ;;  %932 = vmatpush3.bf16.msra.mxu1 %v964_v7  ;;  %v308_v42 = vld [vmem:[%s1057_s6 + $0xd0] sm:$0xff]  ;;  %v309_v43 = vld [vmem:[%s1057_s6 + $0xd8] sm:$0xff]  ;;  %v310_v44 = vld [vmem:[%s1057_s6 + $0xe0] sm:$0xff]  ;;  %v319_v46 = vpack.c.bf16 %v293_v39, %v292_v38  ;;  %v320_v47 = vpack.c.bf16 %v295_v41, %v294_v40 }
  0x1a   : > { %925 = vmatprep.subr.bf16.mxu1 %v965_v11  ;;  %v311_v45 = vld [vmem:[%s1057_s6 + $0xe8] sm:$0xff]  ;;  %v327_v48 = vpack.c.bf16 %v309_v43, %v308_v42  ;;  %v296_v50 = vld [vmem:[%s1057_s6 + $0x70] sm:$0xff]  ;;  %v297_v51 = vld [vmem:[%s1057_s6 + $0x78] sm:$0xff] }
  0x1b   : > { %v328_v49 = vpack.c.bf16 %v311_v45, %v310_v44  ;;  %v312_v52 = vld [vmem:[%s1057_s6 + $0xf0] sm:$0xff]  ;;  %v313_v53 = vld [vmem:[%s1057_s6 + $0xf8] sm:$0xff]  ;;  %v321_v54 = vpack.c.bf16 %v297_v51, %v296_v50 }
  0x1c   : > { %883 = vmatpush3.bf16.msra.mxu0 %v965_v11  ;;  %v329_v55 = vpack.c.bf16 %v313_v53, %v312_v52 }
  0x1d   : > { %884 = vmatprep.subr.bf16.mxu0 %v966_v12  ;;  %933 = vmatpush3.bf16.msra.mxu1 %v965_v11 }
  0x1e   : > { %926 = vmatprep.subr.bf16.mxu1 %v966_v12 }
  0x20   : > { %885 = vmatpush3.bf16.msra.mxu0 %v966_v12 }
  0x21   : > { %886 = vmatprep.subr.bf16.mxu0 %v967_v13  ;;  %934 = vmatpush3.bf16.msra.mxu1 %v966_v12 }
  0x22   : > { %927 = vmatprep.subr.bf16.mxu1 %v967_v13 }
  0x24   : > { %887 = vmatpush3.bf16.msra.mxu0 %v967_v13 }
  0x25   : > { %935 = vmatpush3.bf16.msra.mxu1 %v967_v13 }
  0x27   : > { %889 = vmatmul.mubr.bf16.vlgmr.msra.gmra.mrb[0].mxu0 %v315_v22 }
  0x28   : > { %892 = vmatprep.mubr.bf16.mxu0 %v316_v23  ;;  %905 = vmatmul.mubr.bf16.vlgmr.msra.gmra.mrb[0].mxu1 %v323_v24 }
  0x29   : > { %908 = vmatprep.mubr.bf16.mxu1 %v324_v25 }
  0x2f   : > { %893 = vmatmul.mubr.bf16.gmra.mrb[4].mxu0 %v317_v34 }
  0x30   : > { %896 = vmatprep.mubr.bf16.mxu0 %v318_v35  ;;  %909 = vmatmul.mubr.bf16.gmra.mrb[4].mxu1 %v325_v36 }
  0x31   : > { %912 = vmatprep.mubr.bf16.mxu1 %v326_v37 }
  0x37   : > { %897 = vmatmul.mubr.bf16.gmra.mrb[8].mxu0 %v319_v46 }
  0x38   : > { %900 = vmatprep.mubr.bf16.mxu0 %v320_v47  ;;  %913 = vmatmul.mubr.bf16.gmra.mrb[8].mxu1 %v327_v48 }
  0x39   : > { %916 = vmatprep.mubr.bf16.mxu1 %v328_v49 }
  0x3f   : > { %901 = vmatmul.mubr.bf16.gmra.mrb[12].mxu0 %v321_v54 }
  0x40   : > { %917 = vmatmul.mubr.bf16.gmra.mrb[12].mxu1 %v329_v55 }
  0xfa   : > { %v890_v57 = vpop.f32.mrb[0].mxu0 }
  0xfb   : > { %v564_v59 = vmul.f32 %v890_v57, %v1109_v56  ;;  %v428_v60 = vpop.f32.mrb[1].mxu0  ;;  %v906_v61 = vpop.f32.mrb[0].mxu1 }
  0xfc   : > { %v562_v62 = vmul.f32 %v1109_v56, %v428_v60  ;;  %v891_v63 = vpop.f32.mrb[2].mxu0  ;;  %v580_v0 = vmul.f32 %v906_v61, %v1109_v56  ;;  %v492_v1 = vpop.f32.mrb[1].mxu1 }
  0xfd   : > { %v603_v2 = vadd.f32 %v1114_v58, %v564_v59  ;;  %v565_v3 = vmul.f32 %v891_v63, %v1109_v56  ;;  %v431_v4 = vpop.f32.mrb[3].mxu0  ;;  %v578_v5 = vmul.f32 %v1109_v56, %v492_v1  ;;  %v907_v6 = vpop.f32.mrb[2].mxu1 }
  0xfe   : > { %v601_v7 = vadd.f32 %v1114_v58, %v562_v62  ;;  %v563_v8 = vmul.f32 %v1109_v56, %v431_v4  ;;  %v1132_v9 = vadd.f32 %v1114_v58, %v580_v0  ;;  %v581_v10 = vmul.f32 %v907_v6, %v1109_v56  ;;  %v495_v11 = vpop.f32.mrb[3].mxu1 }
  0xff   : > { %635 = vst [vmem:[%s1122_s27 + $0x10] sm:$0xff] %v603_v2  ;;  %v604_v12 = vadd.f32 %v1114_v58, %v565_v3  ;;  %v1138_v13 = vadd.f32 %v1114_v58, %v578_v5  ;;  %v579_v14 = vmul.f32 %v1109_v56, %v495_v11 }
 0x100   : > { %633 = vst [vmem:[%s1122_s27] sm:$0xff] %v601_v7  ;;  %v602_v15 = vadd.f32 %v1114_v58, %v563_v8  ;;  %651 = vst [vmem:[%s1122_s27 + $0x90] sm:$0xff] %v1132_v9  ;;  %v1146_v16 = vadd.f32 %v1114_v58, %v581_v10 }
 0x101   : > { %636 = vst [vmem:[%s1122_s27 + $0x18] sm:$0xff] %v604_v12  ;;  %649 = vst [vmem:[%s1122_s27 + $0x80] sm:$0xff] %v1138_v13  ;;  %v1152_v17 = vadd.f32 %v1114_v58, %v579_v14 }
 0x102   : > { %634 = vst [vmem:[%s1122_s27 + $0x8] sm:$0xff] %v602_v15  ;;  %v665_v18 = vadd.f32 %v602_v15, %v601_v7  ;;  %v894_v19 = vpop.f32.mrb[4].mxu0  ;;  %652 = vst [vmem:[%s1122_s27 + $0x98] sm:$0xff] %v1146_v16 }
 0x103   : > { %v568_v20 = vmul.f32 %v894_v19, %v1109_v56  ;;  %v444_v21 = vpop.f32.mrb[5].mxu0  ;;  %650 = vst [vmem:[%s1122_s27 + $0x88] sm:$0xff] %v1152_v17  ;;  %v910_v22 = vpop.f32.mrb[4].mxu1 }
 0x104   : > { %v666_v23 = vadd.f32 %v665_v18, %v603_v2  ;;  %v566_v24 = vmul.f32 %v1109_v56, %v444_v21  ;;  %v895_v25 = vpop.f32.mrb[6].mxu0  ;;  %v584_v26 = vmul.f32 %v910_v22, %v1109_v56  ;;  %v508_v27 = vpop.f32.mrb[5].mxu1 }
 0x105   : > { %v607_v28 = vadd.f32 %v1114_v58, %v568_v20  ;;  %v569_v29 = vmul.f32 %v895_v25, %v1109_v56  ;;  %v447_v30 = vpop.f32.mrb[7].mxu0  ;;  %v582_v31 = vmul.f32 %v1109_v56, %v508_v27  ;;  %v911_v32 = vpop.f32.mrb[6].mxu1 }
 0x106   : > { %v605_v33 = vadd.f32 %v1114_v58, %v566_v24  ;;  %v667_v34 = vadd.f32 %v666_v23, %v604_v12  ;;  %v567_v35 = vmul.f32 %v1109_v56, %v447_v30  ;;  %v1168_v36 = vadd.f32 %v1114_v58, %v584_v26  ;;  %v511_v37 = vpop.f32.mrb[7].mxu1 }
 0x107   : > { %639 = vst [vmem:[%s1122_s27 + $0x30] sm:$0xff] %v607_v28  ;;  %v608_v38 = vadd.f32 %v1114_v58, %v569_v29  ;;  %v1173_v39 = vadd.f32 %v1114_v58, %v582_v31  ;;  %v585_v40 = vmul.f32 %v911_v32, %v1109_v56  ;;  %v583_v41 = vmul.f32 %v1109_v56, %v511_v37 }
 0x108   : > { %637 = vst [vmem:[%s1122_s27 + $0x20] sm:$0xff] %v605_v33  ;;  %v668_v42 = vadd.f32 %v667_v34, %v605_v33  ;;  %v606_v43 = vadd.f32 %v1114_v58, %v567_v35  ;;  %655 = vst [vmem:[%s1122_s27 + $0xb0] sm:$0xff] %v1168_v36 }
 0x109   : > { %640 = vst [vmem:[%s1122_s27 + $0x38] sm:$0xff] %v608_v38  ;;  %653 = vst [vmem:[%s1122_s27 + $0xa0] sm:$0xff] %v1173_v39  ;;  %v1185_v44 = vadd.f32 %v1114_v58, %v585_v40  ;;  %v1188_v45 = vadd.f32 %v1114_v58, %v583_v41 }
 0x10a   : > { %638 = vst [vmem:[%s1122_s27 + $0x28] sm:$0xff] %v606_v43  ;;  %v669_v46 = vadd.f32 %v668_v42, %v606_v43  ;;  %v898_v47 = vpop.f32.mrb[8].mxu0 }
 0x10b   : > { %v572_v48 = vmul.f32 %v898_v47, %v1109_v56  ;;  %v460_v49 = vpop.f32.mrb[9].mxu0  ;;  %656 = vst [vmem:[%s1122_s27 + $0xb8] sm:$0xff] %v1185_v44  ;;  %654 = vst [vmem:[%s1122_s27 + $0xa8] sm:$0xff] %v1188_v45  ;;  %v914_v50 = vpop.f32.mrb[8].mxu1 }
 0x10c   : > { %v670_v51 = vadd.f32 %v669_v46, %v607_v28  ;;  %v570_v52 = vmul.f32 %v1109_v56, %v460_v49  ;;  %v899_v53 = vpop.f32.mrb[10].mxu0  ;;  %v588_v54 = vmul.f32 %v914_v50, %v1109_v56  ;;  %v524_v55 = vpop.f32.mrb[9].mxu1 }
 0x10d   : > { %v611_v57 = vadd.f32 %v1114_v58, %v572_v48  ;;  %v573_v59 = vmul.f32 %v899_v53, %v1109_v56  ;;  %v463_v60 = vpop.f32.mrb[11].mxu0  ;;  %v586_v61 = vmul.f32 %v1109_v56, %v524_v55  ;;  %v915_v62 = vpop.f32.mrb[10].mxu1 }
 0x10e   : > { %v609_v63 = vadd.f32 %v1114_v58, %v570_v52  ;;  %v671_v0 = vadd.f32 %v670_v51, %v608_v38  ;;  %v571_v1 = vmul.f32 %v1109_v56, %v463_v60  ;;  %v1204_v2 = vadd.f32 %v1114_v58, %v588_v54  ;;  %v527_v3 = vpop.f32.mrb[11].mxu1 }
 0x10f   : > { %643 = vst [vmem:[%s1122_s27 + $0x50] sm:$0xff] %v611_v57  ;;  %v612_v4 = vadd.f32 %v1114_v58, %v573_v59  ;;  %v625_v5 = vadd.f32 %v1114_v58, %v586_v61  ;;  %v589_v6 = vmul.f32 %v915_v62, %v1109_v56  ;;  %v587_v7 = vmul.f32 %v1109_v56, %v527_v3 }
 0x110   : > { %641 = vst [vmem:[%s1122_s27 + $0x40] sm:$0xff] %v609_v63  ;;  %v672_v8 = vadd.f32 %v671_v0, %v609_v63  ;;  %v610_v10 = vadd.f32 %v1114_v58, %v571_v1  ;;  %659 = vst [vmem:[%s1122_s27 + $0xd0] sm:$0xff] %v1204_v2 }
 0x111   : > { %644 = vst [vmem:[%s1122_s27 + $0x58] sm:$0xff] %v612_v4  ;;  %657 = vst [vmem:[%s1122_s27 + $0xc0] sm:$0xff] %v625_v5  ;;  %v628_v11 = vadd.f32 %v1114_v58, %v589_v6  ;;  %v626_v12 = vadd.f32 %v1114_v58, %v587_v7 }
 0x112   : > { %642 = vst [vmem:[%s1122_s27 + $0x48] sm:$0xff] %v610_v10  ;;  %v673_v14 = vadd.f32 %v672_v8, %v610_v10  ;;  %v902_v15 = vpop.f32.mrb[12].mxu0 }
 0x113   : > { %v576_v18 = vmul.f32 %v902_v15, %v1109_v56  ;;  %v476_v19 = vpop.f32.mrb[13].mxu0  ;;  %660 = vst [vmem:[%s1122_s27 + $0xd8] sm:$0xff] %v628_v11  ;;  %658 = vst [vmem:[%s1122_s27 + $0xc8] sm:$0xff] %v626_v12  ;;  %v918_v20 = vpop.f32.mrb[12].mxu1 }
 0x114   : > { %v674_v21 = vadd.f32 %v673_v14, %v611_v57  ;;  %v574_v22 = vmul.f32 %v1109_v56, %v476_v19  ;;  %v903_v23 = vpop.f32.mrb[14].mxu0  ;;  %v592_v24 = vmul.f32 %v918_v20, %v1109_v56  ;;  %v540_v25 = vpop.f32.mrb[13].mxu1 }
 0x115   : > { %v615_v26 = vadd.f32 %v1114_v58, %v576_v18  ;;  %v577_v27 = vmul.f32 %v903_v23, %v1109_v56  ;;  %v479_v28 = vpop.f32.mrb[15].mxu0  ;;  %v590_v29 = vmul.f32 %v1109_v56, %v540_v25  ;;  %v919_v30 = vpop.f32.mrb[14].mxu1 }
 0x116   : > { %v613_v31 = vadd.f32 %v1114_v58, %v574_v22  ;;  %v675_v32 = vadd.f32 %v674_v21, %v612_v4  ;;  %v575_v33 = vmul.f32 %v1109_v56, %v479_v28  ;;  %v631_v34 = vadd.f32 %v1114_v58, %v592_v24  ;;  %v543_v35 = vpop.f32.mrb[15].mxu1 }
 0x117   : > { %647 = vst [vmem:[%s1122_s27 + $0x70] sm:$0xff] %v615_v26  ;;  %v616_v37 = vadd.f32 %v1114_v58, %v577_v27  ;;  %v629_v38 = vadd.f32 %v1114_v58, %v590_v29  ;;  %v593_v40 = vmul.f32 %v919_v30, %v1109_v56  ;;  %v591_v41 = vmul.f32 %v1109_v56, %v543_v35 }
 0x118   : > { %645 = vst [vmem:[%s1122_s27 + $0x60] sm:$0xff] %v613_v31  ;;  %v676_v42 = vadd.f32 %v675_v32, %v613_v31  ;;  %v614_v43 = vadd.f32 %v1114_v58, %v575_v33  ;;  %663 = vst [vmem:[%s1122_s27 + $0xf0] sm:$0xff] %v631_v34 }
 0x119   : > { %648 = vst [vmem:[%s1122_s27 + $0x78] sm:$0xff] %v616_v37  ;;  %661 = vst [vmem:[%s1122_s27 + $0xe0] sm:$0xff] %v629_v38  ;;  %v632_v46 = vadd.f32 %v1114_v58, %v593_v40  ;;  %v630_v47 = vadd.f32 %v1114_v58, %v591_v41 }
 0x11a   : > { %646 = vst [vmem:[%s1122_s27 + $0x68] sm:$0xff] %v614_v43  ;;  %v677_v48 = vadd.f32 %v676_v42, %v614_v43 }
 0x11b   : > { %664 = vst [vmem:[%s1122_s27 + $0xf8] sm:$0xff] %v632_v46  ;;  %662 = vst [vmem:[%s1122_s27 + $0xe8] sm:$0xff] %v630_v47 }
 0x11c   : > { %v678_v49 = vadd.f32 %v677_v48, %v615_v26 }
 0x11e   : > { %v679_v50 = vadd.f32 %v678_v49, %v616_v37 }
 0x120   : > { %v680_v51 = vadd.f32 %v679_v50, %v1138_v13 }
 0x122   : > { %v681_v56 = vadd.f32 %v680_v51, %v1152_v17 }
 0x124   : > { %v682_v52 = vadd.f32 %v681_v56, %v1132_v9 }
 0x126   : > { %v683_v53 = vadd.f32 %v682_v52, %v1146_v16 }
 0x128   : > { %v684_v54 = vadd.f32 %v683_v53, %v1173_v39 }
 0x12a   : > { %v685_v55 = vadd.f32 %v684_v54, %v1188_v45 }
 0x12c   : > { %v686_v58 = vadd.f32 %v685_v55, %v1168_v36 }
 0x12e   : > { %v687_v57 = vadd.f32 %v686_v58, %v1185_v44 }
 0x130   : > { %v688_v59 = vadd.f32 %v687_v57, %v625_v5 }
 0x132   : > { %v689_v60 = vadd.f32 %v688_v59, %v626_v12 }
 0x134   : > { %v690_v61 = vadd.f32 %v689_v60, %v1204_v2 }
 0x136   : > { %v691_v13 = vadd.f32 %v690_v61, %v628_v11 }
 0x138   : > { %v692_v62 = vadd.f32 %v691_v13, %v629_v38 }
 0x13a   : > { %v693_v17 = vadd.f32 %v692_v62, %v630_v47 }
 0x13c   : > { %v694_v63 = vadd.f32 %v693_v17, %v631_v34 }
 0x13e   : > { %v695_v9 = vadd.f32 %v694_v63, %v632_v46 }
 0x140   : > { %v696_v0 = vrot.slane %v695_v9, 4 }
 0x142   : > { %v697_v16 = vadd.f32 %v696_v0, %v695_v9 }
 0x144   : > { %v698_v1 = vrot.slane %v697_v16, 2 }
 0x146   : > { %v699_v39 = vadd.f32 %v698_v1, %v697_v16 }
 0x148   : > { %v700_v3 = vrot.slane %v699_v39, 1 }
 0x14a   : > { %v701_v36 = vadd.f32 %v700_v3, %v699_v39 }
 0x14c   : > { %702 = vst [vmem:[%s280_s30] sm:$0x1] %v701_v36 }
 0x14d PF: > { %s16_s20 = sadd.s32 1, %s990_s20   ;;  %s1274_s18 = smov %s986_s19 }
 0x14e   : > { %p13_p5 = scmp.ge.s32.totalorder %s16_s20, 4   ;;  %s1275_s19 = smov %s1277_s21 }
 0x150   :  { %15 = sbr.rel (!%p13_p5) target bundleno = 2 (0x2), region = 78 }

// kernel: _lambda_.8
= control target key start
LH: loop header
LB: loop body
LE: loop exit
PB: predicated region body
PF: predicated region fallthrough
CT: control target
= control target key end

     0   :  { %v383_v0 = vmov 0.0|0.0   ;;  %vm384_vm0 = vmmov 0   ;;  %v385_v4 = vmov 0.0   ;;  %v386_v25 = vmov 1966171168   ;;  %s528_s1 = inlined_call_operand.vmem [shape: f32[128,128], index: 1, kind: input, shape index: {}]   ;;  %s529_s2 = inlined_call_operand.vmem [shape: f32[128,128], index: 2, kind: input, shape index: {}]   ;;  %s530_s0 = inlined_call_operand.vmem [shape: f32[2,1,128], index: 0, kind: input, shape index: {}]   ;;  %s531_s3 = inlined_call_operand.vmem [shape: f32[2,128], index: 3, kind: output, shape index: {}]  }
   0x1   :  { %327 = vmatprep.subr.bf16.mxu0 %v383_v0  ;;  %v20_v1 = vld [vmem:[%s528_s1] sm:$0xff]  ;;  %v21_v2 = vld [vmem:[%s528_s1 + $0x8] sm:$0xff]  ;;  %v22_v3 = vld [vmem:[%s528_s1 + $0x10] sm:$0xff]  ;;  %289 = vmatprep.mubr.msk.f32.mxu0 %vm384_vm0, %v385_v4  ;;  %v40_v26 = vunpack.c.l.s4 %v386_v25  ;;  %v42_v27 = vlaneseq }
   0x2   :  { %v328_v5 = vpack.c.bf16 %v21_v2, %v20_v1  ;;  %v23_v6 = vld [vmem:[%s528_s1 + $0x18] sm:$0xff]  ;;  %351 = vmatprep.subr.bf16.mxu1 %v383_v0  ;;  %324 = vmatprep.mubr.msk.f32.mxu1 %vm384_vm0, %v385_v4  ;;  %v24_v8 = vld [vmem:[%s528_s1 + $0x20] sm:$0xff]  ;;  %v25_v9 = vld [vmem:[%s528_s1 + $0x28] sm:$0xff] }
   0x3   :  { %v331_v7 = vpack.c.bf16 %v23_v6, %v22_v3  ;;  %v125_v10 = vld [vmem:[%s529_s2] sm:$0xff]  ;;  %v126_v11 = vld [vmem:[%s529_s2 + $0x8] sm:$0xff]  ;;  %v127_v12 = vld [vmem:[%s529_s2 + $0x10] sm:$0xff]  ;;  %v334_v13 = vpack.c.bf16 %v25_v9, %v24_v8  ;;  %v41_v38 = vunpack.c.0.s8 %v40_v26  ;;  %v43_v39 = vshrl.u32 %v42_v27, 7 }
   0x4   :  { %329 = vmatpush3.bf16.msra.mxu0 %v328_v5  ;;  %v352_v14 = vpack.c.bf16 %v126_v11, %v125_v10  ;;  %v128_v15 = vld [vmem:[%s529_s2 + $0x18] sm:$0xff]  ;;  %v26_v16 = vld [vmem:[%s528_s1 + $0x30] sm:$0xff]  ;;  %v129_v19 = vld [vmem:[%s529_s2 + $0x20] sm:$0xff] }
   0x5   :  { %330 = vmatprep.subr.bf16.mxu0 %v383_v0  ;;  %v27_v17 = vld [vmem:[%s528_s1 + $0x38] sm:$0xff]  ;;  %v355_v18 = vpack.c.bf16 %v128_v15, %v127_v12  ;;  %v130_v20 = vld [vmem:[%s529_s2 + $0x28] sm:$0xff]  ;;  %v28_v22 = vld [vmem:[%s528_s1 + $0x40] sm:$0xff]  ;;  %v44_v47 = vsub.s32 %v41_v38, %v43_v39 }
   0x6   :  { %353 = vmatpush3.bf16.msra.mxu1 %v352_v14  ;;  %v337_v21 = vpack.c.bf16 %v27_v17, %v26_v16  ;;  %v29_v23 = vld [vmem:[%s528_s1 + $0x48] sm:$0xff]  ;;  %v358_v24 = vpack.c.bf16 %v130_v20, %v129_v19  ;;  %v131_v28 = vld [vmem:[%s529_s2 + $0x30] sm:$0xff]  ;;  %v132_v29 = vld [vmem:[%s529_s2 + $0x38] sm:$0xff] }
   0x7   :  { %354 = vmatprep.subr.bf16.mxu1 %v383_v0  ;;  %v340_v30 = vpack.c.bf16 %v29_v23, %v28_v22  ;;  %v14_v31 = vld [vmem:[%s530_s0] sm:$0x1]  ;;  %v15_v32 = vld [vmem:[%s530_s0 + $0x1] sm:$0x1]  ;;  %v30_v33 = vld [vmem:[%s528_s1 + $0x50] sm:$0xff]  ;;  %v361_v35 = vpack.c.bf16 %v132_v29, %v131_v28 }
   0x8   :  { %332 = vmatpush3.bf16.msra.mxu0 %v331_v7  ;;  %v31_v34 = vld [vmem:[%s528_s1 + $0x58] sm:$0xff]  ;;  %v18_v36 = vmul.f32 0.00390625, %v14_v31  ;;  %v19_v37 = vmul.f32 0.00390625, %v15_v32  ;;  %v133_v40 = vld [vmem:[%s529_s2 + $0x40] sm:$0xff]  ;;  %v134_v41 = vld [vmem:[%s529_s2 + $0x48] sm:$0xff] }
   0x9   :  { %333 = vmatprep.subr.bf16.mxu0 %v383_v0  ;;  %v343_v42 = vpack.c.bf16 %v31_v34, %v30_v33  ;;  %v32_v43 = vld [vmem:[%s528_s1 + $0x60] sm:$0xff]  ;;  %v33_v44 = vld [vmem:[%s528_s1 + $0x68] sm:$0xff]  ;;  %v364_v45 = vpack.c.bf16 %v134_v41, %v133_v40  ;;  %v135_v48 = vld [vmem:[%s529_s2 + $0x50] sm:$0xff] }
   0xa   :  { %356 = vmatpush3.bf16.msra.mxu1 %v355_v18  ;;  %v38_v46 = vcombine.low %v18_v36, %v19_v37  ;;  %v136_v49 = vld [vmem:[%s529_s2 + $0x58] sm:$0xff]  ;;  %v346_v50 = vpack.c.bf16 %v33_v44, %v32_v43  ;;  %v34_v51 = vld [vmem:[%s528_s1 + $0x70] sm:$0xff]  ;;  %v137_v55 = vld [vmem:[%s529_s2 + $0x60] sm:$0xff] }
   0xb   :  { %357 = vmatprep.subr.bf16.mxu1 %v383_v0  ;;  %v35_v52 = vld [vmem:[%s528_s1 + $0x78] sm:$0xff]  ;;  %v367_v53 = vpack.c.bf16 %v136_v49, %v135_v48  ;;  %v138_v56 = vld [vmem:[%s529_s2 + $0x68] sm:$0xff]  ;;  %v139_v60 = vld [vmem:[%s529_s2 + $0x70] sm:$0xff] }
   0xc   :  { %335 = vmatpush3.bf16.msra.mxu0 %v334_v13  ;;  %v45_v54 = vrot.slane %v38_v46, %v44_v47  ;;  %v349_v57 = vpack.c.bf16 %v35_v52, %v34_v51  ;;  %v370_v58 = vpack.c.bf16 %v138_v56, %v137_v55  ;;  %v140_v61 = vld [vmem:[%s529_s2 + $0x78] sm:$0xff] }
   0xd   :  { %336 = vmatprep.subr.bf16.mxu0 %v383_v0  ;;  %v373_v62 = vpack.c.bf16 %v140_v61, %v139_v60 }
   0xe   :  { %359 = vmatpush3.bf16.msra.mxu1 %v358_v24  ;;  %v52_v59 = vrot.slane %v45_v54, %v44_v47 }
   0xf   :  { %360 = vmatprep.subr.bf16.mxu1 %v383_v0 }
  0x10   :  { %338 = vmatpush3.bf16.msra.mxu0 %v337_v21 }
  0x11   :  { %339 = vmatprep.subr.bf16.mxu0 %v383_v0 }
  0x12   :  { %362 = vmatpush3.bf16.msra.mxu1 %v361_v35 }
  0x13   :  { %363 = vmatprep.subr.bf16.mxu1 %v383_v0 }
  0x14   :  { %341 = vmatpush3.bf16.msra.mxu0 %v340_v30 }
  0x15   :  { %342 = vmatprep.subr.bf16.mxu0 %v383_v0 }
  0x16   :  { %365 = vmatpush3.bf16.msra.mxu1 %v364_v45 }
  0x17   :  { %366 = vmatprep.subr.bf16.mxu1 %v383_v0 }
  0x18   :  { %344 = vmatpush3.bf16.msra.mxu0 %v343_v42 }
  0x19   :  { %345 = vmatprep.subr.bf16.mxu0 %v383_v0 }
  0x1a   :  { %368 = vmatpush3.bf16.msra.mxu1 %v367_v53 }
  0x1b   :  { %369 = vmatprep.subr.bf16.mxu1 %v383_v0 }
  0x1c   :  { %347 = vmatpush3.bf16.msra.mxu0 %v346_v50 }
  0x1d   :  { %348 = vmatprep.subr.bf16.mxu0 %v383_v0 }
  0x1e   :  { %371 = vmatpush3.bf16.msra.mxu1 %v370_v58 }
  0x1f   :  { %372 = vmatprep.subr.bf16.mxu1 %v383_v0 }
  0x20   :  { %350 = vmatpush3.bf16.msra.mxu0 %v349_v57 }
  0x22   :  { %374 = vmatpush3.bf16.msra.mxu1 %v373_v62 }
  0x23   :  { %290 = vmatmul.mubr.f32.vlgmr.msra.gmra.mrb[0].mxu0 %v52_v59 }
  0xf6   :  { %v120_v63 = vpop.f32.mrb[0].mxu0 }
  0xf7   :  { %v124_v1 = vmax.f32 %v120_v63, 0.0  ;;  %v291_v2 = vpop.f32.mrb[1].mxu0 }
  0xf9   :  { %325 = vmatmul.mubr.f32.vlgmr.msra.gmra.mrb[0].mxu1 %v124_v1 }
 0x1cc   :  { %v207_v3 = vpop.f32.mrb[0].mxu1 }
 0x1cd   :  { %v222_v4 = vmul.f32 -1.442695, %v207_v3  ;;  %v326_v5 = vpop.f32.mrb[1].mxu1 }
 0x1cf   :  { %379 = vpow2.f32 %v222_v4 }
 0x1d9   :  { %v380_v6 = vpop.eup %379 }
 0x1da   :  { %v214_v0 = vadd.f32 1.0, %v380_v6 }
 0x1dc   :  { %381 = vrcp.f32 %v214_v0 }
 0x1e6   :  { %v382_v7 = vpop.eup %381 }
 0x1e7   :  { %217 = vst [vmem:[%s531_s3] sm:$0x3] %v382_v7 }

// kernel: _lambda_.9
= control target key start
LH: loop header
LB: loop body
LE: loop exit
PB: predicated region body
PF: predicated region fallthrough
CT: control target
= control target key end

     0   :  { %8 = vsyncpa [#allocation3], 0  ;;  %s1015_s0 = inlined_call_operand.vmem [shape: f32[2,256,128], index: 0, kind: input, shape index: {}]   ;;  %s1016_s1 = inlined_call_operand.vmem [shape: f32[2,1,128], index: 1, kind: input, shape index: {}]   ;;  %s1017_s2 = inlined_call_operand.vmem [shape: f32[2,256,128], index: 2, kind: input, shape index: {}]   ;;  %s1018_s3 = inlined_call_operand.hbm [shape: f32[2,256,128], index: 3, kind: output, shape index: {}]  }
   0x1   :  { %10 = vsyncpa [#allocation3 + $0x1], 0  ;;  %s750_s12 = smov 0   ;;  %s752_s13 = smov 0  }
   0x2   :  { %s754_s14 = smov 0   ;;  %s756_s15 = smov 0  }
   0x3   :  { %s758_s16 = smov 0   ;;  %s760_s17 = smov 0  }
   0x4 LB: > { %s571_s18 = sadd.s32 4294967295, %s725_s17   ;;  %s572_s19 = sadd.s32 4294967294, %s725_s17   ;;  %s725_s17 = sphi %s760_s17, %s16_s17   ;;  %s721_s16 = sphi %s758_s16, %s1025_s16   ;;  %s717_s15 = sphi %s756_s15, %s1024_s15   ;;  %s713_s14 = sphi %s754_s14, %s1023_s14   ;;  %s709_s13 = sphi %s752_s13, %s1022_s13   ;;  %s705_s12 = sphi %s750_s12, %s1021_s12  }
   0x5   : > { %s28_s20 = sadd.s32 1, %s721_s16  ;;  %s119_s21 = sadd.s32 1, %s713_s14 }
   0x6   : > { %p30_p0 = scmp.ge.s32.totalorder %s28_s20, 2  ;;  %p129_p1 = scmp.ne.s32.totalorder %s713_s14, %s709_s13 }
   0x7   : > { %p130_p2 = scmp.eq.s32.totalorder %s571_s18, 1  ;;  %p135_p3 = scmp.ne.s32.totalorder %s709_s13, %s705_s12 }
   0x8   : > { %s1027_s20 = smov (%p30_p0, %s28_s20), 0  ;;  %p136_p5 = scmp.eq.s32.totalorder %s572_s19, 1 }
   0x9   : > { %p790_p4 = por %p130_p2, %p129_p1  ;;  %s114_s23 = ssub.s32 %s721_s16, %s1027_s20 }
   0xa   : > { %p575_p6 = scmp.ge.s32.totalorder %s725_s17, 1  ;;  %p117_p7 = scmp.eq.s32.totalorder %s114_s23, 0 }
   0xb   : > { %p797_p8 = por %p136_p5, %p135_p3  ;;  %p186_p9 = scmp.lt.s32.totalorder %s725_s17, 3 }
   0xc   : > { %s803_s25 = scalar_select %p117_p7, %s713_s14, %s119_s21  }
   0xd   : > { %p187_p10 = pnand %p575_p6, %p186_p9 }
   0xe   : > { %p227_p11 = scmp.lt.s32.totalorder (!%p187_p10), %s717_s15, 1  ;;  %s223_s27 = sand.u32 (!%p187_p10), 1, %s709_s13  }
   0xf   : > { %190 = sbr.rel (%p187_p10) target bundleno = 71 (0x47), region = 32  ;;  %s828_s11 = sshll.u32 (!%p187_p10), %s223_s27, 8 }
  0x10   : > { %s857_s18 = scalar_lea.vmem (!%p187_p10), [#allocation2], %s828_s11  ;;  %s589_s19 = sshll.u32 (!%p187_p10), %s717_s15, 12 }
  0x11   : > { %s465_s21 = sshll.u32 (!%p187_p10), %s857_s18, 4  ;;  %s727_s30 = smov (!%p187_p10), [#allocation2]   ;;  %s962_s21 = int_to_ptr.vmem [resolvable:$true] %s465_s21 }
  0x12   : > { %s647_s29 = scalar_lea.vmem (!%p187_p10), %s962_s21, 4096 }
  0x13   : > { %p648_p12 = scmp.ne.s32.totalorder (!%p187_p10), %s962_s21, %s647_s29 }
  0x15   : > { %p649_p13 = pnand (!%p187_p10), %p648_p12, %p790_p4 }
  0x16   : > { %s228_s26 = scalar_select %p227_p11, %s717_s15, 1 }
  0x17   : > { %s969_s15 = scalar_lea.sflag [#allocation3], %s223_s27  ;;  %p650_p0 = pneg %p649_p13 }
  0x18   : > { %s587_s28 = sshll.u32 %s228_s26, 8  ;;  %s238_s4 = scalar_lea.vmem %s1016_s1, %s228_s26 }
  0x19   : > { %s814_s7 = scalar_lea.vmem %s1015_s0, %s587_s28  ;;  %s819_s10 = scalar_lea.vmem %s1017_s2, %s587_s28  ;;  %v821_v0 = vld [vmem:[%s238_s4] ss:$0 sm:$0xff] }
  0x1a   : > { %v250_v1 = vld [vmem:[%s814_s7] sm:$0xff]  ;;  %v251_v3 = vld [vmem:[%s814_s7 + $0x8] sm:$0xff]  ;;  %v252_v7 = vld [vmem:[%s814_s7 + $0x10] sm:$0xff]  ;;  %s960_s28 = scalar_lea.hbm %s1018_s3, %s589_s19  ;;  %s651_s4 = sshll.u32 %s727_s30, 4  ;;  %s652_s4 = int_to_ptr.vmem [resolvable:$false] %s651_s4 }
  0x1b   : > { %v321_v2 = vld [vmem:[%s819_s10] sm:$0xff]  ;;  %v289_v4 = vmul.f32 %v821_v0, %v250_v1  ;;  %v290_v5 = vmul.f32 %v821_v0, %v251_v3  ;;  %v322_v6 = vld [vmem:[%s819_s10 + $0x8] sm:$0xff]  ;;  %v323_v8 = vld [vmem:[%s819_s10 + $0x10] sm:$0xff]  ;;  %v291_v9 = vmul.f32 %v821_v0, %v252_v7  ;;  %s653_s5 = scalar_lea.vmem %s652_s4, 8192  ;;  %p654_p1 = scmp.lt.s32.totalorder %s962_s21, %s652_s4 }
  0x1c   : > { %v253_v10 = vld [vmem:[%s814_s7 + $0x18] sm:$0xff]  ;;  %v254_v12 = vld [vmem:[%s814_s7 + $0x20] sm:$0xff]  ;;  %v255_v18 = vld [vmem:[%s814_s7 + $0x28] sm:$0xff]  ;;  %p655_p2 = scmp.lt.s32.totalorder %s653_s5, %s647_s29 }
  0x1d   : > { %v324_v11 = vld [vmem:[%s819_s10 + $0x18] sm:$0xff]  ;;  %v353_v13 = vadd.f32 %v321_v2, %v289_v4  ;;  %v354_v14 = vadd.f32 %v322_v6, %v290_v5  ;;  %v292_v15 = vmul.f32 %v821_v0, %v253_v10  ;;  %v293_v16 = vmul.f32 %v821_v0, %v254_v12  ;;  %v325_v17 = vld [vmem:[%s819_s10 + $0x20] sm:$0xff]  ;;  %v326_v19 = vld [vmem:[%s819_s10 + $0x28] sm:$0xff] }
  0x1e   : > { %v355_v20 = vadd.f32 %v323_v8, %v291_v9  ;;  %v294_v21 = vmul.f32 %v821_v0, %v255_v18  ;;  %v256_v22 = vld [vmem:[%s814_s7 + $0x30] sm:$0xff]  ;;  %v257_v24 = vld [vmem:[%s814_s7 + $0x38] sm:$0xff]  ;;  %v258_v30 = vld [vmem:[%s814_s7 + $0x40] sm:$0xff]  ;;  %p656_p3 = por %p655_p2, %p654_p1 }
  0x1f   : > { %v327_v23 = vld [vmem:[%s819_s10 + $0x30] sm:$0xff]  ;;  %v385_v25 = vmax.f32 %v353_v13, 0.0  ;;  %v386_v26 = vmax.f32 %v354_v14, 0.0  ;;  %v356_v27 = vadd.f32 %v324_v11, %v292_v15  ;;  %v357_v28 = vadd.f32 %v325_v17, %v293_v16  ;;  %v328_v29 = vld [vmem:[%s819_s10 + $0x38] sm:$0xff]  ;;  %v329_v31 = vld [vmem:[%s819_s10 + $0x40] sm:$0xff] }
  0x20   : > { %v387_v32 = vmax.f32 %v355_v20, 0.0  ;;  %v358_v33 = vadd.f32 %v326_v19, %v294_v21  ;;  %v295_v34 = vmul.f32 %v821_v0, %v256_v22  ;;  %v296_v35 = vmul.f32 %v821_v0, %v257_v24  ;;  %v259_v36 = vld [vmem:[%s814_s7 + $0x48] sm:$0xff]  ;;  %v260_v38 = vld [vmem:[%s814_s7 + $0x50] sm:$0xff]  ;;  %v261_v44 = vld [vmem:[%s814_s7 + $0x58] sm:$0xff]  ;;  %p657_p5 = pnand %p656_p3, %p650_p0 }
  0x21   : > { %v330_v37 = vld [vmem:[%s819_s10 + $0x48] sm:$0xff]  ;;  %417 = vst [vmem:[%s857_s18] sm:$0xff] %v385_v25  ;;  %418 = vst [vmem:[%s857_s18 + $0x8] sm:$0xff] %v386_v26  ;;  %v388_v39 = vmax.f32 %v356_v27, 0.0  ;;  %v389_v40 = vmax.f32 %v357_v28, 0.0  ;;  %v297_v41 = vmul.f32 %v821_v0, %v258_v30  ;;  %v298_v42 = vmul.f32 %v821_v0, %v259_v36  ;;  %v331_v43 = vld [vmem:[%s819_s10 + $0x50] sm:$0xff] }
  0x22   : > { %v332_v45 = vld [vmem:[%s819_s10 + $0x58] sm:$0xff]  ;;  %419 = vst [vmem:[%s857_s18 + $0x10] sm:$0xff] %v387_v32  ;;  %v390_v46 = vmax.f32 %v358_v33, 0.0  ;;  %v359_v47 = vadd.f32 %v327_v23, %v295_v34  ;;  %v360_v48 = vadd.f32 %v328_v29, %v296_v35  ;;  %v299_v49 = vmul.f32 %v821_v0, %v260_v38  ;;  %v262_v50 = vld [vmem:[%s814_s7 + $0x60] sm:$0xff]  ;;  %v263_v52 = vld [vmem:[%s814_s7 + $0x68] sm:$0xff] }
  0x23   : > { %v333_v51 = vld [vmem:[%s819_s10 + $0x60] sm:$0xff]  ;;  %420 = vst [vmem:[%s857_s18 + $0x18] sm:$0xff] %v388_v39  ;;  %421 = vst [vmem:[%s857_s18 + $0x20] sm:$0xff] %v389_v40  ;;  %v361_v53 = vadd.f32 %v329_v31, %v297_v41  ;;  %v362_v54 = vadd.f32 %v330_v37, %v298_v42  ;;  %v300_v55 = vmul.f32 %v821_v0, %v261_v44  ;;  %v334_v57 = vld [vmem:[%s819_s10 + $0x68] sm:$0xff] }
  0x24   : > { %v301_v56 = vmul.f32 %v821_v0, %v262_v50  ;;  %v264_v58 = vld [vmem:[%s814_s7 + $0x70] sm:$0xff]  ;;  %422 = vst [vmem:[%s857_s18 + $0x28] sm:$0xff] %v390_v46  ;;  %v391_v59 = vmax.f32 %v359_v47, 0.0  ;;  %v392_v60 = vmax.f32 %v360_v48, 0.0  ;;  %v363_v61 = vadd.f32 %v331_v43, %v299_v49  ;;  %v265_v1 = vld [vmem:[%s814_s7 + $0x78] sm:$0xff]  ;;  %v266_v2 = vld [vmem:[%s814_s7 + $0x80] sm:$0xff] }
  0x25   : > { %v302_v62 = vmul.f32 %v821_v0, %v263_v52  ;;  %v335_v63 = vld [vmem:[%s819_s10 + $0x70] sm:$0xff]  ;;  %v393_v3 = vmax.f32 %v361_v53, 0.0  ;;  %v394_v4 = vmax.f32 %v362_v54, 0.0  ;;  %v364_v5 = vadd.f32 %v332_v45, %v300_v55  ;;  %v336_v7 = vld [vmem:[%s819_s10 + $0x78] sm:$0xff]  ;;  %v337_v8 = vld [vmem:[%s819_s10 + $0x80] sm:$0xff] }
  0x26   : > { %v365_v6 = vadd.f32 %v333_v51, %v301_v56  ;;  %v267_v9 = vld [vmem:[%s814_s7 + $0x88] sm:$0xff]  ;;  %423 = vst [vmem:[%s857_s18 + $0x30] sm:$0xff] %v391_v59  ;;  %424 = vst [vmem:[%s857_s18 + $0x38] sm:$0xff] %v392_v60  ;;  %v395_v10 = vmax.f32 %v363_v61, 0.0  ;;  %v303_v12 = vmul.f32 %v821_v0, %v264_v58  ;;  %v304_v13 = vmul.f32 %v821_v0, %v265_v1  ;;  %v268_v15 = vld [vmem:[%s814_s7 + $0x90] sm:$0xff] }
  0x27   : > { %v366_v11 = vadd.f32 %v334_v57, %v302_v62  ;;  %v338_v14 = vld [vmem:[%s819_s10 + $0x88] sm:$0xff]  ;;  %v269_v16 = vld [vmem:[%s814_s7 + $0x98] sm:$0xff]  ;;  %425 = vst [vmem:[%s857_s18 + $0x40] sm:$0xff] %v393_v3  ;;  %426 = vst [vmem:[%s857_s18 + $0x48] sm:$0xff] %v394_v4  ;;  %v396_v17 = vmax.f32 %v364_v5, 0.0  ;;  %v305_v19 = vmul.f32 %v821_v0, %v266_v2  ;;  %v306_v20 = vmul.f32 %v821_v0, %v267_v9 }
  0x28   : > { %v397_v18 = vmax.f32 %v365_v6, 0.0  ;;  %v339_v21 = vld [vmem:[%s819_s10 + $0x90] sm:$0xff]  ;;  %v270_v22 = vld [vmem:[%s814_s7 + $0xa0] sm:$0xff]  ;;  %427 = vst [vmem:[%s857_s18 + $0x50] sm:$0xff] %v395_v10  ;;  %v367_v24 = vadd.f32 %v335_v63, %v303_v12  ;;  %v368_v25 = vadd.f32 %v336_v7, %v304_v13  ;;  %v307_v26 = vmul.f32 %v821_v0, %v268_v15  ;;  %v340_v27 = vld [vmem:[%s819_s10 + $0x98] sm:$0xff] }
  0x29   : > { %v398_v23 = vmax.f32 %v366_v11, 0.0  ;;  %v341_v28 = vld [vmem:[%s819_s10 + $0xa0] sm:$0xff]  ;;  %v271_v29 = vld [vmem:[%s814_s7 + $0xa8] sm:$0xff]  ;;  %428 = vst [vmem:[%s857_s18 + $0x58] sm:$0xff] %v396_v17  ;;  %v369_v30 = vadd.f32 %v337_v8, %v305_v19  ;;  %v370_v31 = vadd.f32 %v338_v14, %v306_v20  ;;  %v308_v32 = vmul.f32 %v821_v0, %v269_v16  ;;  %v272_v35 = vld [vmem:[%s814_s7 + $0xb0] sm:$0xff] }
  0x2a   : > { %429 = vst [vmem:[%s857_s18 + $0x60] sm:$0xff] %v397_v18  ;;  %v309_v33 = vmul.f32 %v821_v0, %v270_v22  ;;  %v342_v34 = vld [vmem:[%s819_s10 + $0xa8] sm:$0xff]  ;;  %v273_v36 = vld [vmem:[%s814_s7 + $0xb8] sm:$0xff]  ;;  %v399_v37 = vmax.f32 %v367_v24, 0.0  ;;  %v400_v38 = vmax.f32 %v368_v25, 0.0  ;;  %v371_v39 = vadd.f32 %v339_v21, %v307_v26  ;;  %v343_v41 = vld [vmem:[%s819_s10 + $0xb0] sm:$0xff] }
  0x2b   : > { %430 = vst [vmem:[%s857_s18 + $0x68] sm:$0xff] %v398_v23  ;;  %v310_v40 = vmul.f32 %v821_v0, %v271_v29  ;;  %v274_v42 = vld [vmem:[%s814_s7 + $0xc0] sm:$0xff]  ;;  %v275_v43 = vld [vmem:[%s814_s7 + $0xc8] sm:$0xff]  ;;  %v401_v44 = vmax.f32 %v369_v30, 0.0  ;;  %v402_v45 = vmax.f32 %v370_v31, 0.0  ;;  %v372_v46 = vadd.f32 %v340_v27, %v308_v32  ;;  %v344_v48 = vld [vmem:[%s819_s10 + $0xb8] sm:$0xff] }
  0x2c   : > { %v373_v47 = vadd.f32 %v341_v28, %v309_v33  ;;  %v345_v49 = vld [vmem:[%s819_s10 + $0xc0] sm:$0xff]  ;;  %v276_v50 = vld [vmem:[%s814_s7 + $0xd0] sm:$0xff]  ;;  %431 = vst [vmem:[%s857_s18 + $0x70] sm:$0xff] %v399_v37  ;;  %432 = vst [vmem:[%s857_s18 + $0x78] sm:$0xff] %v400_v38  ;;  %v403_v51 = vmax.f32 %v371_v39, 0.0  ;;  %v311_v53 = vmul.f32 %v821_v0, %v272_v35  ;;  %v312_v54 = vmul.f32 %v821_v0, %v273_v36 }
  0x2d   : > { %v374_v52 = vadd.f32 %v342_v34, %v310_v40  ;;  %v346_v55 = vld [vmem:[%s819_s10 + $0xc8] sm:$0xff]  ;;  %v277_v56 = vld [vmem:[%s814_s7 + $0xd8] sm:$0xff]  ;;  %v278_v57 = vld [vmem:[%s814_s7 + $0xe0] sm:$0xff]  ;;  %433 = vst [vmem:[%s857_s18 + $0x80] sm:$0xff] %v401_v44  ;;  %v404_v58 = vmax.f32 %v372_v46, 0.0  ;;  %v313_v60 = vmul.f32 %v821_v0, %v274_v42  ;;  %v314_v61 = vmul.f32 %v821_v0, %v275_v43 }
  0x2e   : > { %434 = vst [vmem:[%s857_s18 + $0x88] sm:$0xff] %v402_v45  ;;  %v405_v59 = vmax.f32 %v373_v47, 0.0  ;;  %v347_v62 = vld [vmem:[%s819_s10 + $0xd0] sm:$0xff]  ;;  %v279_v63 = vld [vmem:[%s814_s7 + $0xe8] sm:$0xff]  ;;  %435 = vst [vmem:[%s857_s18 + $0x90] sm:$0xff] %v403_v51  ;;  %v375_v2 = vadd.f32 %v343_v41, %v311_v53  ;;  %v376_v3 = vadd.f32 %v344_v48, %v312_v54  ;;  %v315_v4 = vmul.f32 %v821_v0, %v276_v50 }
  0x2f   : > { %v406_v1 = vmax.f32 %v374_v52, 0.0  ;;  %v348_v5 = vld [vmem:[%s819_s10 + $0xd8] sm:$0xff]  ;;  %v349_v6 = vld [vmem:[%s819_s10 + $0xe0] sm:$0xff]  ;;  %436 = vst [vmem:[%s857_s18 + $0x98] sm:$0xff] %v404_v58  ;;  %v377_v7 = vadd.f32 %v345_v49, %v313_v60  ;;  %v378_v8 = vadd.f32 %v346_v55, %v314_v61  ;;  %v316_v9 = vmul.f32 %v821_v0, %v277_v56  ;;  %v350_v11 = vld [vmem:[%s819_s10 + $0xe8] sm:$0xff] }
  0x30   : > { %437 = vst [vmem:[%s857_s18 + $0xa0] sm:$0xff] %v405_v59  ;;  %v317_v10 = vmul.f32 %v821_v0, %v278_v57  ;;  %v280_v12 = vld [vmem:[%s814_s7 + $0xf0] sm:$0xff]  ;;  %v281_v13 = vld [vmem:[%s814_s7 + $0xf8] sm:$0xff]  ;;  %v407_v14 = vmax.f32 %v375_v2, 0.0  ;;  %v408_v15 = vmax.f32 %v376_v3, 0.0  ;;  %v379_v16 = vadd.f32 %v347_v62, %v315_v4 }
  0x31   : > { %438 = vst [vmem:[%s857_s18 + $0xa8] sm:$0xff] %v406_v1  ;;  %v318_v17 = vmul.f32 %v821_v0, %v279_v63  ;;  %v409_v18 = vmax.f32 %v377_v7, 0.0  ;;  %v410_v19 = vmax.f32 %v378_v8, 0.0  ;;  %v380_v20 = vadd.f32 %v348_v5, %v316_v9  ;;  %v351_v22 = vld [vmem:[%s819_s10 + $0xf0] sm:$0xff]  ;;  %v352_v23 = vld [vmem:[%s819_s10 + $0xf8] sm:$0xff] }
  0x32   : > { %v381_v21 = vadd.f32 %v349_v6, %v317_v10  ;;  %439 = vst [vmem:[%s857_s18 + $0xb0] sm:$0xff] %v407_v14  ;;  %440 = vst [vmem:[%s857_s18 + $0xb8] sm:$0xff] %v408_v15  ;;  %v411_v24 = vmax.f32 %v379_v16, 0.0  ;;  %v319_v26 = vmul.f32 %v821_v0, %v280_v12  ;;  %v320_v27 = vmul.f32 %v821_v0, %v281_v13 }
  0x33   : > { %v382_v25 = vadd.f32 %v350_v11, %v318_v17  ;;  %441 = vst [vmem:[%s857_s18 + $0xc0] sm:$0xff] %v409_v18  ;;  %442 = vst [vmem:[%s857_s18 + $0xc8] sm:$0xff] %v410_v19  ;;  %v412_v28 = vmax.f32 %v380_v20, 0.0 }
  0x34   : > { %v413_v29 = vmax.f32 %v381_v21, 0.0  ;;  %443 = vst [vmem:[%s857_s18 + $0xd0] sm:$0xff] %v411_v24  ;;  %v383_v31 = vadd.f32 %v351_v22, %v319_v26  ;;  %v384_v32 = vadd.f32 %v352_v23, %v320_v27 }
  0x35   : > { %v414_v30 = vmax.f32 %v382_v25, 0.0  ;;  %444 = vst [vmem:[%s857_s18 + $0xd8] sm:$0xff] %v412_v28 }
  0x36   : > { %445 = vst [vmem:[%s857_s18 + $0xe0] sm:$0xff] %v413_v29  ;;  %v415_v0 = vmax.f32 %v383_v31, 0.0  ;;  %v416_v33 = vmax.f32 %v384_v32, 0.0 }
  0x37   : > { %446 = vst [vmem:[%s857_s18 + $0xe8] sm:$0xff] %v414_v30 }
  0x38   : > { %447 = vst [vmem:[%s857_s18 + $0xf0] sm:$0xff] %v415_v0  ;;  %448 = vst [vmem:[%s857_s18 + $0xf8] sm:$0xff] %v416_v33 }
  0x39   : > { %660 = shalt.err (!%p657_p5)
}
  0x3a   : > { %s661_s27 = scalar_lea.hbm %s960_s28, 4096  ;;  %s665_s8 = scalar_lea.hbm %s1018_s3, 8192 }
  0x3b   : > { %p662_p6 = scmp.ne.s32.totalorder %s960_s28, %s661_s27  ;;  %p666_p10 = scmp.lt.u32.totalorder %s960_s28, %s1018_s3 }
  0x3c   : > { %p667_p11 = scmp.lt.u32.totalorder %s665_s8, %s661_s27  ;;  %p669_p13 = scmp.lt.u32.totalorder %s661_s27, %s960_s28 }
  0x3d   : > { %p663_p7 = pnand %p662_p6, %p790_p4 }
  0x3e   : > { %p668_p12 = por %p667_p11, %p666_p10 }
  0x3f   : > { %p664_p9 = pneg %p663_p7 }
  0x40   : > { %p670_p0 = por %p669_p13, %p668_p12 }
  0x42   : > { %p671_p1 = pnand %p670_p0, %p664_p9 }
  0x44   : > { %674 = shalt.err (!%p671_p1)
}
  0x45   : > { %s728_s11 = smov 128   ;;  %s729_s18 = smov 8  }
  0x46   : > { %590 = dma.vmem_to_hbm [thread:$0]  (%p790_p4), %s962_s21, 4096, %s960_s28, %s969_s15, %s728_s11, %s728_s11, %s729_s18  }
  0x47 PF: > { %p596_p2 = scmp.ge.s32.totalorder %s725_s17, 2  ;;  %s480_s19 = sand.u32 1, %s705_s12  }
  0x48   : > { %s481_s23 = scalar_lea.sflag [#allocation3], %s480_s19 }
  0x49   : > { %p593_p3 = pnand %p596_p2, %p797_p8 }
  0x4b   : > { %700 = dma.done.wait (!%p593_p3), %s481_s23, 4096  }
  0x4c   : > { %702 = vsyncadd (!%p593_p3), %s481_s23, 4294963200  ;;  %s16_s17 = sadd.s32 1, %s725_s17   ;;  %s1021_s12 = smov %s709_s13 }
  0x4d   : > { %p13_p5 = scmp.ge.s32.totalorder %s16_s17, 4   ;;  %s1022_s13 = smov %s713_s14 }
  0x4e   : > { %s1023_s14 = smov %s803_s25  ;;  %s1024_s15 = smov %s721_s16 }
  0x4f   : > { %s1025_s16 = smov %s1027_s20  ;;  %15 = sbr.rel (!%p13_p5) target bundleno = 4 (0x4), region = 73 }
  0x56   :  { %486 = vsyncpa [#allocation3], 1 }
  0x57   :  { %488 = vsyncpa [#allocation3 + $0x1], 1 }

// kernel: _lambda_.6
= control target key start
LH: loop header
LB: loop body
LE: loop exit
PB: predicated region body
PF: predicated region fallthrough
CT: control target
= control target key end

     0   :  { %s4534_s15 = smov 0   ;;  %s5274_s0 = inlined_call_operand.vmem [shape: f32[2,18,18,128], index: 0, kind: input, shape index: {}]   ;;  %s5275_s1 = inlined_call_operand.vmem [shape: bf16[9,128,128], index: 1, kind: input, shape index: {}]   ;;  %s5276_s2 = inlined_call_operand.vmem [shape: f32[1,128], index: 2, kind: input, shape index: {}]   ;;  %s5277_s3 = inlined_call_operand.vmem [shape: f32[1,128], index: 3, kind: input, shape index: {}]   ;;  %s5278_s4 = inlined_call_operand.vmem [shape: f32[2,256,128], index: 4, kind: output, shape index: {}]  }
   0x1 LB: > { %s3087_s16 = sadd.s32 4294967295, %s4507_s15   ;;  %p3091_p0 = scmp.ge.s32.totalorder %s4507_s15, 1  ;;  %s4507_s15 = sphi %s4534_s15, %s14_s15  }
   0x2   : > { %p162_p1 = scmp.lt.s32.totalorder %s4507_s15, 3 }
   0x4   : > { %p163_p2 = pnand %p3091_p0, %p162_p1 }
   0x5   : > { %v4421_v0 = vld [vmem:[%s5275_s1 + $0x40] sm:$0xff] (!%p163_p2)   ;;  %p188_p3 = scmp.lt.s32.totalorder (!%p163_p2), %s3087_s16, 1  ;;  %v4423_v2 = vld [vmem:[%s5275_s1 + $0x48] sm:$0xff] (!%p163_p2)   ;;  %v4425_v4 = vld [vmem:[%s5275_s1 + $0x50] sm:$0xff] (!%p163_p2)  }
   0x6   : > { %166 = sbr.rel (%p163_p2) target bundleno = 543 (0x21f), region = 36  ;;  %v4422_v1 = vld [vmem:[%s5275_s1 + $0x100] sm:$0xff] (!%p163_p2)   ;;  %3708 = vmatprep.subr.bf16.mxu1 (!%p163_p2), %v4421_v0  ;;  %v4424_v3 = vld [vmem:[%s5275_s1 + $0x108] sm:$0xff] (!%p163_p2)   ;;  %v4426_v5 = vld [vmem:[%s5275_s1 + $0x110] sm:$0xff] (!%p163_p2)  }
   0x7   : > { %3900 = vmatprep.subr.bf16.mxu0 (!%p163_p2), %v4422_v1  ;;  %3709 = vmatpush3.bf16.msra.mxu1 (!%p163_p2), %v4421_v0  ;;  %v4427_v6 = vld [vmem:[%s5275_s1 + $0x58] sm:$0xff] (!%p163_p2)   ;;  %v4429_v8 = vld [vmem:[%s5275_s1 + $0x60] sm:$0xff] (!%p163_p2)   ;;  %v4431_v10 = vld [vmem:[%s5275_s1 + $0x68] sm:$0xff] (!%p163_p2)  }
   0x8   : > { %3901 = vmatpush3.bf16.msra.mxu0 (!%p163_p2), %v4422_v1  ;;  %3710 = vmatprep.subr.bf16.mxu1 (!%p163_p2), %v4423_v2  ;;  %v4428_v7 = vld [vmem:[%s5275_s1 + $0x118] sm:$0xff] (!%p163_p2)   ;;  %v4430_v9 = vld [vmem:[%s5275_s1 + $0x120] sm:$0xff] (!%p163_p2)   ;;  %v4432_v11 = vld [vmem:[%s5275_s1 + $0x128] sm:$0xff] (!%p163_p2)  }
   0x9   : > { %3902 = vmatprep.subr.bf16.mxu0 (!%p163_p2), %v4424_v3  ;;  %v4433_v18 = vld [vmem:[%s5275_s1 + $0x70] sm:$0xff] (!%p163_p2)   ;;  %v4435_v20 = vld [vmem:[%s5275_s1 + $0x78] sm:$0xff] (!%p163_p2)   ;;  %v4437_v22 = vld [vmem:[%s5275_s1] sm:$0xff] (!%p163_p2)  }
   0xa   : > { %v4434_v19 = vld [vmem:[%s5275_s1 + $0x130] sm:$0xff] (!%p163_p2)   ;;  %v4436_v21 = vld [vmem:[%s5275_s1 + $0x138] sm:$0xff] (!%p163_p2)   ;;  %v4438_v25 = vld [vmem:[%s5275_s1 + $0x140] sm:$0xff] (!%p163_p2)  }
   0xb   : > { %3711 = vmatpush3.bf16.msra.mxu1 (!%p163_p2), %v4423_v2  ;;  %v4439_v29 = vld [vmem:[%s5275_s1 + $0x148] sm:$0xff] (!%p163_p2)   ;;  %v4441_v34 = vld [vmem:[%s5275_s1 + $0x150] sm:$0xff] (!%p163_p2)   ;;  %v4442_v40 = vld [vmem:[%s5275_s1 + $0x158] sm:$0xff] (!%p163_p2)  }
   0xc   : > { %3903 = vmatpush3.bf16.msra.mxu0 (!%p163_p2), %v4424_v3  ;;  %3712 = vmatprep.subr.bf16.mxu1 (!%p163_p2), %v4425_v4  ;;  %v4440_v31 = vld [vmem:[%s5275_s1 + $0x8] sm:$0xff] (!%p163_p2)   ;;  %v4443_v36 = vld [vmem:[%s5275_s1 + $0x10] sm:$0xff] (!%p163_p2)   ;;  %v4446_v41 = vld [vmem:[%s5275_s1 + $0x18] sm:$0xff] (!%p163_p2)  }
   0xd   : > { %s5280_s16 = smov (!%p188_p3, %s3087_s16), 1  ;;  %3904 = vmatprep.subr.bf16.mxu0 %v4426_v5  ;;  %v4444_v44 = vld [vmem:[%s5275_s1 + $0x160] sm:$0xff]   ;;  %v4445_v50 = vld [vmem:[%s5275_s1 + $0x168] sm:$0xff]   ;;  %v4447_v54 = vld [vmem:[%s5275_s1 + $0x170] sm:$0xff]  }
   0xe   : > { %s4412_s7 = smul.u32 432, %s5280_s16  ;;  %v4449_v47 = vld [vmem:[%s5275_s1 + $0x20] sm:$0xff]   ;;  %v4451_v51 = vld [vmem:[%s5275_s1 + $0x28] sm:$0xff]   ;;  %v4453_v57 = vld [vmem:[%s5275_s1 + $0x30] sm:$0xff]   ;;  %s3491_s22 = sshll.u32 %s5280_s16, 8 }
   0xf   : > { %3713 = vmatpush3.bf16.msra.mxu1 %v4425_v4  ;;  %v4448_v60 = vld [vmem:[%s5275_s1 + $0x178] sm:$0xff]   ;;  %v4450_v4 = vld [vmem:[%s5275_s1 + $0x180] sm:$0xff]   ;;  %s5171_s25 = scalar_lea.vmem %s5278_s4, %s3491_s22 }
  0x10   : > { %3905 = vmatpush3.bf16.msra.mxu0 %v4426_v5  ;;  %3714 = vmatprep.subr.bf16.mxu1 %v4427_v6  ;;  %s4578_s14 = scalar_lea.vmem %s5274_s0, %s4412_s7  ;;  %v4455_v0 = vld [vmem:[%s5275_s1 + $0x38] sm:$0xff]  }
  0x11   : > { %3906 = vmatprep.subr.bf16.mxu0 %v4428_v7  ;;  %v263_v12 = vld [vmem:[%s4578_s14 + $0x1] sm:$0xff]  ;;  %v264_v13 = vld [vmem:[%s4578_s14 + $0x9] sm:$0xff]  ;;  %v3207_v14 = vld [vmem:[%s4578_s14 + $0x19] sm:$0xff] }
  0x12   : > { %v295_v15 = vpack.c.bf16 %v264_v13, %v263_v12  ;;  %v3208_v16 = vld [vmem:[%s4578_s14 + $0x21] sm:$0xff]  ;;  %v3209_v23 = vld [vmem:[%s4578_s14 + $0x31] sm:$0xff]  ;;  %v3210_v24 = vld [vmem:[%s4578_s14 + $0x39] sm:$0xff] }
  0x13   : > { %3715 = vmatpush3.bf16.msra.mxu1 %v4427_v6  ;;  %v1391_v17 = vpack.c.bf16 %v3208_v16, %v3207_v14  ;;  %v3211_v26 = vld [vmem:[%s4578_s14 + $0x49] sm:$0xff]  ;;  %v3212_v27 = vld [vmem:[%s4578_s14 + $0x51] sm:$0xff]  ;;  %v1392_v28 = vpack.c.bf16 %v3210_v24, %v3209_v23  ;;  %v3213_v32 = vld [vmem:[%s4578_s14 + $0x61] sm:$0xff] }
  0x14   : > { %3907 = vmatpush3.bf16.msra.mxu0 %v4428_v7  ;;  %3716 = vmatprep.subr.bf16.mxu1 %v4429_v8  ;;  %v1393_v30 = vpack.c.bf16 %v3212_v27, %v3211_v26  ;;  %v3214_v33 = vld [vmem:[%s4578_s14 + $0x69] sm:$0xff]  ;;  %v3215_v35 = vld [vmem:[%s4578_s14 + $0x79] sm:$0xff]  ;;  %v3216_v37 = vld [vmem:[%s4578_s14 + $0x81] sm:$0xff] }
  0x15   : > { %3908 = vmatprep.subr.bf16.mxu0 %v4430_v9  ;;  %3724 = vmatprep.mubr.bf16.mxu1 %v295_v15  ;;  %v1394_v38 = vpack.c.bf16 %v3214_v33, %v3213_v32  ;;  %v1395_v39 = vpack.c.bf16 %v3216_v37, %v3215_v35  ;;  %v3217_v42 = vld [vmem:[%s4578_s14 + $0x91] sm:$0xff]  ;;  %v3218_v43 = vld [vmem:[%s4578_s14 + $0x99] sm:$0xff]  ;;  %v3219_v45 = vld [vmem:[%s4578_s14 + $0xa9] sm:$0xff] }
  0x16   : > { %3916 = vmatprep.mubr.bf16.mxu0 %v1391_v17  ;;  %v3220_v46 = vld [vmem:[%s4578_s14 + $0xb1] sm:$0xff]  ;;  %v1396_v48 = vpack.c.bf16 %v3218_v43, %v3217_v42  ;;  %v3221_v52 = vld [vmem:[%s4578_s14 + $0xc1] sm:$0xff]  ;;  %v3222_v53 = vld [vmem:[%s4578_s14 + $0xc9] sm:$0xff] }
  0x17   : > { %3717 = vmatpush3.bf16.msra.mxu1 %v4429_v8  ;;  %v4644_v49 = vpack.c.bf16 %v3220_v46, %v3219_v45  ;;  %v3263_v55 = vld [vmem:[%s4578_s14 + $0x1a] sm:$0xff]  ;;  %v3264_v56 = vld [vmem:[%s4578_s14 + $0x22] sm:$0xff]  ;;  %v1398_v58 = vpack.c.bf16 %v3222_v53, %v3221_v52  ;;  %v3265_v63 = vld [vmem:[%s4578_s14 + $0x32] sm:$0xff] }
  0x18   : > { %3909 = vmatpush3.bf16.msra.mxu0 %v4430_v9  ;;  %3718 = vmatprep.subr.bf16.mxu1 %v4431_v10  ;;  %v4663_v59 = vpack.c.bf16 %v3264_v56, %v3263_v55  ;;  %v281_v61 = vld [vmem:[%s4578_s14 + $0xd9] sm:$0xff]  ;;  %v282_v62 = vld [vmem:[%s4578_s14 + $0xe1] sm:$0xff]  ;;  %v283_v2 = vld [vmem:[%s4578_s14 + $0xf1] sm:$0xff] }
  0x19   : > { %3910 = vmatprep.subr.bf16.mxu0 %v4432_v11  ;;  %v3266_v1 = vld [vmem:[%s4578_s14 + $0x3a] sm:$0xff]  ;;  %v3267_v5 = vld [vmem:[%s4578_s14 + $0x4a] sm:$0xff]  ;;  %v3268_v6 = vld [vmem:[%s4578_s14 + $0x52] sm:$0xff]  ;;  %v4684_v7 = vpack.c.bf16 %v282_v62, %v281_v61 }
  0x1a   : > { %v284_v3 = vld [vmem:[%s4578_s14 + $0xf9] sm:$0xff]  ;;  %v4691_v9 = vpack.c.bf16 %v3266_v1, %v3265_v63  ;;  %v4452_v12 = vld [vmem:[%s5275_s1 + $0x188] sm:$0xff]   ;;  %v286_v14 = vld [vmem:[%s4578_s14 + $0x111] sm:$0xff] }
  0x1b   : > { %3719 = vmatpush3.bf16.msra.mxu1 %v4431_v10  ;;  %v4689_v8 = vld [vmem:[%s5275_s1 + $0x80] sm:$0xff]   ;;  %v4693_v10 = vpack.c.bf16 %v284_v3, %v283_v2  ;;  %v285_v13 = vld [vmem:[%s4578_s14 + $0x109] sm:$0xff]  ;;  %v4456_v27 = vld [vmem:[%s5275_s1 + $0x198] sm:$0xff]  }
  0x1c   : > { %3911 = vmatpush3.bf16.msra.mxu0 %v4432_v11  ;;  %3720 = vmatprep.subr.bf16.mxu1 %v4433_v18  ;;  %v4695_v11 = vpack.c.bf16 %v3268_v6, %v3267_v5  ;;  %v3269_v15 = vld [vmem:[%s4578_s14 + $0x62] sm:$0xff]  ;;  %v3270_v16 = vld [vmem:[%s4578_s14 + $0x6a] sm:$0xff]  ;;  %v289_v26 = vld [vmem:[%s4578_s14 + $0x139] sm:$0xff] }
  0x1d   : > { %3912 = vmatprep.subr.bf16.mxu0 %v4434_v19  ;;  %v4718_v23 = vpack.c.bf16 %v3270_v16, %v3269_v15  ;;  %v292_v32 = vld [vmem:[%s4578_s14 + $0x159] sm:$0xff]  ;;  %v3275_v33 = vld [vmem:[%s4578_s14 + $0xaa] sm:$0xff]  ;;  %v3277_v43 = vld [vmem:[%s4578_s14 + $0xc2] sm:$0xff] }
  0x1e   : > { %v4458_v35 = vld [vmem:[%s5275_s1 + $0x1a0] sm:$0xff]   ;;  %v4460_v42 = vld [vmem:[%s5275_s1 + $0x1a8] sm:$0xff]   ;;  %v201_v55 = vld [vmem:[%s4578_s14 + $0x18] sm:$0xff] }
  0x1f   : > { %3721 = vmatpush3.bf16.msra.mxu1 %v4433_v18  ;;  %v288_v18 = vld [vmem:[%s4578_s14 + $0x129] sm:$0xff]  ;;  %v199_v45 = vld [vmem:[%s4578_s14] sm:$0xff]  ;;  %v204_v62 = vld [vmem:[%s4578_s14 + $0x38] sm:$0xff] }
  0x20   : > { %3913 = vmatpush3.bf16.msra.mxu0 %v4434_v19  ;;  %3722 = vmatprep.subr.bf16.mxu1 %v4435_v20  ;;  %v3271_v19 = vld [vmem:[%s4578_s14 + $0x7a] sm:$0xff]  ;;  %v200_v46 = vld [vmem:[%s4578_s14 + $0x8] sm:$0xff]  ;;  %v203_v61 = vld [vmem:[%s4578_s14 + $0x30] sm:$0xff] }
  0x21   : > { %3914 = vmatprep.subr.bf16.mxu0 %v4436_v21  ;;  %v231_v53 = vpack.c.bf16 %v200_v46, %v199_v45  ;;  %v202_v56 = vld [vmem:[%s4578_s14 + $0x20] sm:$0xff]  ;;  %v3283_v63 = vld [vmem:[%s4578_s14 + $0x10a] sm:$0xff] }
  0x22   : > { %v4791_v1 = vld [vmem:[%s5275_s1 + $0x1c0] sm:$0xff]   ;;  %v4793_v2 = vpack.c.bf16 %v202_v56, %v201_v55  ;;  %v205_v6 = vld [vmem:[%s4578_s14 + $0x48] sm:$0xff] }
  0x23   : > { %3723 = vmatpush3.bf16.msra.mxu1 %v4435_v20  ;;  %v3272_v20 = vld [vmem:[%s4578_s14 + $0x82] sm:$0xff]  ;;  %v3286_v15 = vld [vmem:[%s4578_s14 + $0x12a] sm:$0xff] }
  0x24   : > { %3915 = vmatpush3.bf16.msra.mxu0 %v4436_v21  ;;  %3756 = vmatprep.subr.bf16.mxu1 %v4437_v22  ;;  %v4454_v21 = vld [vmem:[%s5275_s1 + $0x190] sm:$0xff]   ;;  %v207_v16 = vld [vmem:[%s4578_s14 + $0x60] sm:$0xff]  ;;  %v4467_v46 = vld [vmem:[%s5275_s1 + $0xa8] sm:$0xff]  }
  0x25   : > { %3948 = vmatprep.subr.bf16.mxu0 %v4438_v25  ;;  %v215_v55 = vld [vmem:[%s4578_s14 + $0xc0] sm:$0xff]  ;;  %v216_v56 = vld [vmem:[%s4578_s14 + $0xc8] sm:$0xff] }
  0x26   : > { %3725 = vmatmul.mubr.bf16.vlgmr.msra.gmra.mrb[0].mxu1 %v1391_v17  ;;  %v287_v17 = vld [vmem:[%s4578_s14 + $0x121] sm:$0xff] }
  0x27   : > { %3917 = vmatmul.mubr.bf16.vlgmr.msra.gmra.mrb[0].mxu0 %v1392_v28  ;;  %3757 = vmatpush3.bf16.msra.mxu1 %v4437_v22  ;;  %v4716_v22 = vpack.c.bf16 %v286_v14, %v285_v13  ;;  %v4720_v24 = vpack.c.bf16 %v288_v18, %v287_v17  ;;  %v4459_v13 = vld [vmem:[%s5275_s1 + $0x88] sm:$0xff]   ;;  %v3287_v18 = vld [vmem:[%s4578_s14 + $0x13a] sm:$0xff] }
  0x28   : > { %3949 = vmatpush3.bf16.msra.mxu0 %v4438_v25  ;;  %3728 = vmatprep.mubr.bf16.mxu1 %v1392_v28  ;;  %v4722_v25 = vpack.c.bf16 %v3272_v20, %v3271_v19  ;;  %v290_v28 = vld [vmem:[%s4578_s14 + $0x141] sm:$0xff]  ;;  %v4461_v19 = vld [vmem:[%s5275_s1 + $0x90] sm:$0xff]  }
  0x29   : > { %3950 = vmatprep.subr.bf16.mxu0 %v4439_v29  ;;  %3920 = vmatprep.mubr.bf16.mxu0 %v1393_v30  ;;  %v3285_v14 = vld [vmem:[%s4578_s14 + $0x122] sm:$0xff] }
  0x2a   : > { %3758 = vmatprep.subr.bf16.mxu1 %v4440_v31  ;;  %v208_v17 = vld [vmem:[%s4578_s14 + $0x68] sm:$0xff] }
  0x2b   : > { %3759 = vmatpush3.bf16.msra.mxu1 %v4440_v31  ;;  %v291_v31 = vld [vmem:[%s4578_s14 + $0x151] sm:$0xff]  ;;  %v3288_v20 = vld [vmem:[%s4578_s14 + $0x142] sm:$0xff] }
  0x2c   : > { %3951 = vmatpush3.bf16.msra.mxu0 %v4439_v29  ;;  %3760 = vmatprep.subr.bf16.mxu1 %v4443_v36  ;;  %v3273_v29 = vld [vmem:[%s4578_s14 + $0x92] sm:$0xff] }
  0x2d   : > { %3952 = vmatprep.subr.bf16.mxu0 %v4441_v34 }
  0x2e   : > { %3729 = vmatmul.mubr.bf16.gmra.mrb[4].mxu1 %v1393_v30  ;;  %v3274_v30 = vld [vmem:[%s4578_s14 + $0x9a] sm:$0xff] }
  0x2f   : > { %3921 = vmatmul.mubr.bf16.gmra.mrb[4].mxu0 %v1394_v38  ;;  %3732 = vmatprep.mubr.bf16.mxu1 %v1394_v38  ;;  %v4744_v37 = vpack.c.bf16 %v3274_v30, %v3273_v29  ;;  %v4746_v38 = vpack.c.bf16 %v292_v32, %v291_v31  ;;  %v210_v29 = vld [vmem:[%s4578_s14 + $0x80] sm:$0xff]  ;;  %v4463_v30 = vld [vmem:[%s5275_s1 + $0x98] sm:$0xff]  }
  0x30   : > { %3953 = vmatpush3.bf16.msra.mxu0 %v4441_v34  ;;  %3924 = vmatprep.mubr.bf16.mxu0 %v1395_v39  ;;  %v3276_v34 = vld [vmem:[%s4578_s14 + $0xb2] sm:$0xff]  ;;  %v3290_v32 = vld [vmem:[%s4578_s14 + $0x15a] sm:$0xff] }
  0x31   : > { %3954 = vmatprep.subr.bf16.mxu0 %v4442_v40  ;;  %3761 = vmatpush3.bf16.msra.mxu1 %v4443_v36  ;;  %v4742_v36 = vpack.c.bf16 %v290_v28, %v289_v26  ;;  %v4825_v26 = vpack.c.bf16 %v208_v17, %v207_v16  ;;  %v209_v28 = vld [vmem:[%s4578_s14 + $0x78] sm:$0xff]  ;;  %v4468_v16 = vld [vmem:[%s5275_s1 + $0x1c8] sm:$0xff]  }
  0x32   : > { %3762 = vmatprep.subr.bf16.mxu1 %v4446_v41  ;;  %v3289_v31 = vld [vmem:[%s4578_s14 + $0x152] sm:$0xff]  ;;  %v221_v17 = vld [vmem:[%s4578_s14 + $0x108] sm:$0xff] }
  0x34   : > { %3955 = vmatpush3.bf16.msra.mxu0 %v4442_v40  ;;  %v293_v40 = vld [vmem:[%s4578_s14 + $0x169] sm:$0xff] }
  0x35   : > { %3956 = vmatprep.subr.bf16.mxu0 %v4444_v44  ;;  %3763 = vmatpush3.bf16.msra.mxu1 %v4446_v41  ;;  %v294_v41 = vld [vmem:[%s4578_s14 + $0x171] sm:$0xff] }
  0x36   : > { %3733 = vmatmul.mubr.bf16.gmra.mrb[8].mxu1 %v1395_v39  ;;  %3764 = vmatprep.subr.bf16.mxu1 %v4449_v47  ;;  %v4748_v39 = vpack.c.bf16 %v3276_v34, %v3275_v33  ;;  %v211_v33 = vld [vmem:[%s4578_s14 + $0x90] sm:$0xff]  ;;  %v212_v34 = vld [vmem:[%s4578_s14 + $0x98] sm:$0xff] }
  0x37   : > { %3925 = vmatmul.mubr.bf16.gmra.mrb[8].mxu0 %v1396_v48  ;;  %3736 = vmatprep.mubr.bf16.mxu1 %v1396_v48  ;;  %v3280_v48 = vld [vmem:[%s4578_s14 + $0xe2] sm:$0xff] }
  0x38   : > { %3957 = vmatpush3.bf16.msra.mxu0 %v4444_v44  ;;  %3928 = vmatprep.mubr.bf16.mxu0 %v4644_v49  ;;  %v3278_v44 = vld [vmem:[%s4578_s14 + $0xca] sm:$0xff] }
  0x39   : > { %3958 = vmatprep.subr.bf16.mxu0 %v4445_v50  ;;  %3765 = vmatpush3.bf16.msra.mxu1 %v4449_v47  ;;  %v3279_v47 = vld [vmem:[%s4578_s14 + $0xda] sm:$0xff]  ;;  %v4770_v52 = vpack.c.bf16 %v3278_v44, %v3277_v43  ;;  %v4849_v43 = vpack.c.bf16 %v3290_v32, %v3289_v31  ;;  %v4851_v44 = vpack.c.bf16 %v212_v34, %v211_v33  ;;  %v227_v33 = vld [vmem:[%s4578_s14 + $0x150] sm:$0xff] }
  0x3a   : > { %3766 = vmatprep.subr.bf16.mxu1 %v4451_v51  ;;  %v225_v31 = vld [vmem:[%s4578_s14 + $0x138] sm:$0xff]  ;;  %v226_v32 = vld [vmem:[%s4578_s14 + $0x140] sm:$0xff] }
  0x3b   : > { %v228_v34 = vld [vmem:[%s4578_s14 + $0x158] sm:$0xff] }
  0x3c   : > { %3959 = vmatpush3.bf16.msra.mxu0 %v4445_v50  ;;  %v4462_v50 = vld [vmem:[%s5275_s1 + $0x1b0] sm:$0xff]  }
  0x3d   : > { %3960 = vmatprep.subr.bf16.mxu0 %v4447_v54  ;;  %3767 = vmatpush3.bf16.msra.mxu1 %v4451_v51  ;;  %v4768_v51 = vpack.c.bf16 %v294_v41, %v293_v40  ;;  %v3292_v40 = vld [vmem:[%s4578_s14 + $0x172] sm:$0xff]  ;;  %v4465_v41 = vld [vmem:[%s5275_s1 + $0xa0] sm:$0xff]  }
  0x3e   : > { %3737 = vmatmul.mubr.bf16.gmra.mrb[12].mxu1 %v4644_v49  ;;  %3768 = vmatprep.subr.bf16.mxu1 %v4453_v57 }
  0x3f   : > { %3929 = vmatmul.mubr.bf16.gmra.mrb[12].mxu0 %v1398_v58  ;;  %3740 = vmatprep.mubr.bf16.mxu1 %v1398_v58  ;;  %v3281_v58 = vld [vmem:[%s4578_s14 + $0xf2] sm:$0xff] }
  0x40   : > { %3961 = vmatpush3.bf16.msra.mxu0 %v4447_v54  ;;  %3964 = vmatprep.mubr.bf16.mxu0 %v4663_v59  ;;  %v4772_v54 = vpack.c.bf16 %v3280_v48, %v3279_v47  ;;  %v213_v47 = vld [vmem:[%s4578_s14 + $0xa8] sm:$0xff]  ;;  %v214_v48 = vld [vmem:[%s4578_s14 + $0xb0] sm:$0xff] }
  0x41   : > { %3962 = vmatprep.subr.bf16.mxu0 %v4448_v60  ;;  %3769 = vmatpush3.bf16.msra.mxu1 %v4453_v57  ;;  %v4464_v57 = vld [vmem:[%s5275_s1 + $0x1b8] sm:$0xff]  }
  0x42   : > { %3770 = vmatprep.subr.bf16.mxu1 %v4455_v0 }
  0x44   : > { %3963 = vmatpush3.bf16.msra.mxu0 %v4448_v60  ;;  %v3282_v60 = vld [vmem:[%s4578_s14 + $0xfa] sm:$0xff] }
  0x45   : > { %3996 = vmatprep.subr.bf16.mxu0 %v4450_v4  ;;  %3771 = vmatpush3.bf16.msra.mxu1 %v4455_v0  ;;  %v3284_v0 = vld [vmem:[%s4578_s14 + $0x112] sm:$0xff]  ;;  %v4795_v3 = vpack.c.bf16 %v3282_v60, %v3281_v58  ;;  %v4871_v58 = vpack.c.bf16 %v214_v48, %v213_v47  ;;  %v229_v47 = vld [vmem:[%s4578_s14 + $0x168] sm:$0xff] }
  0x46   : > { %3741 = vmatmul.mubr.bf16.gmra.mrb[16].mxu1 %v4684_v7  ;;  %3804 = vmatprep.subr.bf16.mxu1 %v4689_v8  ;;  %v4799_v5 = vpack.c.bf16 %v3284_v0, %v3283_v63  ;;  %v217_v63 = vld [vmem:[%s4578_s14 + $0xd8] sm:$0xff]  ;;  %v218_v0 = vld [vmem:[%s4578_s14 + $0xe0] sm:$0xff]  ;;  %v230_v48 = vld [vmem:[%s4578_s14 + $0x170] sm:$0xff] }
  0x47   : > { %3965 = vmatmul.mubr.bf16.vlgmr.msra.gmra.mrb[0].mxu0 %v4691_v9  ;;  %3744 = vmatprep.mubr.bf16.mxu1 %v4693_v10 }
  0x48   : > { %3997 = vmatpush3.bf16.msra.mxu0 %v4450_v4  ;;  %3968 = vmatprep.mubr.bf16.mxu0 %v4695_v11  ;;  %v4797_v4 = vpack.c.bf16 %v204_v62, %v203_v61  ;;  %v4873_v61 = vpack.c.bf16 %v216_v56, %v215_v55  ;;  %v4471_v62 = vld [vmem:[%s5275_s1 + $0xb8] sm:$0xff]   ;;  %v4478_v55 = vld [vmem:[%s5275_s1 + $0x1f0] sm:$0xff]   ;;  %v4946_v56 = vpack.c.bf16 %v230_v48, %v229_v47 }
  0x49   : > { %3998 = vmatprep.subr.bf16.mxu0 %v4452_v12  ;;  %v3383_v47 = vld [vmem:[%s4578_s14 + $0x91] sm:$0xff]  ;;  %v3384_v48 = vld [vmem:[%s4578_s14 + $0x99] sm:$0xff] }
  0x4c   : > { %3999 = vmatpush3.bf16.msra.mxu0 %v4452_v12  ;;  %v206_v12 = vld [vmem:[%s4578_s14 + $0x50] sm:$0xff] }
  0x4d   : > { %4000 = vmatprep.subr.bf16.mxu0 %v4454_v21 }
  0x4e   : > { %3745 = vmatmul.mubr.bf16.gmra.mrb[20].mxu1 %v4716_v22 }
  0x4f   : > { %3969 = vmatmul.mubr.bf16.gmra.mrb[4].mxu0 %v4718_v23  ;;  %3748 = vmatprep.mubr.bf16.mxu1 %v4720_v24 }
  0x50   : > { %3972 = vmatprep.mubr.bf16.mxu0 %v4722_v25  ;;  %4001 = vmatpush3.bf16.msra.mxu0 %v4454_v21  ;;  %v4821_v21 = vpack.c.bf16 %v206_v12, %v205_v6  ;;  %v219_v6 = vld [vmem:[%s4578_s14 + $0xf0] sm:$0xff]  ;;  %v220_v12 = vld [vmem:[%s4578_s14 + $0xf8] sm:$0xff] }
  0x51   : > { %4002 = vmatprep.subr.bf16.mxu0 %v4456_v27 }
  0x54   : > { %4003 = vmatpush3.bf16.msra.mxu0 %v4456_v27  ;;  %v4827_v27 = vpack.c.bf16 %v3288_v20, %v3287_v18  ;;  %v222_v18 = vld [vmem:[%s4578_s14 + $0x110] sm:$0xff]  ;;  %v224_v20 = vld [vmem:[%s4578_s14 + $0x128] sm:$0xff] }
  0x55   : > { %4004 = vmatprep.subr.bf16.mxu0 %v4458_v35 }
  0x56   : > { %3749 = vmatmul.mubr.bf16.gmra.mrb[24].mxu1 %v4742_v36 }
  0x57   : > { %3973 = vmatmul.mubr.bf16.gmra.mrb[8].mxu0 %v4744_v37  ;;  %3752 = vmatprep.mubr.bf16.mxu1 %v4746_v38 }
  0x58   : > { %3976 = vmatprep.mubr.bf16.mxu0 %v4748_v39  ;;  %4005 = vmatpush3.bf16.msra.mxu0 %v4458_v35  ;;  %v3291_v35 = vld [vmem:[%s4578_s14 + $0x16a] sm:$0xff] }
  0x59   : > { %4006 = vmatprep.subr.bf16.mxu0 %v4460_v42  ;;  %v4853_v45 = vpack.c.bf16 %v3292_v40, %v3291_v35  ;;  %v4474_v35 = vld [vmem:[%s5275_s1 + $0x1e0] sm:$0xff]   ;;  %v4928_v40 = vpack.c.bf16 %v226_v32, %v225_v31  ;;  %v3380_v32 = vld [vmem:[%s4578_s14 + $0x69] sm:$0xff] }
  0x5a   : > { %v3379_v31 = vld [vmem:[%s4578_s14 + $0x61] sm:$0xff] }
  0x5c   : > { %4007 = vmatpush3.bf16.msra.mxu0 %v4460_v42  ;;  %v4847_v42 = vpack.c.bf16 %v210_v29, %v209_v28  ;;  %v4470_v28 = vld [vmem:[%s5275_s1 + $0x1d0] sm:$0xff]   ;;  %v4910_v29 = vpack.c.bf16 %v222_v18, %v221_v17  ;;  %v3376_v18 = vld [vmem:[%s4578_s14 + $0x39] sm:$0xff] }
  0x5d   : > { %4008 = vmatprep.subr.bf16.mxu0 %v4462_v50  ;;  %v3375_v17 = vld [vmem:[%s4578_s14 + $0x31] sm:$0xff] }
  0x5e   : > { %3753 = vmatmul.mubr.bf16.gmra.mrb[28].mxu1 %v4768_v51 }
  0x5f   : > { %3977 = vmatmul.mubr.bf16.gmra.mrb[12].mxu0 %v4770_v52  ;;  %3772 = vmatprep.mubr.bf16.mxu1 %v231_v53  ;;  %v3294_v53 = vld [vmem:[%s4578_s14 + $0x18a] sm:$0xff] }
  0x60   : > { %3980 = vmatprep.mubr.bf16.mxu0 %v4772_v54  ;;  %4009 = vmatpush3.bf16.msra.mxu0 %v4462_v50  ;;  %v3293_v50 = vld [vmem:[%s4578_s14 + $0x182] sm:$0xff] }
  0x61   : > { %4010 = vmatprep.subr.bf16.mxu0 %v4464_v57  ;;  %v1712_v60 = vpack.c.bf16 %v3294_v53, %v3293_v50  ;;  %v746_v50 = vld [vmem:[%s4578_s14 + $0x2] sm:$0xff]  ;;  %v747_v53 = vld [vmem:[%s4578_s14 + $0xa] sm:$0xff] }
  0x64   : > { %4011 = vmatpush3.bf16.msra.mxu0 %v4464_v57  ;;  %v4469_v57 = vld [vmem:[%s5275_s1 + $0xb0] sm:$0xff]  }
  0x65   : > { %4044 = vmatprep.subr.bf16.mxu0 %v4791_v1 }
  0x66   : > { %3773 = vmatmul.mubr.bf16.vlgmr.msra.gmra.mrb[0].mxu1 %v4793_v2 }
  0x67   : > { %3981 = vmatmul.mubr.bf16.gmra.mrb[16].mxu0 %v4795_v3  ;;  %3805 = vmatpush3.bf16.msra.mxu1 %v4689_v8  ;;  %v4823_v8 = vpack.c.bf16 %v3286_v15, %v3285_v14  ;;  %v4890_v14 = vpack.c.bf16 %v218_v0, %v217_v63  ;;  %v4892_v15 = vpack.c.bf16 %v220_v12, %v219_v6  ;;  %v4475_v63 = vld [vmem:[%s5275_s1 + $0xc8] sm:$0xff]   ;;  %v4477_v0 = vld [vmem:[%s5275_s1 + $0xd0] sm:$0xff]   ;;  %v4481_v12 = vld [vmem:[%s5275_s1 + $0xe0] sm:$0xff]  }
  0x68   : > { %3776 = vmatprep.mubr.bf16.mxu1 %v4797_v4  ;;  %3984 = vmatprep.mubr.bf16.mxu0 %v4799_v5  ;;  %v3348_v6 = vld [vmem:[%s4578_s14 + $0x188] sm:$0xff] }
  0x69   : > { %3806 = vmatprep.subr.bf16.mxu1 %v4459_v13 }
  0x6b   : > { %3807 = vmatpush3.bf16.msra.mxu1 %v4459_v13  ;;  %v4888_v13 = vld [vmem:[%s5275_s1 + $0xc0] sm:$0xff]  }
  0x6c   : > { %3808 = vmatprep.subr.bf16.mxu1 %v4461_v19 }
  0x6e   : > { %3777 = vmatmul.mubr.bf16.gmra.mrb[4].mxu1 %v4821_v21 }
  0x6f   : > { %3985 = vmatmul.mubr.bf16.gmra.mrb[20].mxu0 %v4823_v8  ;;  %3780 = vmatprep.mubr.bf16.mxu1 %v4825_v26 }
  0x70   : > { %3988 = vmatprep.mubr.bf16.mxu0 %v4827_v27  ;;  %3809 = vmatpush3.bf16.msra.mxu1 %v4461_v19  ;;  %v223_v19 = vld [vmem:[%s4578_s14 + $0x120] sm:$0xff] }
  0x71   : > { %3810 = vmatprep.subr.bf16.mxu1 %v4463_v30 }
  0x74   : > { %3811 = vmatpush3.bf16.msra.mxu1 %v4463_v30  ;;  %v4912_v30 = vpack.c.bf16 %v224_v20, %v223_v19  ;;  %v2310_v20 = vpack.c.bf16 %v3376_v18, %v3375_v17  ;;  %v3443_v17 = vld [vmem:[%s4578_s14 + $0xc2] sm:$0xff]  ;;  %v3444_v18 = vld [vmem:[%s4578_s14 + $0xca] sm:$0xff] }
  0x75   : > { %3812 = vmatprep.subr.bf16.mxu1 %v4465_v41 }
  0x76   : > { %3781 = vmatmul.mubr.bf16.gmra.mrb[8].mxu1 %v4847_v42 }
  0x77   : > { %3989 = vmatmul.mubr.bf16.gmra.mrb[24].mxu0 %v4849_v43  ;;  %3784 = vmatprep.mubr.bf16.mxu1 %v4851_v44 }
  0x78   : > { %3992 = vmatprep.mubr.bf16.mxu0 %v4853_v45  ;;  %3813 = vmatpush3.bf16.msra.mxu1 %v4465_v41  ;;  %v4930_v41 = vpack.c.bf16 %v228_v34, %v227_v33  ;;  %v2312_v34 = vpack.c.bf16 %v3380_v32, %v3379_v31 }
  0x79   : > { %3814 = vmatprep.subr.bf16.mxu1 %v4467_v46 }
  0x7c   : > { %3815 = vmatpush3.bf16.msra.mxu1 %v4467_v46  ;;  %v4476_v46 = vld [vmem:[%s5275_s1 + $0x1e8] sm:$0xff]  }
  0x7d   : > { %3816 = vmatprep.subr.bf16.mxu1 %v4469_v57 }
  0x7e   : > { %3785 = vmatmul.mubr.bf16.gmra.mrb[12].mxu1 %v4871_v58 }
  0x7f   : > { %3993 = vmatmul.mubr.bf16.gmra.mrb[28].mxu0 %v1712_v60  ;;  %3788 = vmatprep.mubr.bf16.mxu1 %v4873_v61  ;;  %v4480_v60 = vld [vmem:[%s5275_s1 + $0x1f8] sm:$0xff]  }
  0x80   : > { %4012 = vmatprep.mubr.bf16.mxu0 %v4797_v4  ;;  %3817 = vmatpush3.bf16.msra.mxu1 %v4469_v57  ;;  %v778_v57 = vpack.c.bf16 %v747_v53, %v746_v50  ;;  %v4486_v50 = vld [vmem:[%s5275_s1 + $0x210] sm:$0xff]  }
  0x81   : > { %3818 = vmatprep.subr.bf16.mxu1 %v4471_v62 }
  0x84   : > { %3819 = vmatpush3.bf16.msra.mxu1 %v4471_v62  ;;  %v4482_v62 = vld [vmem:[%s5275_s1 + $0x200] sm:$0xff]  }
  0x85   : > { %3852 = vmatprep.subr.bf16.mxu1 %v4888_v13 }
  0x86   : > { %3789 = vmatmul.mubr.bf16.gmra.mrb[16].mxu1 %v4890_v14 }
  0x87   : > { %4013 = vmatmul.mubr.bf16.vlgmr.msra.gmra.mrb[0].mxu0 %v4821_v21  ;;  %3792 = vmatprep.mubr.bf16.mxu1 %v4892_v15 }
  0x88   : > { %4045 = vmatpush3.bf16.msra.mxu0 %v4791_v1  ;;  %4016 = vmatprep.mubr.bf16.mxu0 %v4825_v26  ;;  %v4472_v1 = vld [vmem:[%s5275_s1 + $0x1d8] sm:$0xff]  }
  0x89   : > { %4046 = vmatprep.subr.bf16.mxu0 %v4468_v16 }
  0x8c   : > { %4047 = vmatpush3.bf16.msra.mxu0 %v4468_v16  ;;  %v3350_v16 = vld [vmem:[%s4578_s14 + $0x1a0] sm:$0xff] }
  0x8d   : > { %4048 = vmatprep.subr.bf16.mxu0 %v4470_v28 }
  0x8e   : > { %3793 = vmatmul.mubr.bf16.gmra.mrb[20].mxu1 %v4910_v29 }
  0x8f   : > { %4017 = vmatmul.mubr.bf16.gmra.mrb[4].mxu0 %v4847_v42  ;;  %3796 = vmatprep.mubr.bf16.mxu1 %v4912_v30 }
  0x90   : > { %4020 = vmatprep.mubr.bf16.mxu0 %v4851_v44  ;;  %4049 = vmatpush3.bf16.msra.mxu0 %v4470_v28  ;;  %v3377_v28 = vld [vmem:[%s4578_s14 + $0x49] sm:$0xff] }
  0x91   : > { %4050 = vmatprep.subr.bf16.mxu0 %v4472_v1 }
  0x94   : > { %4051 = vmatpush3.bf16.msra.mxu0 %v4472_v1  ;;  %v3378_v1 = vld [vmem:[%s4578_s14 + $0x51] sm:$0xff] }
  0x95   : > { %4052 = vmatprep.subr.bf16.mxu0 %v4474_v35  ;;  %v2311_v33 = vpack.c.bf16 %v3378_v1, %v3377_v28  ;;  %v3447_v28 = vld [vmem:[%s4578_s14 + $0xf2] sm:$0xff]  ;;  %v3448_v1 = vld [vmem:[%s4578_s14 + $0xfa] sm:$0xff] }
  0x96   : > { %3797 = vmatmul.mubr.bf16.gmra.mrb[24].mxu1 %v4928_v40  ;;  %v2624_v32 = vpack.c.bf16 %v3448_v1, %v3447_v28  ;;  %v5161_v28 = vld [vmem:[%s5277_s3] ss:$0 sm:$0xff] }
  0x97   : > { %4021 = vmatmul.mubr.bf16.gmra.mrb[8].mxu0 %v4871_v58  ;;  %3800 = vmatprep.mubr.bf16.mxu1 %v4930_v41 }
  0x98   : > { %4024 = vmatprep.mubr.bf16.mxu0 %v4873_v61  ;;  %4053 = vmatpush3.bf16.msra.mxu0 %v4474_v35  ;;  %v3381_v35 = vld [vmem:[%s4578_s14 + $0x79] sm:$0xff] }
  0x99   : > { %4054 = vmatprep.subr.bf16.mxu0 %v4476_v46 }
  0x9c   : > { %4055 = vmatpush3.bf16.msra.mxu0 %v4476_v46  ;;  %v3382_v46 = vld [vmem:[%s4578_s14 + $0x81] sm:$0xff] }
  0x9d   : > { %4056 = vmatprep.subr.bf16.mxu0 %v4478_v55  ;;  %v2313_v53 = vpack.c.bf16 %v3382_v46, %v3381_v35  ;;  %v3228_v35 = vld [vmem:[%s4578_s14 + $0x111] sm:$0xff]  ;;  %v3451_v46 = vld [vmem:[%s4578_s14 + $0x122] sm:$0xff] }
  0x9e   : > { %3801 = vmatmul.mubr.bf16.gmra.mrb[28].mxu1 %v4946_v56 }
  0x9f   : > { %4025 = vmatmul.mubr.bf16.gmra.mrb[12].mxu0 %v4890_v14  ;;  %3820 = vmatprep.mubr.bf16.mxu1 %v778_v57  ;;  %v3388_v57 = vld [vmem:[%s4578_s14 + $0xc9] sm:$0xff] }
  0xa0   : > { %4028 = vmatprep.mubr.bf16.mxu0 %v4892_v15  ;;  %4057 = vmatpush3.bf16.msra.mxu0 %v4478_v55  ;;  %v2314_v55 = vpack.c.bf16 %v3384_v48, %v3383_v47  ;;  %v3452_v47 = vld [vmem:[%s4578_s14 + $0x12a] sm:$0xff] }
  0xa1   : > { %4058 = vmatprep.subr.bf16.mxu0 %v4480_v60 }
  0xa4   : > { %4059 = vmatpush3.bf16.msra.mxu0 %v4480_v60  ;;  %v4489_v60 = vld [vmem:[%s5275_s1 + $0x220] sm:$0xff]  }
  0xa5   : > { %4092 = vmatprep.subr.bf16.mxu0 %v4482_v62 }
  0xa6   : > { %3821 = vmatmul.mubr.bf16.vlgmr.msra.gmra.mrb[0].mxu1 %v4663_v59  ;;  %v4479_v59 = vld [vmem:[%s5275_s1 + $0xd8] sm:$0xff]  }
  0xa7   : > { %4029 = vmatmul.mubr.bf16.gmra.mrb[16].mxu0 %v4910_v29  ;;  %3853 = vmatpush3.bf16.msra.mxu1 %v4888_v13 }
  0xa8   : > { %3824 = vmatprep.mubr.bf16.mxu1 %v4691_v9  ;;  %4032 = vmatprep.mubr.bf16.mxu0 %v4912_v30  ;;  %v3347_v9 = vld [vmem:[%s4578_s14 + $0x180] sm:$0xff] }
  0xa9   : > { %3854 = vmatprep.subr.bf16.mxu1 %v4475_v63  ;;  %v4980_v13 = vpack.c.bf16 %v3348_v6, %v3347_v9  ;;  %v3438_v6 = vld [vmem:[%s4578_s14 + $0x82] sm:$0xff] }
  0xab   : > { %3855 = vmatpush3.bf16.msra.mxu1 %v4475_v63  ;;  %v4490_v63 = vld [vmem:[%s5275_s1 + $0x228] sm:$0xff]  }
  0xac   : > { %3856 = vmatprep.subr.bf16.mxu1 %v4477_v0 }
  0xae   : > { %3825 = vmatmul.mubr.bf16.gmra.mrb[4].mxu1 %v4695_v11  ;;  %v4483_v11 = vld [vmem:[%s5275_s1 + $0xe8] sm:$0xff]  }
  0xaf   : > { %4033 = vmatmul.mubr.bf16.gmra.mrb[20].mxu0 %v4928_v40  ;;  %3828 = vmatprep.mubr.bf16.mxu1 %v4718_v23  ;;  %v3349_v23 = vld [vmem:[%s4578_s14 + $0x198] sm:$0xff] }
  0xb0   : > { %4036 = vmatprep.mubr.bf16.mxu0 %v4930_v41  ;;  %3857 = vmatpush3.bf16.msra.mxu1 %v4477_v0  ;;  %v2019_v19 = vpack.c.bf16 %v3350_v16, %v3349_v23  ;;  %v3436_v0 = vld [vmem:[%s4578_s14 + $0x6a] sm:$0xff] }
  0xb1   : > { %3858 = vmatprep.subr.bf16.mxu1 %v4479_v59 }
  0xb4   : > { %3859 = vmatpush3.bf16.msra.mxu1 %v4479_v59  ;;  %v4500_v59 = vld [vmem:[%s5275_s1 + $0x138] sm:$0xff]  }
  0xb5   : > { %3860 = vmatprep.subr.bf16.mxu1 %v4481_v12 }
  0xb6   : > { %3829 = vmatmul.mubr.bf16.gmra.mrb[8].mxu1 %v4722_v25  ;;  %v4485_v25 = vld [vmem:[%s5275_s1 + $0xf0] sm:$0xff]  }
  0xb7   : > { %4037 = vmatmul.mubr.bf16.gmra.mrb[24].mxu0 %v4946_v56  ;;  %3832 = vmatprep.mubr.bf16.mxu1 %v4744_v37  ;;  %v4487_v37 = vld [vmem:[%s5275_s1 + $0xf8] sm:$0xff]  }
  0xb8   : > { %4040 = vmatprep.mubr.bf16.mxu0 %v4980_v13  ;;  %3861 = vmatpush3.bf16.msra.mxu1 %v4481_v12  ;;  %v3439_v12 = vld [vmem:[%s4578_s14 + $0x92] sm:$0xff] }
  0xb9   : > { %3862 = vmatprep.subr.bf16.mxu1 %v4483_v11 }
  0xbc   : > { %3863 = vmatpush3.bf16.msra.mxu1 %v4483_v11  ;;  %v3440_v11 = vld [vmem:[%s4578_s14 + $0x9a] sm:$0xff] }
  0xbd   : > { %3864 = vmatprep.subr.bf16.mxu1 %v4485_v25  ;;  %v2620_v16 = vpack.c.bf16 %v3440_v11, %v3439_v12 }
  0xbe   : > { %3833 = vmatmul.mubr.bf16.gmra.mrb[12].mxu1 %v4748_v39  ;;  %v4484_v39 = vld [vmem:[%s5275_s1 + $0x208] sm:$0xff]  }
  0xbf   : > { %4041 = vmatmul.mubr.bf16.gmra.mrb[28].mxu0 %v2019_v19  ;;  %3836 = vmatprep.mubr.bf16.mxu1 %v4770_v52  ;;  %v4493_v52 = vld [vmem:[%s5275_s1 + $0x100] sm:$0xff]   ;;  %v2622_v19 = vpack.c.bf16 %v3444_v18, %v3443_v17 }
  0xc0   : > { %4060 = vmatprep.mubr.bf16.mxu0 %v2310_v20  ;;  %3865 = vmatpush3.bf16.msra.mxu1 %v4485_v25  ;;  %v3223_v20 = vld [vmem:[%s4578_s14 + $0xd9] sm:$0xff] }
  0xc1   : > { %3866 = vmatprep.subr.bf16.mxu1 %v4487_v37 }
  0xc4   : > { %3867 = vmatpush3.bf16.msra.mxu1 %v4487_v37  ;;  %v3224_v37 = vld [vmem:[%s4578_s14 + $0xe1] sm:$0xff] }
  0xc5   : > { %4140 = vmatprep.subr.bf16.mxu1 %v4493_v52 }
  0xc6   : > { %3837 = vmatmul.mubr.bf16.gmra.mrb[16].mxu1 %v4772_v54  ;;  %v4488_v54 = vld [vmem:[%s5275_s1 + $0x218] sm:$0xff]  }
  0xc7   : > { %4061 = vmatmul.mubr.bf16.vlgmr.msra.gmra.mrb[0].mxu0 %v2311_v33  ;;  %3840 = vmatprep.mubr.bf16.mxu1 %v4795_v3  ;;  %v3387_v3 = vld [vmem:[%s4578_s14 + $0xc1] sm:$0xff]  ;;  %v3226_v33 = vld [vmem:[%s4578_s14 + $0xf9] sm:$0xff] }
  0xc8   : > { %4093 = vmatpush3.bf16.msra.mxu0 %v4482_v62  ;;  %4064 = vmatprep.mubr.bf16.mxu0 %v2312_v34  ;;  %v2316_v62 = vpack.c.bf16 %v3388_v57, %v3387_v3  ;;  %v3449_v34 = vld [vmem:[%s4578_s14 + $0x10a] sm:$0xff]  ;;  %v3453_v3 = vld [vmem:[%s4578_s14 + $0x13a] sm:$0xff]  ;;  %v3454_v57 = vld [vmem:[%s4578_s14 + $0x142] sm:$0xff] }
  0xc9   : > { %4094 = vmatprep.subr.bf16.mxu0 %v4484_v39 }
  0xcc   : > { %4095 = vmatpush3.bf16.msra.mxu0 %v4484_v39  ;;  %v3450_v39 = vld [vmem:[%s4578_s14 + $0x112] sm:$0xff] }
  0xcd   : > { %4096 = vmatprep.subr.bf16.mxu0 %v4486_v50  ;;  %v2625_v48 = vpack.c.bf16 %v3450_v39, %v3449_v34 }
  0xce   : > { %3841 = vmatmul.mubr.bf16.gmra.mrb[20].mxu1 %v4799_v5  ;;  %v4491_v5 = vld [vmem:[%s5275_s1 + $0x230] sm:$0xff]  }
  0xcf   : > { %4065 = vmatmul.mubr.bf16.gmra.mrb[4].mxu0 %v2313_v53  ;;  %3844 = vmatprep.mubr.bf16.mxu1 %v4823_v8  ;;  %v4492_v8 = vld [vmem:[%s5275_s1 + $0x238] sm:$0xff]   ;;  %v2626_v53 = vpack.c.bf16 %v3452_v47, %v3451_v46 }
  0xd0   : > { %4068 = vmatprep.mubr.bf16.mxu0 %v2314_v55  ;;  %4097 = vmatpush3.bf16.msra.mxu0 %v4486_v50  ;;  %v3229_v55 = vld [vmem:[%s4578_s14 + $0x121] sm:$0xff] }
  0xd1   : > { %4098 = vmatprep.subr.bf16.mxu0 %v4488_v54 }
  0xd4   : > { %4099 = vmatpush3.bf16.msra.mxu0 %v4488_v54  ;;  %v3230_v54 = vld [vmem:[%s4578_s14 + $0x129] sm:$0xff] }
  0xd5   : > { %4100 = vmatprep.subr.bf16.mxu0 %v4489_v60 }
  0xd6   : > { %3845 = vmatmul.mubr.bf16.gmra.mrb[24].mxu1 %v4827_v27  ;;  %v4498_v27 = vld [vmem:[%s5275_s1 + $0x128] sm:$0xff]  }
  0xd7   : > { %4069 = vmatmul.mubr.bf16.gmra.mrb[8].mxu0 %v4644_v49  ;;  %3848 = vmatprep.mubr.bf16.mxu1 %v4849_v43  ;;  %v4494_v49 = vld [vmem:[%s5275_s1 + $0x108] sm:$0xff]   ;;  %v4499_v43 = vld [vmem:[%s5275_s1 + $0x130] sm:$0xff]  }
  0xd8   : > { %4072 = vmatprep.mubr.bf16.mxu0 %v2316_v62  ;;  %4101 = vmatpush3.bf16.msra.mxu0 %v4489_v60  ;;  %v3231_v60 = vld [vmem:[%s4578_s14 + $0x139] sm:$0xff]  ;;  %v3232_v62 = vld [vmem:[%s4578_s14 + $0x141] sm:$0xff] }
  0xd9   : > { %4102 = vmatprep.subr.bf16.mxu0 %v4490_v63 }
  0xdc   : > { %4103 = vmatpush3.bf16.msra.mxu0 %v4490_v63  ;;  %v3455_v63 = vld [vmem:[%s4578_s14 + $0x152] sm:$0xff] }
  0xdd   : > { %4104 = vmatprep.subr.bf16.mxu0 %v4491_v5 }
  0xde   : > { %3849 = vmatmul.mubr.bf16.gmra.mrb[28].mxu1 %v4853_v45  ;;  %v3434_v45 = vld [vmem:[%s4578_s14 + $0x52] sm:$0xff] }
  0xdf   : > { %4073 = vmatmul.mubr.bf16.gmra.mrb[12].mxu0 %v4684_v7  ;;  %3868 = vmatprep.mubr.bf16.mxu1 %v4793_v2  ;;  %v4495_v7 = vld [vmem:[%s5275_s1 + $0x110] sm:$0xff]  }
  0xe0   : > { %4076 = vmatprep.mubr.bf16.mxu0 %v4693_v10  ;;  %4105 = vmatpush3.bf16.msra.mxu0 %v4491_v5  ;;  %v3403_v10 = vld [vmem:[%s4578_s14 + $0x181] sm:$0xff] }
  0xe1   : > { %4106 = vmatprep.subr.bf16.mxu0 %v4492_v8  ;;  %v3456_v5 = vld [vmem:[%s4578_s14 + $0x15a] sm:$0xff] }
  0xe4   : > { %4107 = vmatpush3.bf16.msra.mxu0 %v4492_v8  ;;  %v1402_v8 = vpack.c.bf16 %v3230_v54, %v3229_v55 }
  0xe6   : > { %3869 = vmatmul.mubr.bf16.vlgmr.msra.gmra.mrb[0].mxu1 %v4797_v4  ;;  %v3406_v4 = vld [vmem:[%s4578_s14 + $0x1a1] sm:$0xff] }
  0xe7   : > { %4077 = vmatmul.mubr.bf16.gmra.mrb[16].mxu0 %v4716_v22  ;;  %4148 = vmatpush3.bf16.msra.mxu1 %v4493_v52  ;;  %v3404_v22 = vld [vmem:[%s4578_s14 + $0x189] sm:$0xff] }
  0xe8   : > { %3872 = vmatprep.mubr.bf16.mxu1 %v4821_v21  ;;  %4080 = vmatprep.mubr.bf16.mxu0 %v4720_v24  ;;  %v4496_v24 = vld [vmem:[%s5275_s1 + $0x118] sm:$0xff]   ;;  %v5065_v2 = vpack.c.bf16 %v3404_v22, %v3403_v10  ;;  %v3227_v52 = vld [vmem:[%s4578_s14 + $0x109] sm:$0xff]  ;;  %v2628_v10 = vpack.c.bf16 %v3456_v5, %v3455_v63 }
  0xe9   : > { %4141 = vmatprep.subr.bf16.mxu1 %v4494_v49  ;;  %v3431_v21 = vld [vmem:[%s4578_s14 + $0x32] sm:$0xff]  ;;  %v1401_v50 = vpack.c.bf16 %v3228_v35, %v3227_v52 }
  0xea   : > { %v3233_v22 = vld [vmem:[%s4578_s14 + $0x151] sm:$0xff] }
  0xeb   : > { %4149 = vmatpush3.bf16.msra.mxu1 %v4494_v49  ;;  %v2627_v49 = vpack.c.bf16 %v3454_v57, %v3453_v3 }
  0xec   : > { %4142 = vmatprep.subr.bf16.mxu1 %v4495_v7 }
  0xee   : > { %3873 = vmatmul.mubr.bf16.gmra.mrb[4].mxu1 %v4825_v26  ;;  %v3432_v26 = vld [vmem:[%s4578_s14 + $0x3a] sm:$0xff] }
  0xef   : > { %4081 = vmatmul.mubr.bf16.gmra.mrb[20].mxu0 %v4742_v36  ;;  %3876 = vmatprep.mubr.bf16.mxu1 %v4847_v42  ;;  %v4497_v36 = vld [vmem:[%s5275_s1 + $0x120] sm:$0xff]  }
  0xf0   : > { %4084 = vmatprep.mubr.bf16.mxu0 %v4746_v38  ;;  %4150 = vmatpush3.bf16.msra.mxu1 %v4495_v7  ;;  %v3405_v38 = vld [vmem:[%s4578_s14 + $0x199] sm:$0xff]  ;;  %v1403_v7 = vpack.c.bf16 %v3232_v62, %v3231_v60 }
  0xf1   : > { %4143 = vmatprep.subr.bf16.mxu1 %v4496_v24  ;;  %v2325_v42 = vpack.c.bf16 %v3406_v4, %v3405_v38  ;;  %v3458_v38 = vld [vmem:[%s4578_s14 + $0x172] sm:$0xff]  ;;  %v3235_v4 = vld [vmem:[%s4578_s14 + $0x169] sm:$0xff] }
  0xf4   : > { %4151 = vmatpush3.bf16.msra.mxu1 %v4496_v24  ;;  %v3234_v24 = vld [vmem:[%s4578_s14 + $0x159] sm:$0xff] }
  0xf5   : > { %4144 = vmatprep.subr.bf16.mxu1 %v4497_v36 }
  0xf6   : > { %3877 = vmatmul.mubr.bf16.gmra.mrb[8].mxu1 %v4851_v44  ;;  %v3433_v44 = vld [vmem:[%s4578_s14 + $0x4a] sm:$0xff] }
  0xf7   : > { %4085 = vmatmul.mubr.bf16.gmra.mrb[24].mxu0 %v4768_v51  ;;  %3880 = vmatprep.mubr.bf16.mxu1 %v4871_v58  ;;  %v2616_v51 = vpack.c.bf16 %v3432_v26, %v3431_v21  ;;  %v3435_v58 = vld [vmem:[%s4578_s14 + $0x62] sm:$0xff]  ;;  %v2617_v9 = vpack.c.bf16 %v3434_v45, %v3433_v44  ;;  %v3236_v21 = vld [vmem:[%s4578_s14 + $0x171] sm:$0xff]  ;;  %v3461_v45 = vld [vmem:[%s4578_s14 + $0x19a] sm:$0xff] }
  0xf8   : > { %4088 = vmatprep.mubr.bf16.mxu0 %v5065_v2  ;;  %4152 = vmatpush3.bf16.msra.mxu1 %v4497_v36  ;;  %v3457_v36 = vld [vmem:[%s4578_s14 + $0x16a] sm:$0xff]  ;;  %v3459_v26 = vld [vmem:[%s4578_s14 + $0x182] sm:$0xff] }
  0xf9   : > { %4145 = vmatprep.subr.bf16.mxu1 %v4498_v27 }
  0xfc   : > { %4153 = vmatpush3.bf16.msra.mxu1 %v4498_v27  ;;  %v3460_v27 = vld [vmem:[%s4578_s14 + $0x18a] sm:$0xff] }
  0xfd   : > { %4146 = vmatprep.subr.bf16.mxu1 %v4499_v43  ;;  %v2630_v44 = vpack.c.bf16 %v3460_v27, %v3459_v26 }
  0xfe   : > { %3881 = vmatmul.mubr.bf16.gmra.mrb[12].mxu1 %v4873_v61  ;;  %v2618_v61 = vpack.c.bf16 %v3436_v0, %v3435_v58  ;;  %v3462_v58 = vld [vmem:[%s4578_s14 + $0x1a2] sm:$0xff] }
  0xff   : > { %4089 = vmatmul.mubr.bf16.gmra.mrb[28].mxu0 %v2325_v42  ;;  %3884 = vmatprep.mubr.bf16.mxu1 %v4890_v14  ;;  %v3437_v14 = vld [vmem:[%s4578_s14 + $0x7a] sm:$0xff]  ;;  %v1404_v42 = vpack.c.bf16 %v3234_v24, %v3233_v22  ;;  %v2631_v0 = vpack.c.bf16 %v3462_v58, %v3461_v45 }
 0x100   : > { %4108 = vmatprep.mubr.bf16.mxu0 %v2616_v51  ;;  %4154 = vmatpush3.bf16.msra.mxu1 %v4499_v43  ;;  %v2619_v23 = vpack.c.bf16 %v3438_v6, %v3437_v14  ;;  %v2629_v51 = vpack.c.bf16 %v3458_v38, %v3457_v36  ;;  %v1405_v43 = vpack.c.bf16 %v3236_v21, %v3235_v4 }
 0x101   : > { %4147 = vmatprep.subr.bf16.mxu1 %v4500_v59 }
 0x104   : > { %4155 = vmatpush3.bf16.msra.mxu1 %v4500_v59 }
 0x106   : > { %3885 = vmatmul.mubr.bf16.gmra.mrb[16].mxu1 %v4892_v15  ;;  %v3441_v15 = vld [vmem:[%s4578_s14 + $0xaa] sm:$0xff] }
 0x107   : > { %4109 = vmatmul.mubr.bf16.vlgmr.msra.gmra.mrb[0].mxu0 %v2617_v9  ;;  %3888 = vmatprep.mubr.bf16.mxu1 %v4910_v29  ;;  %v3442_v29 = vld [vmem:[%s4578_s14 + $0xb2] sm:$0xff] }
 0x108   : > { %4112 = vmatprep.mubr.bf16.mxu0 %v2618_v61  ;;  %v2621_v25 = vpack.c.bf16 %v3442_v29, %v3441_v15 }
 0x10e   : > { %3889 = vmatmul.mubr.bf16.gmra.mrb[20].mxu1 %v4912_v30  ;;  %v3445_v30 = vld [vmem:[%s4578_s14 + $0xda] sm:$0xff] }
 0x10f   : > { %4113 = vmatmul.mubr.bf16.gmra.mrb[4].mxu0 %v2619_v23  ;;  %3892 = vmatprep.mubr.bf16.mxu1 %v4928_v40  ;;  %v3446_v40 = vld [vmem:[%s4578_s14 + $0xe2] sm:$0xff] }
 0x110   : > { %4116 = vmatprep.mubr.bf16.mxu0 %v2620_v16  ;;  %v2623_v31 = vpack.c.bf16 %v3446_v40, %v3445_v30  ;;  %v5156_v40 = vld [vmem:[%s5276_s2] ss:$0 sm:$0xff] }
 0x116   : > { %3893 = vmatmul.mubr.bf16.gmra.mrb[24].mxu1 %v4930_v41  ;;  %v1399_v41 = vpack.c.bf16 %v3224_v37, %v3223_v20 }
 0x117   : > { %4117 = vmatmul.mubr.bf16.gmra.mrb[8].mxu0 %v2621_v25  ;;  %3896 = vmatprep.mubr.bf16.mxu1 %v4946_v56  ;;  %v3225_v56 = vld [vmem:[%s4578_s14 + $0xf1] sm:$0xff] }
 0x118   : > { %4120 = vmatprep.mubr.bf16.mxu0 %v2622_v19 }
 0x11e   : > { %3897 = vmatmul.mubr.bf16.gmra.mrb[28].mxu1 %v4980_v13  ;;  %v1400_v13 = vpack.c.bf16 %v3226_v33, %v3225_v56 }
 0x11f   : > { %4121 = vmatmul.mubr.bf16.gmra.mrb[12].mxu0 %v2623_v31  ;;  %3932 = vmatprep.mubr.bf16.mxu1 %v1399_v41 }
 0x120   : > { %4124 = vmatprep.mubr.bf16.mxu0 %v2624_v32 }
 0x126   : > { %3933 = vmatmul.mubr.bf16.vlgmr.msra.gmra.mrb[16].mxu1 %v1400_v13 }
 0x127   : > { %4125 = vmatmul.mubr.bf16.gmra.mrb[16].mxu0 %v2625_v48  ;;  %3936 = vmatprep.mubr.bf16.mxu1 %v1401_v50 }
 0x128   : > { %4128 = vmatprep.mubr.bf16.mxu0 %v2626_v53 }
 0x12e   : > { %3937 = vmatmul.mubr.bf16.gmra.mrb[20].mxu1 %v1402_v8 }
 0x12f   : > { %4129 = vmatmul.mubr.bf16.gmra.mrb[20].mxu0 %v2627_v49  ;;  %3940 = vmatprep.mubr.bf16.mxu1 %v1403_v7 }
 0x130   : > { %4132 = vmatprep.mubr.bf16.mxu0 %v2628_v10 }
 0x136   : > { %3941 = vmatmul.mubr.bf16.gmra.mrb[24].mxu1 %v1404_v42 }
 0x137   : > { %4133 = vmatmul.mubr.bf16.gmra.mrb[24].mxu0 %v2629_v51  ;;  %3944 = vmatprep.mubr.bf16.mxu1 %v1405_v43 }
 0x138   : > { %4136 = vmatprep.mubr.bf16.mxu0 %v2630_v44 }
 0x13e   : > { %3945 = vmatmul.mubr.bf16.gmra.mrb[28].mxu1 %v5065_v2 }
 0x13f   : > { %4137 = vmatmul.mubr.bf16.gmra.mrb[28].mxu0 %v2631_v0 }
 0x1b9   : > { %v3870_v59 = vpop.f32.mrb[0].mxu1 }
 0x1ba   : > { %v1200_v9 = vpop.f32.mrb[1].mxu1 }
 0x1bb   : > { %v3871_v61 = vpop.f32.mrb[2].mxu1 }
 0x1bc   : > { %v1203_v14 = vpop.f32.mrb[3].mxu1 }
 0x1c1   : > { %v3874_v6 = vpop.f32.mrb[4].mxu1 }
 0x1c2   : > { %v1216_v12 = vpop.f32.mrb[5].mxu1 }
 0x1c3   : > { %v3875_v11 = vpop.f32.mrb[6].mxu1 }
 0x1c4   : > { %v1219_v23 = vpop.f32.mrb[7].mxu1 }
 0x1c9   : > { %v3878_v16 = vpop.f32.mrb[8].mxu1 }
 0x1ca   : > { %v1232_v15 = vpop.f32.mrb[9].mxu1 }
 0x1cb   : > { %v5141_v29 = vpop.f32.mrb[10].mxu1 }
 0x1cc   : > { %v5143_v17 = vpop.f32.mrb[11].mxu1 }
 0x1d1   : > { %v5145_v18 = vpop.f32.mrb[12].mxu1 }
 0x1d2   : > { %v5147_v25 = vpop.f32.mrb[13].mxu1 }
 0x1d3   : > { %v5149_v2 = vpop.f32.mrb[14].mxu1 }
 0x1d4   : > { %v5151_v19 = vpop.f32.mrb[15].mxu1 }
 0x1da   : > { %v4110_v30 = vpop.f32.mrb[0].mxu0 }
 0x1db   : > { %v4156_v20 = vadd.f32 %v4110_v30, %v3870_v59  ;;  %v2731_v37 = vpop.f32.mrb[1].mxu0 }
 0x1dc   : > { %v4157_v1 = vadd.f32 %v2731_v37, %v1200_v9  ;;  %v4111_v31 = vpop.f32.mrb[2].mxu0 }
 0x1dd   : > { %v2899_v41 = vmul.f32 %v4156_v20, %v5156_v40  ;;  %v4158_v32 = vadd.f32 %v4111_v31, %v3871_v61  ;;  %v2734_v56 = vpop.f32.mrb[3].mxu0 }
 0x1de   : > { %v2897_v33 = vmul.f32 %v4157_v1, %v5156_v40  ;;  %v4159_v34 = vadd.f32 %v2734_v56, %v1203_v14 }
 0x1df   : > { %v2938_v39 = vadd.f32 %v5161_v28, %v2899_v41  ;;  %v2900_v52 = vmul.f32 %v4158_v32, %v5156_v40 }
 0x1e0   : > { %v2936_v35 = vadd.f32 %v5161_v28, %v2897_v33  ;;  %v2898_v46 = vmul.f32 %v4159_v34, %v5156_v40 }
 0x1e1   : > { %v2970_v47 = vmax.f32 %v2938_v39, 0.0  ;;  %v2939_v13 = vadd.f32 %v5161_v28, %v2900_v52 }
 0x1e2   : > { %v2968_v48 = vmax.f32 %v2936_v35, 0.0  ;;  %v2937_v50 = vadd.f32 %v5161_v28, %v2898_v46  ;;  %v4114_v53 = vpop.f32.mrb[4].mxu0 }
 0x1e3   : > { %3002 = vst [vmem:[%s5171_s25 + $0x10] sm:$0xff] %v2970_v47  ;;  %v2971_v55 = vmax.f32 %v2939_v13, 0.0  ;;  %v4160_v54 = vadd.f32 %v4114_v53, %v3874_v6  ;;  %v2747_v3 = vpop.f32.mrb[5].mxu0 }
 0x1e4   : > { %3000 = vst [vmem:[%s5171_s25] sm:$0xff] %v2968_v48  ;;  %v2969_v57 = vmax.f32 %v2937_v50, 0.0  ;;  %v4161_v60 = vadd.f32 %v2747_v3, %v1216_v12  ;;  %v4115_v62 = vpop.f32.mrb[6].mxu0 }
 0x1e5   : > { %3003 = vst [vmem:[%s5171_s25 + $0x18] sm:$0xff] %v2971_v55  ;;  %v2903_v63 = vmul.f32 %v4160_v54, %v5156_v40  ;;  %v4162_v5 = vadd.f32 %v4115_v62, %v3875_v11  ;;  %v2750_v8 = vpop.f32.mrb[7].mxu0 }
 0x1e6   : > { %3001 = vst [vmem:[%s5171_s25 + $0x8] sm:$0xff] %v2969_v57  ;;  %v2901_v49 = vmul.f32 %v4161_v60, %v5156_v40  ;;  %v4163_v7 = vadd.f32 %v2750_v8, %v1219_v23 }
 0x1e7   : > { %v2942_v10 = vadd.f32 %v5161_v28, %v2903_v63  ;;  %v2904_v22 = vmul.f32 %v4162_v5, %v5156_v40 }
 0x1e8   : > { %v2940_v24 = vadd.f32 %v5161_v28, %v2901_v49  ;;  %v2902_v36 = vmul.f32 %v4163_v7, %v5156_v40 }
 0x1e9   : > { %v2974_v38 = vmax.f32 %v2942_v10, 0.0  ;;  %v2943_v4 = vadd.f32 %v5161_v28, %v2904_v22 }
 0x1ea   : > { %v2972_v21 = vmax.f32 %v2940_v24, 0.0  ;;  %v2941_v26 = vadd.f32 %v5161_v28, %v2902_v36  ;;  %v4118_v27 = vpop.f32.mrb[8].mxu0 }
 0x1eb   : > { %3006 = vst [vmem:[%s5171_s25 + $0x30] sm:$0xff] %v2974_v38  ;;  %v2975_v42 = vmax.f32 %v2943_v4, 0.0  ;;  %v4164_v51 = vadd.f32 %v4118_v27, %v3878_v16  ;;  %v2763_v43 = vpop.f32.mrb[9].mxu0 }
 0x1ec   : > { %3004 = vst [vmem:[%s5171_s25 + $0x20] sm:$0xff] %v2972_v21  ;;  %v2973_v44 = vmax.f32 %v2941_v26, 0.0  ;;  %v4165_v45 = vadd.f32 %v2763_v43, %v1232_v15  ;;  %v4119_v58 = vpop.f32.mrb[10].mxu0 }
 0x1ed   : > { %3007 = vst [vmem:[%s5171_s25 + $0x38] sm:$0xff] %v2975_v42  ;;  %v2907_v0 = vmul.f32 %v4164_v51, %v5156_v40  ;;  %v4166_v59 = vadd.f32 %v4119_v58, %v5141_v29  ;;  %v2766_v9 = vpop.f32.mrb[11].mxu0 }
 0x1ee   : > { %3005 = vst [vmem:[%s5171_s25 + $0x28] sm:$0xff] %v2973_v44  ;;  %v2905_v61 = vmul.f32 %v4165_v45, %v5156_v40  ;;  %v4167_v14 = vadd.f32 %v2766_v9, %v5143_v17 }
 0x1ef   : > { %v2946_v6 = vadd.f32 %v5161_v28, %v2907_v0  ;;  %v2908_v12 = vmul.f32 %v4166_v59, %v5156_v40 }
 0x1f0   : > { %v2944_v11 = vadd.f32 %v5161_v28, %v2905_v61  ;;  %v2906_v23 = vmul.f32 %v4167_v14, %v5156_v40 }
 0x1f1   : > { %v2978_v16 = vmax.f32 %v2946_v6, 0.0  ;;  %v2947_v15 = vadd.f32 %v5161_v28, %v2908_v12 }
 0x1f2   : > { %v2976_v29 = vmax.f32 %v2944_v11, 0.0  ;;  %v2945_v30 = vadd.f32 %v5161_v28, %v2906_v23  ;;  %v4122_v20 = vpop.f32.mrb[12].mxu0 }
 0x1f3   : > { %3010 = vst [vmem:[%s5171_s25 + $0x50] sm:$0xff] %v2978_v16  ;;  %v2979_v37 = vmax.f32 %v2947_v15, 0.0  ;;  %v4168_v17 = vadd.f32 %v4122_v20, %v5145_v18  ;;  %v2779_v1 = vpop.f32.mrb[13].mxu0 }
 0x1f4   : > { %3008 = vst [vmem:[%s5171_s25 + $0x40] sm:$0xff] %v2976_v29  ;;  %v2977_v31 = vmax.f32 %v2945_v30, 0.0  ;;  %v4169_v41 = vadd.f32 %v2779_v1, %v5147_v25  ;;  %v4123_v32 = vpop.f32.mrb[14].mxu0 }
 0x1f5   : > { %3011 = vst [vmem:[%s5171_s25 + $0x58] sm:$0xff] %v2979_v37  ;;  %v2911_v56 = vmul.f32 %v4168_v17, %v5156_v40  ;;  %v4170_v33 = vadd.f32 %v4123_v32, %v5149_v2  ;;  %v2782_v34 = vpop.f32.mrb[15].mxu0 }
 0x1f6   : > { %3009 = vst [vmem:[%s5171_s25 + $0x48] sm:$0xff] %v2977_v31  ;;  %v2909_v39 = vmul.f32 %v4169_v41, %v5156_v40  ;;  %v4171_v52 = vadd.f32 %v2782_v34, %v5151_v19 }
 0x1f7   : > { %v2950_v18 = vadd.f32 %v5161_v28, %v2911_v56  ;;  %v2912_v35 = vmul.f32 %v4170_v33, %v5156_v40 }
 0x1f8   : > { %v2948_v25 = vadd.f32 %v5161_v28, %v2909_v39  ;;  %v2910_v46 = vmul.f32 %v4171_v52, %v5156_v40 }
 0x1f9   : > { %v2982_v47 = vmax.f32 %v2950_v18, 0.0  ;;  %v2951_v13 = vadd.f32 %v5161_v28, %v2912_v35  ;;  %v3934_v2 = vpop.f32.mrb[16].mxu1 }
 0x1fa   : > { %v2980_v48 = vmax.f32 %v2948_v25, 0.0  ;;  %v2949_v50 = vadd.f32 %v5161_v28, %v2910_v46  ;;  %v4126_v53 = vpop.f32.mrb[16].mxu0  ;;  %v1570_v19 = vpop.f32.mrb[17].mxu1 }
 0x1fb   : > { %3014 = vst [vmem:[%s5171_s25 + $0x70] sm:$0xff] %v2982_v47  ;;  %v2983_v55 = vmax.f32 %v2951_v13, 0.0  ;;  %v4172_v54 = vadd.f32 %v4126_v53, %v3934_v2  ;;  %v2795_v3 = vpop.f32.mrb[17].mxu0  ;;  %v3935_v57 = vpop.f32.mrb[18].mxu1 }
 0x1fc   : > { %3012 = vst [vmem:[%s5171_s25 + $0x60] sm:$0xff] %v2980_v48  ;;  %v2981_v60 = vmax.f32 %v2949_v50, 0.0  ;;  %v4173_v62 = vadd.f32 %v2795_v3, %v1570_v19  ;;  %v4127_v63 = vpop.f32.mrb[18].mxu0  ;;  %v1573_v5 = vpop.f32.mrb[19].mxu1 }
 0x1fd   : > { %3015 = vst [vmem:[%s5171_s25 + $0x78] sm:$0xff] %v2983_v55  ;;  %v2915_v8 = vmul.f32 %v4172_v54, %v5156_v40  ;;  %v4174_v49 = vadd.f32 %v4127_v63, %v3935_v57  ;;  %v2798_v7 = vpop.f32.mrb[19].mxu0 }
 0x1fe   : > { %3013 = vst [vmem:[%s5171_s25 + $0x68] sm:$0xff] %v2981_v60  ;;  %v2913_v10 = vmul.f32 %v4173_v62, %v5156_v40  ;;  %v4175_v22 = vadd.f32 %v2798_v7, %v1573_v5 }
 0x1ff   : > { %v2954_v24 = vadd.f32 %v5161_v28, %v2915_v8  ;;  %v2916_v36 = vmul.f32 %v4174_v49, %v5156_v40 }
 0x200   : > { %v2952_v38 = vadd.f32 %v5161_v28, %v2913_v10  ;;  %v2914_v4 = vmul.f32 %v4175_v22, %v5156_v40 }
 0x201   : > { %v2986_v21 = vmax.f32 %v2954_v24, 0.0  ;;  %v2955_v26 = vadd.f32 %v5161_v28, %v2916_v36  ;;  %v3938_v27 = vpop.f32.mrb[20].mxu1 }
 0x202   : > { %v2984_v42 = vmax.f32 %v2952_v38, 0.0  ;;  %v2953_v51 = vadd.f32 %v5161_v28, %v2914_v4  ;;  %v4130_v43 = vpop.f32.mrb[20].mxu0  ;;  %v1586_v44 = vpop.f32.mrb[21].mxu1 }
 0x203   : > { %3018 = vst [vmem:[%s5171_s25 + $0x90] sm:$0xff] %v2986_v21  ;;  %v2987_v45 = vmax.f32 %v2955_v26, 0.0  ;;  %v4176_v58 = vadd.f32 %v4130_v43, %v3938_v27  ;;  %v2811_v0 = vpop.f32.mrb[21].mxu0  ;;  %v3939_v59 = vpop.f32.mrb[22].mxu1 }
 0x204   : > { %3016 = vst [vmem:[%s5171_s25 + $0x80] sm:$0xff] %v2984_v42  ;;  %v2985_v9 = vmax.f32 %v2953_v51, 0.0  ;;  %v4177_v61 = vadd.f32 %v2811_v0, %v1586_v44  ;;  %v4131_v14 = vpop.f32.mrb[22].mxu0  ;;  %v1589_v6 = vpop.f32.mrb[23].mxu1 }
 0x205   : > { %3019 = vst [vmem:[%s5171_s25 + $0x98] sm:$0xff] %v2987_v45  ;;  %v2919_v12 = vmul.f32 %v4176_v58, %v5156_v40  ;;  %v4178_v11 = vadd.f32 %v4131_v14, %v3939_v59  ;;  %v2814_v23 = vpop.f32.mrb[23].mxu0 }
 0x206   : > { %3017 = vst [vmem:[%s5171_s25 + $0x88] sm:$0xff] %v2985_v9  ;;  %v2917_v16 = vmul.f32 %v4177_v61, %v5156_v40  ;;  %v4179_v15 = vadd.f32 %v2814_v23, %v1589_v6 }
 0x207   : > { %v2958_v29 = vadd.f32 %v5161_v28, %v2919_v12  ;;  %v2920_v30 = vmul.f32 %v4178_v11, %v5156_v40 }
 0x208   : > { %v2956_v20 = vadd.f32 %v5161_v28, %v2917_v16  ;;  %v2918_v37 = vmul.f32 %v4179_v15, %v5156_v40 }
 0x209   : > { %v2990_v17 = vmax.f32 %v2958_v29, 0.0  ;;  %v2959_v1 = vadd.f32 %v5161_v28, %v2920_v30  ;;  %v3942_v31 = vpop.f32.mrb[24].mxu1 }
 0x20a   : > { %v2988_v41 = vmax.f32 %v2956_v20, 0.0  ;;  %v2957_v32 = vadd.f32 %v5161_v28, %v2918_v37  ;;  %v4134_v56 = vpop.f32.mrb[24].mxu0  ;;  %v1602_v33 = vpop.f32.mrb[25].mxu1 }
 0x20b   : > { %3022 = vst [vmem:[%s5171_s25 + $0xb0] sm:$0xff] %v2990_v17  ;;  %v2991_v34 = vmax.f32 %v2959_v1, 0.0  ;;  %v4180_v39 = vadd.f32 %v4134_v56, %v3942_v31  ;;  %v2827_v52 = vpop.f32.mrb[25].mxu0  ;;  %v3943_v18 = vpop.f32.mrb[26].mxu1 }
 0x20c   : > { %3020 = vst [vmem:[%s5171_s25 + $0xa0] sm:$0xff] %v2988_v41  ;;  %v2989_v35 = vmax.f32 %v2957_v32, 0.0  ;;  %v4181_v25 = vadd.f32 %v2827_v52, %v1602_v33  ;;  %v4135_v46 = vpop.f32.mrb[26].mxu0  ;;  %v1605_v47 = vpop.f32.mrb[27].mxu1 }
 0x20d   : > { %3023 = vst [vmem:[%s5171_s25 + $0xb8] sm:$0xff] %v2991_v34  ;;  %v2923_v13 = vmul.f32 %v4180_v39, %v5156_v40  ;;  %v4182_v2 = vadd.f32 %v4135_v46, %v3943_v18  ;;  %v2830_v48 = vpop.f32.mrb[27].mxu0 }
 0x20e   : > { %3021 = vst [vmem:[%s5171_s25 + $0xa8] sm:$0xff] %v2989_v35  ;;  %v2921_v50 = vmul.f32 %v4181_v25, %v5156_v40  ;;  %v4183_v53 = vadd.f32 %v2830_v48, %v1605_v47 }
 0x20f   : > { %v2962_v19 = vadd.f32 %v5161_v28, %v2923_v13  ;;  %v2924_v55 = vmul.f32 %v4182_v2, %v5156_v40 }
 0x210   : > { %v2960_v54 = vadd.f32 %v5161_v28, %v2921_v50  ;;  %v2922_v3 = vmul.f32 %v4183_v53, %v5156_v40 }
 0x211   : > { %v2994_v57 = vmax.f32 %v2962_v19, 0.0  ;;  %v2963_v60 = vadd.f32 %v5161_v28, %v2924_v55  ;;  %v3946_v62 = vpop.f32.mrb[28].mxu1 }
 0x212   : > { %v2992_v63 = vmax.f32 %v2960_v54, 0.0  ;;  %v2961_v5 = vadd.f32 %v5161_v28, %v2922_v3  ;;  %v4138_v8 = vpop.f32.mrb[28].mxu0  ;;  %v1618_v49 = vpop.f32.mrb[29].mxu1 }
 0x213   : > { %3026 = vst [vmem:[%s5171_s25 + $0xd0] sm:$0xff] %v2994_v57  ;;  %v2995_v7 = vmax.f32 %v2963_v60, 0.0  ;;  %v4184_v10 = vadd.f32 %v4138_v8, %v3946_v62  ;;  %v2843_v22 = vpop.f32.mrb[29].mxu0  ;;  %v3947_v24 = vpop.f32.mrb[30].mxu1 }
 0x214   : > { %3024 = vst [vmem:[%s5171_s25 + $0xc0] sm:$0xff] %v2992_v63  ;;  %v2993_v36 = vmax.f32 %v2961_v5, 0.0  ;;  %v4185_v38 = vadd.f32 %v2843_v22, %v1618_v49  ;;  %v4139_v4 = vpop.f32.mrb[30].mxu0  ;;  %v1621_v21 = vpop.f32.mrb[31].mxu1 }
 0x215   : > { %3027 = vst [vmem:[%s5171_s25 + $0xd8] sm:$0xff] %v2995_v7  ;;  %v2927_v26 = vmul.f32 %v4184_v10, %v5156_v40  ;;  %v4186_v27 = vadd.f32 %v4139_v4, %v3947_v24  ;;  %v2846_v42 = vpop.f32.mrb[31].mxu0 }
 0x216   : > { %3025 = vst [vmem:[%s5171_s25 + $0xc8] sm:$0xff] %v2993_v36  ;;  %v2925_v51 = vmul.f32 %v4185_v38, %v5156_v40  ;;  %v4187_v43 = vadd.f32 %v2846_v42, %v1621_v21 }
 0x217   : > { %v2966_v44 = vadd.f32 %v5161_v28, %v2927_v26  ;;  %v2928_v45 = vmul.f32 %v4186_v27, %v5156_v40 }
 0x218   : > { %v2964_v58 = vadd.f32 %v5161_v28, %v2925_v51  ;;  %v2926_v0 = vmul.f32 %v4187_v43, %v5156_v40 }
 0x219   : > { %v2998_v59 = vmax.f32 %v2966_v44, 0.0  ;;  %v2967_v9 = vadd.f32 %v5161_v28, %v2928_v45 }
 0x21a   : > { %v2996_v61 = vmax.f32 %v2964_v58, 0.0  ;;  %v2965_v14 = vadd.f32 %v5161_v28, %v2926_v0 }
 0x21b   : > { %3030 = vst [vmem:[%s5171_s25 + $0xf0] sm:$0xff] %v2998_v59  ;;  %v2999_v6 = vmax.f32 %v2967_v9, 0.0 }
 0x21c   : > { %3028 = vst [vmem:[%s5171_s25 + $0xe0] sm:$0xff] %v2996_v61  ;;  %v2997_v12 = vmax.f32 %v2965_v14, 0.0 }
 0x21d   : > { %3031 = vst [vmem:[%s5171_s25 + $0xf8] sm:$0xff] %v2999_v6 }
 0x21e   : > { %3029 = vst [vmem:[%s5171_s25 + $0xe8] sm:$0xff] %v2997_v12 }
 0x21f PF: > { %s14_s15 = sadd.s32 1, %s4507_s15  }
 0x220   : > { %p11_p4 = scmp.ge.s32.totalorder %s14_s15, 4  }
 0x222   :  { %13 = sbr.rel (!%p11_p4) target bundleno = 1 (0x1), region = 76 }

</bundles_post_ra>
